<compile_context>
chip_gen: v5e
topology: v5e:2x2
jax: 0.10.0
libtpu: 0.0.40
codegen_flags: <defaults>
</compile_context>

<pallas_src>
import functools
import math

import jax
import jax.numpy as jnp
import numpy as np
from jax.experimental import pallas as pl
from jax.experimental.pallas import tpu as pltpu


def _round_up(n, m):
    return (n + m - 1) // m * m


def _residual_block_kernel(len_ref, x_hbm, c_ref, wc_ref, wa_ref, bg_ref,
                           wo_ref, bo_ref, out_ref, xbuf, sem, *,
                           kernel_size, dilation, pad, tile_t, win_t,
                           half_p, c_res_p):
    """One (batch, time-tile) grid step.

    len_ref : (B,) int32 SMEM        per-batch valid length (scalar prefetch)
    x_hbm   : (B, Tx, Cres_p) bf16   un-duplicated padded input, HBM (pl.ANY)
    c_ref   : (1, tile_t, Caux_p)    bf16 local conditioning tile
    wc_ref  : (K, Cres_p, 2*Half_p)  bf16 dilated-conv weights (tanh|sigmoid fused)
    wa_ref  : (Caux_p, 2*Half_p)     bf16 aux 1x1 weights (fused halves)
    bg_ref  : (1, 2*Half_p)          f32  conv bias (fused halves)
    wo_ref  : (Half_p, Cres_p+Cskip_p) bf16 output 1x1 weights (packed [res|skip])
    bo_ref  : (1, Cres_p+Cskip_p)    f32  output bias (packed)
    out_ref : (1, tile_t, Cres_p+Cskip_p) bf16 packed [residual | skip] output
    xbuf    : (2, win_t, Cres_p) bf16 VMEM   double-buffered x window (with halo)
    sem     : (2,) DMA semaphores
    """
    b = pl.program_id(0)
    t = pl.program_id(1)
    n_t = pl.num_programs(1)

    def x_copy(tt, slot):
        return pltpu.make_async_copy(
            x_hbm.at[b, pl.ds(tt * tile_t, win_t), :],
            xbuf.at[slot], sem.at[slot])

    slot = t % 2

    @pl.when(t == 0)
    def _():                      # prime the pipeline for this batch row
        x_copy(t, slot).start()

    x_copy(t, slot).wait()

    @pl.when(t + 1 < n_t)
    def _():                      # prefetch next time-tile while computing
        x_copy(t + 1, 1 - slot).start()

    xw = xbuf.at[slot]            # (win_t, Cres_p) view, no load yet

    # --- gated dilated conv: fused tanh|sigmoid halves, K accumulated matmuls.
    cond = c_ref[0]                                        # (tile_t, Caux_p)
    acc = (jnp.dot(cond, wa_ref[...], preferred_element_type=jnp.float32)
           + bg_ref[...])
    for k in range(kernel_size):
        tap = xw[pl.ds(k * dilation, tile_t), :]           # (tile_t, Cres_p) bf16
        acc = acc + jnp.dot(tap, wc_ref[k],
                            preferred_element_type=jnp.float32)

    xa = acc[:, :half_p]                                   # 128-lane-aligned slices
    xb = acc[:, half_p:]
    z = (jnp.tanh(xa) * jax.nn.sigmoid(xb)).astype(wo_ref.dtype)

    # --- 1x1 output conv (packed [res | skip] columns) + in-kernel length mask.
    out = (jnp.dot(z, wo_ref[...], preferred_element_type=jnp.float32)
           + bo_ref[...])
    row = jax.lax.broadcasted_iota(jnp.int32, (tile_t, 1), 0) + t * tile_t
    out = out * (row < len_ref[b]).astype(jnp.float32)

    # --- residual add on the first Cres_p columns; two lane-aligned stores.
    resid = xw[pl.ds(pad, tile_t), :].astype(jnp.float32)
    out_ref[0, :, :c_res_p] = (out[:, :c_res_p] + resid).astype(out_ref.dtype)
    out_ref[0, :, c_res_p:] = out[:, c_res_p:].astype(out_ref.dtype)


def residual_block_forward(x, x_mask, c, params, *, kernel_size, dilation,
                           tile_t=1024, lane=128):
    """x: (B, Cres, T), x_mask: (B, 1, T) prefix mask, c: (B, Caux, T) (NCT).

    Returns (res, skip) in NCT layout, matching ResidualBlock.forward.
    """
    B, c_res, T = x.shape
    c_aux = c.shape[1]
    conv_w = params["conv_w"]                    # (Cgate, Cres, K) torch layout
    c_gate, _, K = conv_w.shape
    assert K == kernel_size
    half = c_gate // 2
    c_out_total = params["out_w"].shape[0]
    c_skip = c_out_total - c_res
    pad = (kernel_size - 1) // 2 * dilation

    # ---- lane-dense channel padding ---------------------------------------
    c_res_p = _round_up(c_res, lane)
    c_aux_p = _round_up(c_aux, lane)
    half_p = _round_up(half, lane)
    gate_p = 2 * half_p
    c_skip_p = _round_up(c_skip, lane)
    c_out_p = c_res_p + c_skip_p

    # ---- time tiling --------------------------------------------------------
    tile_t = min(int(tile_t), _round_up(T, 16))
    tile_t = _round_up(tile_t, 16)
    n_t = pl.cdiv(T, tile_t)
    t_grid = n_t * tile_t
    win_t = _round_up(tile_t + 2 * pad, 16)      # x window rows incl. conv halo
    t_x_len = (n_t - 1) * tile_t + win_t         # padded x time extent

    # ---- weight re-layout (once, outside the kernel) -----------------------
    wt = jnp.transpose(conv_w, (2, 1, 0))                      # (K, Cres, Cgate)
    wt = jnp.pad(wt, ((0, 0), (0, c_res_p - c_res), (0, 0)))
    wc = jnp.concatenate(
        [jnp.pad(wt[..., :half], ((0, 0), (0, 0), (0, half_p - half))),
         jnp.pad(wt[..., half:], ((0, 0), (0, 0), (0, half_p - half)))],
        axis=-1).astype(jnp.bfloat16)                          # (K, Cres_p, 2*Half_p)

    wat = jnp.transpose(params["aux_w"][:, :, 0], (1, 0))      # (Caux, Cgate)
    wat = jnp.pad(wat, ((0, c_aux_p - c_aux), (0, 0)))
    wa = jnp.concatenate(
        [jnp.pad(wat[:, :half], ((0, 0), (0, half_p - half))),
         jnp.pad(wat[:, half:], ((0, 0), (0, half_p - half)))],
        axis=-1).astype(jnp.bfloat16)                          # (Caux_p, 2*Half_p)

    conv_b = params["conv_b"].astype(jnp.float32)
    bg = jnp.concatenate([jnp.pad(conv_b[:half], (0, half_p - half)),
                          jnp.pad(conv_b[half:], (0, half_p - half))]
                         ).reshape(1, gate_p)

    wot = jnp.transpose(params["out_w"][:, :, 0], (1, 0))      # (half, Cres+Cskip)
    wot = jnp.pad(wot, ((0, half_p - half), (0, 0)))
    wout = jnp.concatenate(
        [jnp.pad(wot[:, :c_res], ((0, 0), (0, c_res_p - c_res))),
         jnp.pad(wot[:, c_res:], ((0, 0), (0, c_skip_p - c_skip)))],
        axis=-1).astype(jnp.bfloat16)                          # (Half_p, Cout_p)

    out_b = params["out_b"].astype(jnp.float32)
    bout = jnp.concatenate([jnp.pad(out_b[:c_res], (0, c_res_p - c_res)),
                            jnp.pad(out_b[c_res:], (0, c_skip_p - c_skip))]
                           ).reshape(1, c_out_p)

    # ---- activation re-layout: NTC, channel pad, bf16; NO halo duplication --
    x_t = jnp.transpose(x, (0, 2, 1))                          # (B, T, Cres)
    x_t = jnp.pad(x_t, ((0, 0), (0, 0), (0, c_res_p - c_res)))
    xp = jnp.pad(x_t, ((0, 0), (pad, t_x_len - pad - T), (0, 0))
                 ).astype(jnp.bfloat16)                        # (B, t_x_len, Cres_p)

    c_t = jnp.transpose(c, (0, 2, 1))                          # (B, T, Caux)
    c_t = jnp.pad(c_t, ((0, 0), (0, t_grid - T), (0, c_aux_p - c_aux))
                  ).astype(jnp.bfloat16)                       # (B, t_grid, Caux_p)

    # Per-batch valid lengths (x_mask assumed to be a prefix/non-pad mask).
    lengths = jnp.rint(jnp.sum(x_mask[:, 0, :].astype(jnp.float32), axis=-1)
                       ).astype(jnp.int32)                     # (B,)

    kernel = functools.partial(_residual_block_kernel,
                               kernel_size=K, dilation=dilation, pad=pad,
                               tile_t=tile_t, win_t=win_t,
                               half_p=half_p, c_res_p=c_res_p)

    grid_spec = pltpu.PrefetchScalarGridSpec(
        num_scalar_prefetch=1,
        grid=(B, n_t),
        in_specs=[
            pl.BlockSpec(memory_space=pl.ANY),                               # x (HBM)
            pl.BlockSpec((1, tile_t, c_aux_p), lambda b, t, lens: (b, t, 0)),
            pl.BlockSpec((K, c_res_p, gate_p), lambda b, t, lens: (0, 0, 0)),
            pl.BlockSpec((c_aux_p, gate_p), lambda b, t, lens: (0, 0)),
            pl.BlockSpec((1, gate_p), lambda b, t, lens: (0, 0)),
            pl.BlockSpec((half_p, c_out_p), lambda b, t, lens: (0, 0)),
            pl.BlockSpec((1, c_out_p), lambda b, t, lens: (0, 0)),
        ],
        out_specs=pl.BlockSpec((1, tile_t, c_out_p), lambda b, t, lens: (b, t, 0)),
        scratch_shapes=[
            pltpu.VMEM((2, win_t, c_res_p), jnp.bfloat16),   # double-buffered x window
            pltpu.SemaphoreType.DMA((2,)),
        ],
    )

    # Time axis is "arbitrary" (sequential per batch row: needed for the manual
    # double-buffered halo DMA); batch axis is "parallel" for megacore / v7x.
    out_all = pl.pallas_call(
        kernel,
        grid_spec=grid_spec,
        out_shape=jax.ShapeDtypeStruct((B, t_grid, c_out_p), jnp.bfloat16),
        compiler_params=pltpu.CompilerParams(
            dimension_semantics=("parallel", "arbitrary")),
    )(lengths, xp, c_t, wc, wa, bg, wout, bout)

    # Unpack [res (Cres_p) | skip (Cskip_p)] -> NCT, drop channel/time padding.
    res = jnp.transpose(out_all[:, :T, :c_res], (0, 2, 1)).astype(x.dtype)
    skip = jnp.transpose(out_all[:, :T, c_res_p:c_res_p + c_skip],
                         (0, 2, 1)).astype(x.dtype)
    return res, skip


def reference_forward(x, x_mask, c, params, *, kernel_size, dilation):
    """Pure-JAX f32 reference (mirrors the torch forward) for correctness check."""
    c_res = x.shape[1]
    pad = (kernel_size - 1) // 2 * dilation
    dn = ("NCH", "OIH", "NCH")
    h = jax.lax.conv_general_dilated(
        x, params["conv_w"], window_strides=(1,), padding=[(pad, pad)],
        rhs_dilation=(dilation,), dimension_numbers=dn)
    h = h + params["conv_b"][None, :, None]
    ca = jax.lax.conv_general_dilated(
        c, params["aux_w"], window_strides=(1,), padding=[(0, 0)],
        dimension_numbers=dn)
    h = h + ca
    half = h.shape[1] // 2
    z = jnp.tanh(h[:, :half]) * jax.nn.sigmoid(h[:, half:])
    out = jax.lax.conv_general_dilated(
        z, params["out_w"], window_strides=(1,), padding=[(0, 0)],
        dimension_numbers=dn)
    out = out + params["out_b"][None, :, None]
    out = out * x_mask
    res = out[:, :c_res] + x
    skip = out[:, c_res:]
    return res, skip


def init_params(key, *, kernel_size, c_res, c_gate, c_skip, c_aux):
    k1, k2, k3, k4, k5 = jax.random.split(key, 5)
    std_conv = math.sqrt(2.0 / (c_res * kernel_size))   # kaiming_normal_, relu
    std_aux = math.sqrt(2.0 / c_aux)
    std_out = math.sqrt(2.0 / (c_gate // 2))
    return {
        "conv_w": jax.random.normal(k1, (c_gate, c_res, kernel_size), jnp.float32) * std_conv,
        "conv_b": jax.random.normal(k2, (c_gate,), jnp.float32) * 0.1,
        "aux_w": jax.random.normal(k3, (c_gate, c_aux, 1), jnp.float32) * std_aux,
        "out_w": jax.random.normal(k4, (c_res + c_skip, c_gate // 2, 1), jnp.float32) * std_out,
        "out_b": jax.random.normal(k5, (c_res + c_skip,), jnp.float32) * 0.1,
    }


if __name__ == "__main__":
    B, T = 2, 1000
    kernel_size, dilation = 3, 2
    c_res, c_gate, c_skip, c_aux = 16, 32, 16, 16

    key = jax.random.PRNGKey(0)
    kp, kx, kc = jax.random.split(key, 3)
    params = init_params(kp, kernel_size=kernel_size, c_res=c_res,
                         c_gate=c_gate, c_skip=c_skip, c_aux=c_aux)

    x = jax.random.normal(kx, (B, c_res, T), jnp.float32)
    c = jax.random.normal(kc, (B, c_aux, T), jnp.float32)
    lengths = jnp.array([937, 640], jnp.int32)
    x_mask = (jnp.arange(T)[None, :] < lengths[:, None]).astype(jnp.float32)[:, None, :]

    # tile_t=256 here so the small test exercises multiple time tiles, the halo
    # DMA double-buffering and time padding; real workloads use the 1024 default.
    res, skip = residual_block_forward(x, x_mask, c, params,
                                       kernel_size=kernel_size, dilation=dilation,
                                       tile_t=256)
    jax.block_until_ready((res, skip))

    res_ref, skip_ref = reference_forward(x, x_mask, c, params,
                                          kernel_size=kernel_size, dilation=dilation)
    # bf16 MXU operands + bf16 activations in/out (f32 accumulation) -> loose tol.
    np.testing.assert_allclose(np.asarray(res), np.asarray(res_ref), rtol=3e-2, atol=4e-2)
    np.testing.assert_allclose(np.asarray(skip), np.asarray(skip_ref), rtol=3e-2, atol=4e-2)

    print("KERNEL_OK")
</pallas_src>

<mosaic_0001>
module attributes {stable_mosaic.version = 11 : i64} {
  func.func @_residual_block_kernel(%arg0: i32, %arg1: i32, %arg2: memref<2xi32, #tpu.memory_space<smem>>, %arg3: memref<2x1040x128xbf16, #tpu.memory_space<any>>, %arg4: memref<1x256x128xbf16, #tpu.memory_space<vmem>>, %arg5: memref<3x128x256xbf16, #tpu.memory_space<vmem>>, %arg6: memref<128x256xbf16, #tpu.memory_space<vmem>>, %arg7: memref<1x256xf32, #tpu.memory_space<vmem>>, %arg8: memref<128x256xbf16, #tpu.memory_space<vmem>>, %arg9: memref<1x256xf32, #tpu.memory_space<vmem>>, %arg10: memref<1x256x256xbf16, #tpu.memory_space<vmem>>, %arg11: memref<2x272x128xbf16, #tpu.memory_space<vmem>>, %arg12: memref<2x!tpu.dma_semaphore, #tpu.memory_space<semaphore_mem>>) attributes {dimension_semantics = [#tpu.dimension_semantics<parallel>, #tpu.dimension_semantics<arbitrary>], iteration_bounds = array<i64: 2, 4>, scalar_prefetch = 1 : i64, scratch_operands = 2 : i64, tpu.core_type = #tpu.core_type<tc>, window_params = [{}, {transform_indices = @transform_1, window_bounds = array<i64: 1, 256, 128>}, {pipeline_mode = #tpu.pipeline_mode<synchronous>, transform_indices = @transform_2, window_bounds = array<i64: 3, 128, 256>}, {pipeline_mode = #tpu.pipeline_mode<synchronous>, transform_indices = @transform_3, window_bounds = array<i64: 128, 256>}, {pipeline_mode = #tpu.pipeline_mode<synchronous>, transform_indices = @transform_4, window_bounds = array<i64: 1, 256>}, {pipeline_mode = #tpu.pipeline_mode<synchronous>, transform_indices = @transform_5, window_bounds = array<i64: 128, 256>}, {pipeline_mode = #tpu.pipeline_mode<synchronous>, transform_indices = @transform_6, window_bounds = array<i64: 1, 256>}, {transform_indices = @transform_7, window_bounds = array<i64: 1, 256, 256>}]} {
    %c2_i32 = arith.constant 2 : i32
    %c0_i32 = arith.constant 0 : i32
    %0 = arith.cmpi eq, %c2_i32, %c0_i32 : i32
    %c1_i32 = arith.constant 1 : i32
    %1 = arith.select %0, %c1_i32, %c2_i32 : i32
    %2 = arith.remsi %arg1, %1 : i32
    %c0_i32_0 = arith.constant 0 : i32
    %3 = arith.cmpi ne, %2, %c0_i32_0 : i32
    %c0_i32_1 = arith.constant 0 : i32
    %4 = arith.cmpi slt, %2, %c0_i32_1 : i32
    %c0_i32_2 = arith.constant 0 : i32
    %5 = arith.cmpi slt, %1, %c0_i32_2 : i32
    %6 = arith.xori %4, %5 : i1
    %7 = arith.andi %6, %3 : i1
    %8 = arith.addi %2, %1 : i32
    %9 = arith.select %7, %8, %2 : i32
    %c0_i32_3 = arith.constant 0 : i32
    %10 = arith.cmpi eq, %arg1, %c0_i32_3 : i32
    %11 = arith.extui %10 : i1 to i32
    %c0_i32_4 = arith.constant 0 : i32
    %12 = arith.cmpi ne, %11, %c0_i32_4 : i32
    scf.if %12 {
      %c256_i32_53 = arith.constant 256 : i32
      %94 = arith.muli %arg1, %c256_i32_53 : i32
      %c0_i32_54 = arith.constant 0 : i32
      %95 = tpu.memref_slice %arg3[%arg0, %94, %c0_i32_54] : memref<2x1040x128xbf16, #tpu.memory_space<any>> -> memref<1x272x128xbf16, #tpu.memory_space<any>>
      %96 = tpu.memref_squeeze %95 : memref<1x272x128xbf16, #tpu.memory_space<any>> -> memref<272x128xbf16, #tpu.memory_space<any>>
      %c0_i32_55 = arith.constant 0 : i32
      %c0_i32_56 = arith.constant 0 : i32
      %97 = tpu.memref_slice %arg11[%9, %c0_i32_55, %c0_i32_56] : memref<2x272x128xbf16, #tpu.memory_space<vmem>> -> memref<1x272x128xbf16, #tpu.memory_space<vmem>>
      %98 = tpu.memref_squeeze %97 : memref<1x272x128xbf16, #tpu.memory_space<vmem>> -> memref<272x128xbf16, #tpu.memory_space<vmem>>
      %99 = tpu.memref_slice %arg12[%9] : memref<2x!tpu.dma_semaphore, #tpu.memory_space<semaphore_mem>> -> memref<1x!tpu.dma_semaphore, #tpu.memory_space<semaphore_mem>>
      %100 = tpu.memref_squeeze %99 : memref<1x!tpu.dma_semaphore, #tpu.memory_space<semaphore_mem>> -> memref<!tpu.dma_semaphore, #tpu.memory_space<semaphore_mem>>
      tpu.enqueue_dma source(%96 : memref<272x128xbf16, #tpu.memory_space<any>>) target(%98 : memref<272x128xbf16, #tpu.memory_space<vmem>>) target_semaphore(%100 : memref<!tpu.dma_semaphore, #tpu.memory_space<semaphore_mem>>)
    } else {
    }
    %c256_i32 = arith.constant 256 : i32
    %13 = arith.muli %arg1, %c256_i32 : i32
    %c0_i32_5 = arith.constant 0 : i32
    %14 = tpu.memref_slice %arg3[%arg0, %13, %c0_i32_5] : memref<2x1040x128xbf16, #tpu.memory_space<any>> -> memref<1x272x128xbf16, #tpu.memory_space<any>>
    %15 = tpu.memref_squeeze %14 : memref<1x272x128xbf16, #tpu.memory_space<any>> -> memref<272x128xbf16, #tpu.memory_space<any>>
    %c0_i32_6 = arith.constant 0 : i32
    %c0_i32_7 = arith.constant 0 : i32
    %16 = tpu.memref_slice %arg11[%9, %c0_i32_6, %c0_i32_7] : memref<2x272x128xbf16, #tpu.memory_space<vmem>> -> memref<1x272x128xbf16, #tpu.memory_space<vmem>>
    %17 = tpu.memref_squeeze %16 : memref<1x272x128xbf16, #tpu.memory_space<vmem>> -> memref<272x128xbf16, #tpu.memory_space<vmem>>
    %18 = tpu.memref_slice %arg12[%9] : memref<2x!tpu.dma_semaphore, #tpu.memory_space<semaphore_mem>> -> memref<1x!tpu.dma_semaphore, #tpu.memory_space<semaphore_mem>>
    %19 = tpu.memref_squeeze %18 : memref<1x!tpu.dma_semaphore, #tpu.memory_space<semaphore_mem>> -> memref<!tpu.dma_semaphore, #tpu.memory_space<semaphore_mem>>
    tpu.wait_dma2 semaphore(%19 : memref<!tpu.dma_semaphore, #tpu.memory_space<semaphore_mem>>) src(%15 : memref<272x128xbf16, #tpu.memory_space<any>>) dst(%17 : memref<272x128xbf16, #tpu.memory_space<vmem>>)
    %c1_i32_8 = arith.constant 1 : i32
    %20 = arith.addi %arg1, %c1_i32_8 : i32
    %c4_i32 = arith.constant 4 : i32
    %21 = arith.cmpi slt, %20, %c4_i32 : i32
    %22 = arith.extui %21 : i1 to i32
    %c0_i32_9 = arith.constant 0 : i32
    %23 = arith.cmpi ne, %22, %c0_i32_9 : i32
    scf.if %23 {
      %c1_i32_53 = arith.constant 1 : i32
      %94 = arith.addi %arg1, %c1_i32_53 : i32
      %c1_i32_54 = arith.constant 1 : i32
      %95 = arith.subi %c1_i32_54, %9 : i32
      %c256_i32_55 = arith.constant 256 : i32
      %96 = arith.muli %94, %c256_i32_55 : i32
      %c0_i32_56 = arith.constant 0 : i32
      %97 = tpu.memref_slice %arg3[%arg0, %96, %c0_i32_56] : memref<2x1040x128xbf16, #tpu.memory_space<any>> -> memref<1x272x128xbf16, #tpu.memory_space<any>>
      %98 = tpu.memref_squeeze %97 : memref<1x272x128xbf16, #tpu.memory_space<any>> -> memref<272x128xbf16, #tpu.memory_space<any>>
      %c0_i32_57 = arith.constant 0 : i32
      %c0_i32_58 = arith.constant 0 : i32
      %99 = tpu.memref_slice %arg11[%95, %c0_i32_57, %c0_i32_58] : memref<2x272x128xbf16, #tpu.memory_space<vmem>> -> memref<1x272x128xbf16, #tpu.memory_space<vmem>>
      %100 = tpu.memref_squeeze %99 : memref<1x272x128xbf16, #tpu.memory_space<vmem>> -> memref<272x128xbf16, #tpu.memory_space<vmem>>
      %101 = tpu.memref_slice %arg12[%95] : memref<2x!tpu.dma_semaphore, #tpu.memory_space<semaphore_mem>> -> memref<1x!tpu.dma_semaphore, #tpu.memory_space<semaphore_mem>>
      %102 = tpu.memref_squeeze %101 : memref<1x!tpu.dma_semaphore, #tpu.memory_space<semaphore_mem>> -> memref<!tpu.dma_semaphore, #tpu.memory_space<semaphore_mem>>
      tpu.enqueue_dma source(%98 : memref<272x128xbf16, #tpu.memory_space<any>>) target(%100 : memref<272x128xbf16, #tpu.memory_space<vmem>>) target_semaphore(%102 : memref<!tpu.dma_semaphore, #tpu.memory_space<semaphore_mem>>)
    } else {
    }
    %c0 = arith.constant 0 : index
    %c0_10 = arith.constant 0 : index
    %c0_11 = arith.constant 0 : index
    %24 = vector.load %arg4[%c0, %c0_10, %c0_11] : memref<1x256x128xbf16, #tpu.memory_space<vmem>>, vector<1x256x128xbf16>
    %25 = vector.shape_cast %24 : vector<1x256x128xbf16> to vector<256x128xbf16>
    %c0_12 = arith.constant 0 : index
    %c0_13 = arith.constant 0 : index
    %26 = vector.load %arg6[%c0_12, %c0_13] : memref<128x256xbf16, #tpu.memory_space<vmem>>, vector<128x256xbf16>
    %cst = arith.constant dense<0.000000e+00> : vector<256x256xf32>
    %27 = tpu.matmul %25, %26, %cst {dimension_numbers = #tpu.dot_dimension_numbers<[1], [0], [0], [1], [0, 0, 1, 1], [], []>} : vector<256x128xbf16>, vector<128x256xbf16>, vector<256x256xf32> -> vector<256x256xf32>
    %c0_14 = arith.constant 0 : index
    %c0_15 = arith.constant 0 : index
    %28 = vector.load %arg7[%c0_14, %c0_15] : memref<1x256xf32, #tpu.memory_space<vmem>>, vector<1x256xf32>
    %29 = vector.broadcast %28 : vector<1x256xf32> to vector<256x256xf32>
    %30 = arith.addf %27, %29 : vector<256x256xf32>
    %c0_i32_16 = arith.constant 0 : i32
    %c0_i32_17 = arith.constant 0 : i32
    %31 = tpu.memref_slice %arg11[%9, %c0_i32_16, %c0_i32_17] : memref<2x272x128xbf16, #tpu.memory_space<vmem>> -> memref<1x272x128xbf16, #tpu.memory_space<vmem>>
    %32 = tpu.memref_squeeze %31 : memref<1x272x128xbf16, #tpu.memory_space<vmem>> -> memref<272x128xbf16, #tpu.memory_space<vmem>>
    %c0_18 = arith.constant 0 : index
    %c0_19 = arith.constant 0 : index
    %33 = vector.load %32[%c0_18, %c0_19] : memref<272x128xbf16, #tpu.memory_space<vmem>>, vector<256x128xbf16>
    %c0_20 = arith.constant 0 : index
    %c0_21 = arith.constant 0 : index
    %c0_22 = arith.constant 0 : index
    %34 = vector.load %arg5[%c0_20, %c0_21, %c0_22] : memref<3x128x256xbf16, #tpu.memory_space<vmem>>, vector<1x128x256xbf16>
    %35 = vector.shape_cast %34 : vector<1x128x256xbf16> to vector<128x256xbf16>
    %cst_23 = arith.constant dense<0.000000e+00> : vector<256x256xf32>
    %36 = tpu.matmul %33, %35, %cst_23 {dimension_numbers = #tpu.dot_dimension_numbers<[1], [0], [0], [1], [0, 0, 1, 1], [], []>} : vector<256x128xbf16>, vector<128x256xbf16>, vector<256x256xf32> -> vector<256x256xf32>
    %37 = arith.addf %30, %36 : vector<256x256xf32>
    %c0_i32_24 = arith.constant 0 : i32
    %c0_i32_25 = arith.constant 0 : i32
    %38 = tpu.memref_slice %arg11[%9, %c0_i32_24, %c0_i32_25] : memref<2x272x128xbf16, #tpu.memory_space<vmem>> -> memref<1x272x128xbf16, #tpu.memory_space<vmem>>
    %39 = tpu.memref_squeeze %38 : memref<1x272x128xbf16, #tpu.memory_space<vmem>> -> memref<272x128xbf16, #tpu.memory_space<vmem>>
    %c2 = arith.constant 2 : index
    %c0_26 = arith.constant 0 : index
    %40 = vector.load %39[%c2, %c0_26] : memref<272x128xbf16, #tpu.memory_space<vmem>>, vector<256x128xbf16>
    %c1 = arith.constant 1 : index
    %c0_27 = arith.constant 0 : index
    %c0_28 = arith.constant 0 : index
    %41 = vector.load %arg5[%c1, %c0_27, %c0_28] : memref<3x128x256xbf16, #tpu.memory_space<vmem>>, vector<1x128x256xbf16>
    %42 = vector.shape_cast %41 : vector<1x128x256xbf16> to vector<128x256xbf16>
    %cst_29 = arith.constant dense<0.000000e+00> : vector<256x256xf32>
    %43 = tpu.matmul %40, %42, %cst_29 {dimension_numbers = #tpu.dot_dimension_numbers<[1], [0], [0], [1], [0, 0, 1, 1], [], []>} : vector<256x128xbf16>, vector<128x256xbf16>, vector<256x256xf32> -> vector<256x256xf32>
    %44 = arith.addf %37, %43 : vector<256x256xf32>
    %c0_i32_30 = arith.constant 0 : i32
    %c0_i32_31 = arith.constant 0 : i32
    %45 = tpu.memref_slice %arg11[%9, %c0_i32_30, %c0_i32_31] : memref<2x272x128xbf16, #tpu.memory_space<vmem>> -> memref<1x272x128xbf16, #tpu.memory_space<vmem>>
    %46 = tpu.memref_squeeze %45 : memref<1x272x128xbf16, #tpu.memory_space<vmem>> -> memref<272x128xbf16, #tpu.memory_space<vmem>>
    %c4 = arith.constant 4 : index
    %c0_32 = arith.constant 0 : index
    %47 = vector.load %46[%c4, %c0_32] : memref<272x128xbf16, #tpu.memory_space<vmem>>, vector<256x128xbf16>
    %c2_33 = arith.constant 2 : index
    %c0_34 = arith.constant 0 : index
    %c0_35 = arith.constant 0 : index
    %48 = vector.load %arg5[%c2_33, %c0_34, %c0_35] : memref<3x128x256xbf16, #tpu.memory_space<vmem>>, vector<1x128x256xbf16>
    %49 = vector.shape_cast %48 : vector<1x128x256xbf16> to vector<128x256xbf16>
    %cst_36 = arith.constant dense<0.000000e+00> : vector<256x256xf32>
    %50 = tpu.matmul %47, %49, %cst_36 {dimension_numbers = #tpu.dot_dimension_numbers<[1], [0], [0], [1], [0, 0, 1, 1], [], []>} : vector<256x128xbf16>, vector<128x256xbf16>, vector<256x256xf32> -> vector<256x256xf32>
    %51 = arith.addf %44, %50 : vector<256x256xf32>
    %52 = vector.extract_strided_slice %51 {offsets = [0, 0], sizes = [256, 128], strides = [1, 1]} : vector<256x256xf32> to vector<256x128xf32>
    %53 = vector.extract_strided_slice %51 {offsets = [0, 128], sizes = [256, 128], strides = [1, 1]} : vector<256x256xf32> to vector<256x128xf32>
    %54 = math.tanh %52 : vector<256x128xf32>
    %55 = arith.negf %53 : vector<256x128xf32>
    %56 = math.exp %55 : vector<256x128xf32>
    %cst_37 = arith.constant 1.000000e+00 : f32
    %57 = vector.broadcast %cst_37 : f32 to vector<256x128xf32>
    %58 = arith.addf %57, %56 : vector<256x128xf32>
    %59 = arith.divf %57, %58 : vector<256x128xf32>
    %60 = arith.mulf %54, %59 : vector<256x128xf32>
    %61 = arith.truncf %60 : vector<256x128xf32> to vector<256x128xbf16>
    %c0_38 = arith.constant 0 : index
    %c0_39 = arith.constant 0 : index
    %62 = vector.load %arg8[%c0_38, %c0_39] : memref<128x256xbf16, #tpu.memory_space<vmem>>, vector<128x256xbf16>
    %cst_40 = arith.constant dense<0.000000e+00> : vector<256x256xf32>
    %63 = tpu.matmul %61, %62, %cst_40 {dimension_numbers = #tpu.dot_dimension_numbers<[1], [0], [0], [1], [0, 0, 1, 1], [], []>} : vector<256x128xbf16>, vector<128x256xbf16>, vector<256x256xf32> -> vector<256x256xf32>
    %c0_41 = arith.constant 0 : index
    %c0_42 = arith.constant 0 : index
    %64 = vector.load %arg9[%c0_41, %c0_42] : memref<1x256xf32, #tpu.memory_space<vmem>>, vector<1x256xf32>
    %65 = vector.broadcast %64 : vector<1x256xf32> to vector<256x256xf32>
    %66 = arith.addf %63, %65 : vector<256x256xf32>
    %67 = tpu.iota {dimensions = array<i32: 0>} : vector<256x1xi32>
    %c256_i32_43 = arith.constant 256 : i32
    %68 = arith.muli %arg1, %c256_i32_43 : i32
    %69 = vector.broadcast %68 : i32 to vector<256x1xi32>
    %70 = arith.addi %67, %69 : vector<256x1xi32>
    %71 = arith.index_cast %arg0 : i32 to index
    %72 = memref.load %arg2[%71] : memref<2xi32, #tpu.memory_space<smem>>
    %73 = vector.broadcast %72 : i32 to vector<256x1xi32>
    %74 = arith.cmpi slt, %70, %73 : vector<256x1xi32>
    %75 = arith.extui %74 : vector<256x1xi1> to vector<256x1xi32>
    %76 = arith.sitofp %75 : vector<256x1xi32> to vector<256x1xf32>
    %77 = vector.broadcast %76 : vector<256x1xf32> to vector<256x256xf32>
    %78 = arith.mulf %66, %77 : vector<256x256xf32>
    %c0_i32_44 = arith.constant 0 : i32
    %c0_i32_45 = arith.constant 0 : i32
    %79 = tpu.memref_slice %arg11[%9, %c0_i32_44, %c0_i32_45] : memref<2x272x128xbf16, #tpu.memory_space<vmem>> -> memref<1x272x128xbf16, #tpu.memory_space<vmem>>
    %80 = tpu.memref_squeeze %79 : memref<1x272x128xbf16, #tpu.memory_space<vmem>> -> memref<272x128xbf16, #tpu.memory_space<vmem>>
    %c2_46 = arith.constant 2 : index
    %c0_47 = arith.constant 0 : index
    %81 = vector.load %80[%c2_46, %c0_47] : memref<272x128xbf16, #tpu.memory_space<vmem>>, vector<256x128xbf16>
    %82 = arith.extf %81 : vector<256x128xbf16> to vector<256x128xf32>
    %83 = vector.extract_strided_slice %78 {offsets = [0, 0], sizes = [256, 128], strides = [1, 1]} : vector<256x256xf32> to vector<256x128xf32>
    %84 = arith.addf %83, %82 : vector<256x128xf32>
    %85 = arith.truncf %84 : vector<256x128xf32> to vector<256x128xbf16>
    %c0_48 = arith.constant 0 : index
    %c0_49 = arith.constant 0 : index
    %c0_50 = arith.constant 0 : index
    %86 = vector.load %arg10[%c0_48, %c0_49, %c0_50] : memref<1x256x256xbf16, #tpu.memory_space<vmem>>, vector<1x256x128xbf16>
    %87 = vector.shape_cast %86 : vector<1x256x128xbf16> to vector<256x128xbf16>
    %88 = vector.shape_cast %85 : vector<256x128xbf16> to vector<1x256x128xbf16>
    tpu.vector_store %arg10[%c0_48, %c0_49, %c0_50], %88 {strides = array<i32>} : memref<1x256x256xbf16, #tpu.memory_space<vmem>>, vector<1x256x128xbf16>,
    %89 = vector.extract_strided_slice %78 {offsets = [0, 128], sizes = [256, 128], strides = [1, 1]} : vector<256x256xf32> to vector<256x128xf32>
    %90 = arith.truncf %89 : vector<256x128xf32> to vector<256x128xbf16>
    %c0_51 = arith.constant 0 : index
    %c0_52 = arith.constant 0 : index
    %c128 = arith.constant 128 : index
    %91 = vector.load %arg10[%c0_51, %c0_52, %c128] : memref<1x256x256xbf16, #tpu.memory_space<vmem>>, vector<1x256x128xbf16>
    %92 = vector.shape_cast %91 : vector<1x256x128xbf16> to vector<256x128xbf16>
    %93 = vector.shape_cast %90 : vector<256x128xbf16> to vector<1x256x128xbf16>
    tpu.vector_store %arg10[%c0_51, %c0_52, %c128], %93 {strides = array<i32>} : memref<1x256x256xbf16, #tpu.memory_space<vmem>>, vector<1x256x128xbf16>,
    return
  }
  func.func @transform_1(%arg0: i32, %arg1: i32, %arg2: memref<2xi32, #tpu.memory_space<smem>>) -> (i32, i32, i32) {
    %c0_i32 = arith.constant 0 : i32
    %c0_i32_0 = arith.constant 0 : i32
    return %arg0, %arg1, %c0_i32 : i32, i32, i32
  }
  func.func @transform_2(%arg0: i32, %arg1: i32, %arg2: memref<2xi32, #tpu.memory_space<smem>>) -> (i32, i32, i32) {
    %c0_i32 = arith.constant 0 : i32
    %c0_i32_0 = arith.constant 0 : i32
    %c0_i32_1 = arith.constant 0 : i32
    %c0_i32_2 = arith.constant 0 : i32
    return %c0_i32, %c0_i32_0, %c0_i32_1 : i32, i32, i32
  }
  func.func @transform_3(%arg0: i32, %arg1: i32, %arg2: memref<2xi32, #tpu.memory_space<smem>>) -> (i32, i32) {
    %c0_i32 = arith.constant 0 : i32
    %c0_i32_0 = arith.constant 0 : i32
    %c0_i32_1 = arith.constant 0 : i32
    return %c0_i32, %c0_i32_0 : i32, i32
  }
  func.func @transform_4(%arg0: i32, %arg1: i32, %arg2: memref<2xi32, #tpu.memory_space<smem>>) -> (i32, i32) {
    %c0_i32 = arith.constant 0 : i32
    %c0_i32_0 = arith.constant 0 : i32
    %c0_i32_1 = arith.constant 0 : i32
    return %c0_i32, %c0_i32_0 : i32, i32
  }
  func.func @transform_5(%arg0: i32, %arg1: i32, %arg2: memref<2xi32, #tpu.memory_space<smem>>) -> (i32, i32) {
    %c0_i32 = arith.constant 0 : i32
    %c0_i32_0 = arith.constant 0 : i32
    %c0_i32_1 = arith.constant 0 : i32
    return %c0_i32, %c0_i32_0 : i32, i32
  }
  func.func @transform_6(%arg0: i32, %arg1: i32, %arg2: memref<2xi32, #tpu.memory_space<smem>>) -> (i32, i32) {
    %c0_i32 = arith.constant 0 : i32
    %c0_i32_0 = arith.constant 0 : i32
    %c0_i32_1 = arith.constant 0 : i32
    return %c0_i32, %c0_i32_0 : i32, i32
  }
  func.func @transform_7(%arg0: i32, %arg1: i32, %arg2: memref<2xi32, #tpu.memory_space<smem>>) -> (i32, i32, i32) {
    %c0_i32 = arith.constant 0 : i32
    %c0_i32_0 = arith.constant 0 : i32
    return %arg0, %arg1, %c0_i32 : i32, i32, i32
  }
}

</mosaic_0001>

<bundles_post_ra>
// kernel: tpu_custom_call.1
= control target key start
LH: loop header
LB: loop body
LE: loop exit
PB: predicated region body
PF: predicated region fallthrough
CT: control target
= control target key end

     0   :  { %s5275_s30 = smov [#allocation5]   ;;  %s7278_s0 = inlined_call_operand.hbm [shape: s32[2], index: 0, kind: input, shape index: {}]   ;;  %s7279_s1 = inlined_call_operand.hbm [shape: bf16[2,1040,128], index: 1, kind: input, shape index: {}]   ;;  %s7280_s2 = inlined_call_operand.hbm [shape: bf16[2,1024,128], index: 2, kind: input, shape index: {}]   ;;  %s7281_s3 = inlined_call_operand.hbm [shape: bf16[3,128,256], index: 3, kind: input, shape index: {}]   ;;  %s7282_s4 = inlined_call_operand.hbm [shape: bf16[128,256], index: 4, kind: input, shape index: {}]   ;;  %s7283_s5 = inlined_call_operand.vmem [shape: f32[1,256], index: 5, kind: input, shape index: {}]   ;;  %s7284_s6 = inlined_call_operand.hbm [shape: bf16[128,256], index: 6, kind: input, shape index: {}]   ;;  %s7285_s7 = inlined_call_operand.vmem [shape: f32[1,256], index: 7, kind: input, shape index: {}]   ;;  %s7286_s8 = inlined_call_operand.hbm [shape: bf16[2,1024,256], index: 8, kind: output, shape index: {}]  }
   0x1   :  { %7302 = sst [smem:[#allocation81_spill]] %s7281_s3  ;;  %s14_s29 = sshll.u32 %s7278_s0, 4  ;;  %s15_s29 = int_to_ptr.hbm [resolvable:$true] %s14_s29 }
   0x2   :  { %7303 = sst [smem:[#allocation82_spill]] %s7282_s4 }
   0x3   :  { %7304 = sst [smem:[#allocation83_spill]] %s7284_s6 }
   0x4   :  { %7305 = sst [smem:[#allocation84_spill]] %s7285_s7 }
   0x5   :  { %7306 = sst [smem:[#allocation85_spill]] %s7286_s8 }
   0x6   :  { %17 = dma.hbm_to_smem %s15_s29, 16, %s5275_s30, [#allocation4] }
   0x7   :  { %5223 = dma.done.wait [#allocation4], 16 }
   0x8   :  { %5224 = vsyncadd [#allocation4], 4294967280 }
   0x9   :  { %20 = sfence }
   0xa   :  { %21 = vsyncpa [#allocation7], 0 }
   0xb   :  { %23 = vsyncpa [#allocation7 + $0x1], 0 }
   0xc   :  { %24 = vsyncpa [#allocation10], 0 }
   0xd   :  { %25 = vsyncpa [#allocation13], 0 }
   0xe   :  { %26 = vsyncpa [#allocation8], 0 }
   0xf   :  { %28 = vsyncpa [#allocation8 + $0x1], 0  ;;  %s5335_s9 = smov 0   ;;  %s5337_s10 = smov 0  }
  0x10   :  { %s5339_s11 = smov 0   ;;  %s5341_s12 = smov 0  }
  0x11   :  { %s5343_s0 = smov 0   ;;  %s5345_s13 = smov 0  }
  0x12   :  { %s5347_s14 = smov 0   ;;  %s5349_s15 = smov 0  }
  0x13 LB: > { %7307 = sst [smem:[#allocation27_spill]] %s5245_s9  ;;  %s3895_s16 = sadd.s32 4294967295, %s5273_s15   ;;  %s5273_s15 = sphi %s5349_s15, %s34_s15   ;;  %s5269_s14 = sphi %s5347_s14, %s7522_s14   ;;  %s5265_s13 = sphi %s5345_s13, %s7517_s13   ;;  %s5261_s0 = sphi %s5343_s0, %s7521_s0   ;;  %s5257_s12 = sphi %s5341_s12, %s7516_s12   ;;  %s5253_s11 = sphi %s5339_s11, %s7520_s11   ;;  %s5249_s10 = sphi %s5337_s10, %s7519_s10   ;;  %s5245_s9 = sphi %s5335_s9, %s7518_s9  }
  0x14   : > { %7308 = sst [smem:[#allocation28_spill]] %s5265_s13  ;;  %s3896_s17 = sadd.s32 4294967294, %s5273_s15  }
  0x15   : > { %p68_p0 = scmp.ne.s32.totalorder %s5249_s10, %s5245_s9  ;;  %p5379_p1 = scmp.eq.s32.totalorder %s3895_s16, 0 }
  0x16   : > { %p5383_p2 = scmp.eq.s32.totalorder %s3895_s16, 7  ;;  %p205_p3 = scmp.eq.s32.totalorder %s3896_s17, 7 }
  0x17   : > { %p5389_p4 = por %p5379_p1, %p68_p0  ;;  %p3897_p5 = scmp.ge.s32.totalorder %s5273_s15, 1 }
  0x18   : > { %p5394_p6 = por %p205_p3, %p68_p0  ;;  %p212_p7 = scmp.lt.s32.totalorder %s5273_s15, 9 }
  0x19   : > { %s7314_s3 = sld [smem:[#allocation81_spill]]  ;;  %s5276_s26 = smov [#allocation9]  }
  0x1a   : > { %s7312_s21 = scalar_select %p5394_p6, 1, 0 }
  0x1b   : > { %p5402_p8 = pnand %p3897_p5, %p212_p7  ;;  %s225_s27 = sshll.u32 %s5276_s26, 4  ;;  %s226_s27 = int_to_ptr.vmem [resolvable:$true] %s225_s27 }
  0x1c   : > { %7313 = sst [smem:[#allocation29_spill]] %s7312_s21  ;;  %s5277_s17 = smov 128  }
  0x1d   : > { %p4675_p9 = pneg %p5402_p8  ;;  %s7317_s4 = sld [smem:[#allocation82_spill]] }
  0x1e   : > { %s5278_s22 = smov 8   ;;  %s5279_s23 = smov [#allocation11]  }
  0x1f   : > { %s223_s24 = sshll.u32 %s7314_s3, 4  ;;  %p5410_p10 = pnand %p4675_p9, %p5379_p1  ;;  %s224_s24 = int_to_ptr.hbm [resolvable:$true] %s223_s24 }
  0x20   : > { %s239_s26 = sshll.u32 %s5279_s23, 4  ;;  %s7318_s6 = sld [smem:[#allocation83_spill]]  ;;  %s240_s26 = int_to_ptr.vmem [resolvable:$true] %s239_s26 }
  0x21   : > { %4678 = dma.hbm_to_vmem [thread:$0]  (!%p5410_p10), %s224_s24, 6144, %s226_s27, [#allocation10], %s5277_s17, %s5277_s17, %s5278_s22  }
  0x22   : > { %s5280_s30 = smov [#allocation12]   ;;  %s43_s24 = sadd.s32 1, %s5265_s13 }
  0x23   : > { %s237_s16 = sshll.u32 %s7317_s4, 4  ;;  %s256_s4 = sshll.u32 %s5280_s30, 4  ;;  %s238_s16 = int_to_ptr.hbm [resolvable:$true] %s237_s16  ;;  %s257_s4 = int_to_ptr.vmem [resolvable:$true] %s256_s4 }
  0x24   : > { %4681 = dma.hbm_to_vmem [thread:$0]  (!%p5410_p10), %s238_s16, 2048, %s240_s26, [#allocation10], %s5277_s17, %s5277_s17, %s5278_s22  }
  0x25   : > { %p44_p11 = scmp.ge.s32.totalorder %s43_s24, 4  ;;  %s46_s3 = sadd.s32 1, %s5269_s14 }
  0x26   : > { %s254_s29 = sshll.u32 %s7318_s6, 4  ;;  %s55_s21 = sadd.s32 1, %s5253_s11  ;;  %s255_s29 = int_to_ptr.hbm [resolvable:$true] %s254_s29 }
  0x27   : > { %4684 = dma.hbm_to_vmem [thread:$0]  (!%p5410_p10), %s255_s29, 2048, %s257_s4, [#allocation13], %s5277_s17, %s5277_s17, %s5278_s22  }
  0x28   : > { %p62_p12 = scmp.ne.s32.totalorder %s5253_s11, %s5249_s10  ;;  %s7524_s24 = smov (%p44_p11, %s43_s24), 0 }
  0x29   : > { %7319 = sst [smem:[#allocation30_spill]] %s7524_s24  ;;  %s7526_s3 = smov (!%p44_p11, %s46_s3), %s5269_s14 }
  0x2a   : > { %s51_s27 = ssub.s32 %s5265_s13, %s7524_s24  ;;  %p63_p13 = scmp.eq.s32.totalorder %s5273_s15, 0 }
  0x2b   : > { %p48_p0 = scmp.ge.s32.totalorder %s7526_s3, 2  ;;  %p5439_p3 = por %p5383_p2, %p62_p12 }
  0x2c   : > { %p5443_p5 = por %p63_p13, %p62_p12  ;;  %p4696_p7 = scmp.lt.s32.totalorder %s5273_s15, 8 }
  0x2d   : > { %s7320_s28 = scalar_select %p5439_p3, 1, 0 }
  0x2e   : > { %s7528_s3 = smov (%p48_p0, %s7526_s3), 0  ;;  %s273_s16 = sand.u32 1, %s5253_s11  }
  0x2f   : > { %7321 = sst [smem:[#allocation31_spill]] %s7320_s28  ;;  %s3903_s17 = sshll.u32 %s5265_s13, 5 }
  0x30   : > { %s50_s22 = ssub.s32 %s5269_s14, %s7528_s3  ;;  %s3902_s26 = sshll.u32 %s273_s16, 7 }
  0x31   : > { %s52_s23 = sor.u32 %s51_s27, %s50_s22  ;;  %s3904_s19 = sshll.u32 %s5269_s14, 7 }
  0x32   : > { %p53_p9 = scmp.eq.s32.totalorder %s52_s23, 0  ;;  %s277_s29 = scalar_lea.vmem [#allocation6], %s3902_s26 }
  0x33   : > { %s287_s30 = sshll.u32 %s277_s29, 4  ;;  %s282_s24 = sadd.s32 %s3904_s19, %s3903_s17  ;;  %s288_s30 = int_to_ptr.vmem [resolvable:$true] %s287_s30 }
  0x34   : > { %s5456_s6 = scalar_select %p53_p9, %s5253_s11, %s55_s21  }
  0x35   : > { %s3905_s9 = sshll.u32 %s282_s24, 2  ;;  %p4686_p2 = pnand %p4696_p7, %p5443_p5 }
  0x36   : > { %s284_s7 = scalar_lea.hbm %s7280_s2, %s3905_s9  ;;  %s274_s27 = scalar_lea.sflag [#allocation7], %s273_s16 }
  0x37   : > { %s285_s13 = sshll.u32 %s284_s7, 4  ;;  %s5281_s22 = smov 64   ;;  %s286_s13 = int_to_ptr.hbm [resolvable:$true] %s285_s13 }
  0x38   : > { %s5282_s23 = smov 4   ;;  %299 = sbr.rel (%p5402_p8) target bundleno = 1093 (0x445), region = 44 }
  0x39   : > { %4688 = dma.hbm_to_vmem [thread:$0]  (!%p4686_p2), %s286_s13, 2048, %s288_s30, %s274_s27, %s5281_s22, %s5281_s22, %s5282_s23  }
  0x3d   : > { %s5468_s21 = sand.u32 1, %s5249_s10  }
  0x3e   : > { %s3907_s24 = sshll.u32 %s5468_s21, 7  ;;  %s302_s4 = scalar_lea.sflag [#allocation7], %s5468_s21 }
  0x3f   : > { %s5472_s17 = scalar_lea.vmem [#allocation6], %s3907_s24 }
  0x40   : > { %5226 = dma.done.wait (%p5389_p4), %s302_s4, 2048  }
  0x41   : > { %5228 = vsyncadd (%p5389_p4), %s302_s4, 4294965248 }
  0x42   : > { %5230 = dma.done.wait (%p5379_p1), [#allocation10], 8192  }
  0x43   : > { %5232 = vsyncadd (%p5379_p1), [#allocation10], 4294959104 }
  0x44   : > { %5234 = dma.done.wait (%p5379_p1), [#allocation13], 2048  }
  0x45   : > { %5236 = vsyncadd (%p5379_p1), [#allocation13], 4294965248  ;;  %s3911_s7 = sshll.u32 %s5468_s21, 8  ;;  %p352_p4 = scmp.lt.s32.totalorder %s5257_s12, 0 }
  0x46   : > { %s353_s8 = ssub.s32 0, %s5257_s12  ;;  %s5491_s25 = sshll.u32 %s5257_s12, 8 }
  0x47   : > { %s3912_s9 = smin.u32 %s5257_s12, %s353_s8  ;;  %s369_s18 = sshra.s32 %s5491_s25, 3 }
  0x48   : > { %s355_s13 = sand.u32 1, %s3912_s9   ;;  %s7294_s28 = smul.u32 130, %s5261_s0 }
  0x49   : > { %s356_s20 = ssub.s32 0, %s355_s13  ;;  %p4700_p8 = scmp.eq.s32.totalorder %s5257_s12, 0 }
  0x4a   : > { %s7530_s20 = smov (!%p352_p4, %s356_s20), %s355_s13  ;;  %s372_s26 = sadd.s32 %s7294_s28, %s369_s18 }
  0x4b   : > { %p3914_p1 = scmp.lt.s32.totalorder %s7530_s20, 0  ;;  %s362_s16 = sadd.s32 2, %s7530_s20 }
  0x4c   : > { %s3917_s19 = sshll.u32 %s372_s26, 2  ;;  %s5113_s26 = scalar_lea.hbm %s7279_s1, 1040 }
  0x4d   : > { %s7532_s16 = smov (!%p3914_p1, %s362_s16), %s7530_s20  ;;  %s374_s27 = scalar_lea.hbm %s7279_s1, %s3917_s19 }
  0x4e   : > { %s4506_s22 = smul.u32 136, %s7532_s16  ;;  %s386_s23 = sshll.u32 %s374_s27, 4  ;;  %s5504_s23 = int_to_ptr.hbm [resolvable:$true] %s386_s23 }
  0x4f   : > { %s378_s8 = scalar_lea.sflag [#allocation3], %s7532_s16  ;;  %s5107_s9 = sshra.s32 %s5504_s23, 4  ;;  %s5108_s9 = int_to_ptr.hbm [resolvable:$true] %s5107_s9 }
  0x50   : > { %s5506_s24 = scalar_lea.vmem [#allocation2], %s4506_s22  ;;  %s5109_s13 = scalar_lea.hbm %s5108_s9, 136 }
  0x51   : > { %s388_s4 = sshll.u32 %s5506_s24, 4  ;;  %p5110_p10 = scmp.ne.s32.totalorder %s5108_s9, %s5109_s13  ;;  %s389_s4 = int_to_ptr.vmem [resolvable:$true] %s388_s4 }
  0x52   : > { %p5114_p13 = scmp.lt.s32.totalorder %s5108_s9, %s7279_s1  ;;  %p5115_p0 = scmp.lt.s32.totalorder %s5113_s26, %s5109_s13 }
  0x53   : > { %p5111_p11 = pnand %p5110_p10, %p4700_p8 }
  0x54   : > { %p5116_p5 = por %p5115_p0, %p5114_p13 }
  0x55   : > { %p5112_p12 = pneg %p5111_p11 }
  0x57   : > { %p5117_p7 = pnand %p5116_p5, %p5112_p12 }
  0x59   : > { %5120 = shalt.err (!%p5117_p7)  }
  0x5a   : > { %s5121_s22 = sshra.s32 %s389_s4, 4  ;;  %s5283_s20 = smov [#allocation2]   ;;  %s5122_s22 = int_to_ptr.vmem [resolvable:$true] %s5121_s22 }
  0x5b   : > { %s5123_s28 = scalar_lea.vmem %s5122_s22, 136  ;;  %s5525_s18 = scalar_lea.vmem %s5283_s20, 272 }
  0x5c   : > { %p5124_p9 = scmp.ne.s32.totalorder %s5122_s22, %s5123_s28  ;;  %p5128_p1 = scmp.lt.s32.totalorder %s5122_s22, [#allocation2] }
  0x5d   : > { %p5129_p10 = scmp.lt.s32.totalorder %s5525_s18, %s5123_s28 }
  0x5e   : > { %p5125_p2 = pnand %p5124_p9, %p4700_p8 }
  0x5f   : > { %p5130_p11 = por %p5129_p10, %p5128_p1 }
  0x60   : > { %p5126_p4 = pneg %p5125_p2 }
  0x62   : > { %p5131_p6 = pnand %p5130_p11, %p5126_p4 }
  0x64   : > { %5134 = shalt.err (!%p5131_p6)  }
  0x65   : > { %4670 = dma.hbm_to_vmem [thread:$0]  (%p4700_p8), %s5504_s23, 2176, %s389_s4, %s378_s8 }
  0x66   : > { %s5533_s9 = scalar_lea.vmem [#allocation14], %s3911_s7 }
  0x67   : > { %5237 = dma.done.wait %s378_s8, 2176 }
  0x68   : > { %5238 = vsyncadd %s378_s8, 4294965120  ;;  %v4047_v0 = vld [vmem:[#allocation11 + $0x70] sm:$0xf]  ;;  %v4542_v1 = vld [vmem:[#allocation11 + $0x74] sm:$0xf0]  ;;  %s401_s7 = sadd.s32 1, %s5257_s12 }
  0x69   : > { %v4541_v2 = vld [vmem:[#allocation11 + $0x74] sm:$0xf]  ;;  %v4048_v3 = vor.u32 %v4542_v1, %v4047_v0  ;;  %v4049_v4 = vld [vmem:[#allocation11 + $0x78] sm:$0xf0]  ;;  %v4039_v5 = vld [vmem:[#allocation11 + $0x60] sm:$0xf] }
  0x6a   : > { %v4540_v6 = vld [vmem:[#allocation11 + $0x64] sm:$0xf0]  ;;  %v4052_v7 = vor.u32 %v4541_v2, %v4049_v4  ;;  %v4539_v8 = vld [vmem:[#allocation11 + $0x64] sm:$0xf]  ;;  %v4041_v9 = vld [vmem:[#allocation11 + $0x68] sm:$0xf0] }
  0x6b   : > { %4639 = vmatpush.bf16.msra.mxu2 %v4048_v3  ;;  %v4040_v10 = vor.u32 %v4540_v6, %v4039_v5  ;;  %661 = vmatpush.bf16.msra.mxu0 %v4048_v3  ;;  %v4044_v11 = vor.u32 %v4539_v8, %v4041_v9  ;;  %v4031_v12 = vld [vmem:[#allocation11 + $0x50] sm:$0xf]  ;;  %v4538_v13 = vld [vmem:[#allocation11 + $0x54] sm:$0xf0]  ;;  %v4537_v14 = vld [vmem:[#allocation11 + $0x54] sm:$0xf] }
  0x6c   : > { %4647 = vmatpush.bf16.msra.mxu3 %v4052_v7  ;;  %750 = vmatpush.bf16.msra.mxu1 %v4052_v7  ;;  %v4033_v15 = vld [vmem:[#allocation11 + $0x58] sm:$0xf0]  ;;  %v4032_v16 = vor.u32 %v4538_v13, %v4031_v12  ;;  %v4023_v18 = vld [vmem:[#allocation11 + $0x40] sm:$0xf]  ;;  %v4536_v19 = vld [vmem:[#allocation11 + $0x44] sm:$0xf0] }
  0x6d   : > { %v4036_v17 = vor.u32 %v4537_v14, %v4033_v15  ;;  %v4535_v20 = vld [vmem:[#allocation11 + $0x44] sm:$0xf]  ;;  %v4025_v21 = vld [vmem:[#allocation11 + $0x48] sm:$0xf0]  ;;  %v4024_v22 = vor.u32 %v4536_v19, %v4023_v18  ;;  %v4015_v24 = vld [vmem:[#allocation11 + $0x30] sm:$0xf] }
  0x6e   : > { %v4028_v23 = vor.u32 %v4535_v20, %v4025_v21  ;;  %v4534_v25 = vld [vmem:[#allocation11 + $0x34] sm:$0xf0]  ;;  %v4533_v26 = vld [vmem:[#allocation11 + $0x34] sm:$0xf]  ;;  %v4017_v27 = vld [vmem:[#allocation11 + $0x38] sm:$0xf0] }
  0x6f   : > { %4640 = vmatpush.bf16.msra.mxu2 %v4040_v10  ;;  %662 = vmatpush.bf16.msra.mxu0 %v4040_v10  ;;  %v4016_v28 = vor.u32 %v4534_v25, %v4015_v24  ;;  %v4020_v29 = vor.u32 %v4533_v26, %v4017_v27  ;;  %v4007_v30 = vld [vmem:[#allocation11 + $0x20] sm:$0xf]  ;;  %v4532_v31 = vld [vmem:[#allocation11 + $0x24] sm:$0xf0]  ;;  %v4531_v32 = vld [vmem:[#allocation11 + $0x24] sm:$0xf] }
  0x70   : > { %4648 = vmatpush.bf16.msra.mxu3 %v4044_v11  ;;  %751 = vmatpush.bf16.msra.mxu1 %v4044_v11  ;;  %v4009_v33 = vld [vmem:[#allocation11 + $0x28] sm:$0xf0]  ;;  %v4008_v34 = vor.u32 %v4532_v31, %v4007_v30  ;;  %v3999_v36 = vld [vmem:[#allocation11 + $0x10] sm:$0xf]  ;;  %v4530_v37 = vld [vmem:[#allocation11 + $0x14] sm:$0xf0] }
  0x71   : > { %v4012_v35 = vor.u32 %v4531_v32, %v4009_v33  ;;  %s406_s28 = ssub.s32 1, %s7532_s16  ;;  %v4529_v38 = vld [vmem:[#allocation11 + $0x14] sm:$0xf]  ;;  %v4001_v39 = vld [vmem:[#allocation11 + $0x18] sm:$0xf0]  ;;  %p5537_p6 = scmp.lt.s32.totalorder %s401_s7, 4  ;;  %v4000_v40 = vor.u32 %v4530_v37, %v3999_v36 }
  0x72   : > { %s4509_s4 = sadd.s32 256, %s5491_s25  ;;  %s4510_s8 = smul.u32 136, %s406_s28  ;;  %v3991_v41 = vld [vmem:[#allocation11] sm:$0xf]  ;;  %v4004_v42 = vor.u32 %v4529_v38, %v4001_v39  ;;  %v4528_v43 = vld [vmem:[#allocation11 + $0x4] sm:$0xf0] }
  0x73   : > { %4641 = vmatpush.bf16.msra.mxu2 %v4032_v16  ;;  %663 = vmatpush.bf16.msra.mxu0 %v4032_v16  ;;  %s408_s13 = sshra.s32 %s4509_s4, 3  ;;  %v4527_v44 = vld [vmem:[#allocation11 + $0x4] sm:$0xf]  ;;  %s7324_s19 = smul.u32 130, %s5261_s0  ;;  %v3993_v45 = vld [vmem:[#allocation11 + $0x8] sm:$0xf0]  ;;  %v3992_v50 = vor.u32 %v4528_v43, %v3991_v41 }
  0x74   : > { %4649 = vmatpush.bf16.msra.mxu3 %v4036_v17  ;;  %752 = vmatpush.bf16.msra.mxu1 %v4036_v17  ;;  %v4573_v46 = vld [vmem:[#allocation9 + $0x74] sm:$0xf]  ;;  %s416_s27 = scalar_lea.vmem [#allocation2], %s4510_s8  ;;  %v4177_v47 = vld [vmem:[#allocation9 + $0x78] sm:$0xf0]  ;;  %v3996_v51 = vor.u32 %v4527_v44, %v3993_v45  ;;  %v4519_v52 = vld [vmem:[%s5472_s17 + $0x40] sm:$0xff] }
  0x75   : > { %s411_s29 = sadd.s32 %s408_s13, %s7324_s19  ;;  %s5546_s22 = sshll.u32 %s416_s27, 4  ;;  %v4175_v48 = vld [vmem:[#allocation9 + $0x70] sm:$0xf]  ;;  %v4574_v49 = vld [vmem:[#allocation9 + $0x74] sm:$0xf0]  ;;  %v4180_v53 = vor.u32 %v4573_v46, %v4177_v47  ;;  %s428_s22 = int_to_ptr.vmem [resolvable:$true] %s5546_s22 }
  0x76   : > { %s3923_s30 = sshll.u32 %s411_s29, 2  ;;  %v4176_v54 = vor.u32 %v4574_v49, %v4175_v48  ;;  %s417_s8 = scalar_lea.sflag [#allocation3], %s406_s28 }
  0x77   : > { %4642 = vmatpush.bf16.msra.mxu2 %v4024_v22  ;;  %664 = vmatpush.bf16.msra.mxu0 %v4024_v22  ;;  %s413_s4 = scalar_lea.hbm %s7279_s1, %s3923_s30 }
  0x78   : > { %4650 = vmatpush.bf16.msra.mxu3 %v4028_v23  ;;  %753 = vmatpush.bf16.msra.mxu1 %v4028_v23  ;;  %s425_s13 = sshll.u32 %s413_s4, 4  ;;  %s426_s13 = int_to_ptr.hbm [resolvable:$true] %s425_s13 }
  0x79   : > { %s5135_s19 = sshra.s32 %s426_s13, 4  ;;  %s5136_s19 = int_to_ptr.hbm [resolvable:$true] %s5135_s19 }
  0x7a   : > { %s5137_s29 = scalar_lea.hbm %s5136_s19, 136  ;;  %p5142_p0 = scmp.lt.s32.totalorder %s5136_s19, %s7279_s1 }
  0x7b   : > { %4643 = vmatpush.bf16.msra.mxu2 %v4016_v28  ;;  %665 = vmatpush.bf16.msra.mxu0 %v4016_v28  ;;  %p5138_p8 = scmp.ne.s32.totalorder %s5136_s19, %s5137_s29  ;;  %p5143_p5 = scmp.lt.s32.totalorder %s5113_s26, %s5137_s29 }
  0x7c   : > { %4651 = vmatpush.bf16.msra.mxu3 %v4020_v29  ;;  %754 = vmatpush.bf16.msra.mxu1 %v4020_v29 }
  0x7d   : > { %p5139_p12 = pnand %p5138_p8, %p5537_p6  ;;  %p5144_p7 = por %p5143_p5, %p5142_p0 }
  0x7f   : > { %4644 = vmatpush.bf16.msra.mxu2 %v4008_v34  ;;  %666 = vmatpush.bf16.msra.mxu0 %v4008_v34  ;;  %p5140_p13 = pneg %p5139_p12 }
  0x80   : > { %4652 = vmatpush.bf16.msra.mxu3 %v4012_v35  ;;  %755 = vmatpush.bf16.msra.mxu1 %v4012_v35 }
  0x81   : > { %p5145_p9 = pnand %p5144_p7, %p5140_p13 }
  0x83   : > { %4645 = vmatpush.bf16.msra.mxu2 %v4000_v40  ;;  %667 = vmatpush.bf16.msra.mxu0 %v4000_v40 }
  0x84   : > { %4653 = vmatpush.bf16.msra.mxu3 %v4004_v42  ;;  %756 = vmatpush.bf16.msra.mxu1 %v4004_v42 }
  0x85   : > { %5148 = shalt.err (!%p5145_p9)  }
  0x86   : > { %s5149_s16 = sshra.s32 %s428_s22, 4  ;;  %s5150_s16 = int_to_ptr.vmem [resolvable:$true] %s5149_s16 }
  0x87   : > { %s5151_s28 = scalar_lea.vmem %s5150_s16, 136  ;;  %p5156_p10 = scmp.lt.s32.totalorder %s5150_s16, [#allocation2] }
  0x88   : > { %p5152_p2 = scmp.ne.s32.totalorder %s5150_s16, %s5151_s28  ;;  %p5157_p11 = scmp.lt.s32.totalorder %s5525_s18, %s5151_s28 }
  0x8a   : > { %p5153_p4 = pnand %p5152_p2, %p5537_p6  ;;  %p5158_p8 = por %p5157_p11, %p5156_p10 }
  0x8c   : > { %p5154_p1 = pneg %p5153_p4 }
  0x8e   : > { %p5159_p12 = pnand %p5158_p8, %p5154_p1 }
  0x90   : > { %5162 = shalt.err (!%p5159_p12)  }
  0x91   : > { %4672 = dma.hbm_to_vmem [thread:$0]  (%p5537_p6), %s426_s13, 2176, %s428_s22, %s417_s8  ;;  %v4511_v55 = vld [vmem:[%s5472_s17] sm:$0xff]  ;;  %v4169_v57 = vld [vmem:[#allocation9 + $0x68] sm:$0xf0]  ;;  %4646 = vmatpush.bf16.msra.mxu2 %v3992_v50  ;;  %668 = vmatpush.bf16.msra.mxu0 %v3992_v50  ;;  %v4569_v59 = vld [vmem:[#allocation9 + $0x54] sm:$0xf] }
  0x92   : > { %v4571_v56 = vld [vmem:[#allocation9 + $0x64] sm:$0xf]  ;;  %4654 = vmatpush.bf16.msra.mxu3 %v3996_v51  ;;  %757 = vmatpush.bf16.msra.mxu1 %v3996_v51  ;;  %v4161_v60 = vld [vmem:[#allocation9 + $0x58] sm:$0xf0]  ;;  %v4167_v61 = vld [vmem:[#allocation9 + $0x60] sm:$0xf] }
  0x93   : > { %v4172_v58 = vor.u32 %v4571_v56, %v4169_v57  ;;  %v4572_v62 = vld [vmem:[#allocation9 + $0x64] sm:$0xf0]  ;;  %v4164_v63 = vor.u32 %v4569_v59, %v4161_v60  ;;  %v4567_v3 = vld [vmem:[#allocation9 + $0x44] sm:$0xf]  ;;  %v4153_v4 = vld [vmem:[#allocation9 + $0x48] sm:$0xf0] }
  0x94   : > { %709 = vmatmul.bf16.vlgmr.msra.gmra.mxu2 %v4519_v52  ;;  %669 = vmatmul.bf16.vlgmr.msra.gmra.mxu0 %v4511_v55  ;;  %v4168_v0 = vor.u32 %v4572_v62, %v4167_v61  ;;  %v4520_v1 = vld [vmem:[%s5472_s17 + $0x48] sm:$0xff]  ;;  %v4159_v5 = vld [vmem:[#allocation9 + $0x50] sm:$0xf]  ;;  %v4156_v6 = vor.u32 %v4567_v3, %v4153_v4  ;;  %v4570_v7 = vld [vmem:[#allocation9 + $0x54] sm:$0xf0]  ;;  %vm1438_vm0 = vcmask 1046528  }
  0x95   : > { %1063 = vmatpush.bf16.msrb.mxu2 %v4176_v54  ;;  %798 = vmatmul.bf16.vlgmr.msra.gmra.mxu3 %v4519_v52  ;;  %v4512_v2 = vld [vmem:[%s5472_s17 + $0x8] sm:$0xff]  ;;  %v4160_v8 = vor.u32 %v4570_v7, %v4159_v5  ;;  %v4521_v9 = vld [vmem:[%s5472_s17 + $0x50] sm:$0xff]  ;;  %v4145_v12 = vld [vmem:[#allocation9 + $0x38] sm:$0xf0]  ;;  %vm1835_vm1 = vcmask 1045504   ;;  %s6399_s18 = sld [smem:[#allocation5 + %s5261_s0]] }
  0x96   : > { %1152 = vmatpush.bf16.msrb.mxu3 %v4180_v53  ;;  %758 = vmatmul.bf16.vlgmr.msra.gmra.mxu1 %v4511_v55  ;;  %v4513_v10 = vld [vmem:[%s5472_s17 + $0x10] sm:$0xff]  ;;  %v4151_v13 = vld [vmem:[#allocation9 + $0x40] sm:$0xf]  ;;  %v4568_v15 = vld [vmem:[#allocation9 + $0x44] sm:$0xf0]  ;;  %s7460_s4 = sld [smem:[#allocation84_spill]] }
  0x97   : > { %v4565_v11 = vld [vmem:[#allocation9 + $0x34] sm:$0xf]  ;;  %v4152_v16 = vor.u32 %v4568_v15, %v4151_v13  ;;  %v4522_v17 = vld [vmem:[%s5472_s17 + $0x58] sm:$0xff]  ;;  %v4563_v19 = vld [vmem:[#allocation9 + $0x24] sm:$0xf]  ;;  %s4500_s13 = sshll.u32 %s5261_s0, 8 }
  0x98   : > { %v4148_v14 = vor.u32 %v4565_v11, %v4145_v12  ;;  %v4514_v18 = vld [vmem:[%s5472_s17 + $0x18] sm:$0xff]  ;;  %v4137_v20 = vld [vmem:[#allocation9 + $0x28] sm:$0xf0]  ;;  %v4143_v21 = vld [vmem:[#allocation9 + $0x30] sm:$0xf]  ;;  %s7511_s19 = sld [smem:[#allocation85_spill]] }
  0x99   : > { %1064 = vmatpush.bf16.msrb.mxu2 %v4168_v0  ;;  %v4140_v22 = vor.u32 %v4563_v19, %v4137_v20  ;;  %v4566_v23 = vld [vmem:[#allocation9 + $0x34] sm:$0xf0]  ;;  %v4523_v25 = vld [vmem:[%s5472_s17 + $0x60] sm:$0xff]  ;;  %v4561_v27 = vld [vmem:[#allocation9 + $0x14] sm:$0xf]  ;;  %s3743_s27 = sshll.u32 %s5533_s9, 4  ;;  %s3744_s27 = int_to_ptr.vmem [resolvable:$true] %s3743_s27 }
  0x9a   : > { %1153 = vmatpush.bf16.msrb.mxu3 %v4172_v58  ;;  %v4144_v24 = vor.u32 %v4566_v23, %v4143_v21  ;;  %v4515_v26 = vld [vmem:[%s5472_s17 + $0x20] sm:$0xff]  ;;  %v4129_v28 = vld [vmem:[#allocation9 + $0x18] sm:$0xf0]  ;;  %v4564_v31 = vld [vmem:[#allocation9 + $0x24] sm:$0xf0]  ;;  %s3728_s7 = scalar_lea.sflag [#allocation8], %s5468_s21 }
  0x9b   : > { %v4135_v29 = vld [vmem:[#allocation9 + $0x20] sm:$0xf]  ;;  %v4132_v30 = vor.u32 %v4561_v27, %v4129_v28  ;;  %v4299_v32 = vld [vmem:[#allocation9 + $0xf0] sm:$0xf]  ;;  %v4605_v34 = vld [vmem:[#allocation9 + $0xf4] sm:$0xf0] }
  0x9c   : > { %v4136_v33 = vor.u32 %v4564_v31, %v4135_v29  ;;  %v4604_v35 = vld [vmem:[#allocation9 + $0xf4] sm:$0xf]  ;;  %v4301_v36 = vld [vmem:[#allocation9 + $0xf8] sm:$0xf0]  ;;  %v4300_v37 = vor.u32 %v4605_v34, %v4299_v32  ;;  %v4291_v39 = vld [vmem:[#allocation9 + $0xe0] sm:$0xf] }
  0x9d   : > { %1065 = vmatpush.bf16.msrb.mxu2 %v4160_v8  ;;  %v4304_v38 = vor.u32 %v4604_v35, %v4301_v36  ;;  %v4603_v40 = vld [vmem:[#allocation9 + $0xe4] sm:$0xf0]  ;;  %v4602_v41 = vld [vmem:[#allocation9 + $0xe4] sm:$0xf]  ;;  %v4293_v42 = vld [vmem:[#allocation9 + $0xe8] sm:$0xf0] }
  0x9e   : > { %1154 = vmatpush.bf16.msrb.mxu3 %v4164_v63  ;;  %1568 = vmatpush.bf16.msrb.mxu0 %v4300_v37  ;;  %v4292_v43 = vor.u32 %v4603_v40, %v4291_v39  ;;  %v4296_v44 = vor.u32 %v4602_v41, %v4293_v42  ;;  %v4524_v45 = vld [vmem:[%s5472_s17 + $0x68] sm:$0xff]  ;;  %v4283_v47 = vld [vmem:[#allocation9 + $0xd0] sm:$0xf]  ;;  %v4601_v48 = vld [vmem:[#allocation9 + $0xd4] sm:$0xf0] }
  0x9f   : > { %1657 = vmatpush.bf16.msrb.mxu1 %v4304_v38  ;;  %v4516_v46 = vld [vmem:[%s5472_s17 + $0x28] sm:$0xff]  ;;  %v4600_v49 = vld [vmem:[#allocation9 + $0xd4] sm:$0xf]  ;;  %v4284_v50 = vor.u32 %v4601_v48, %v4283_v47  ;;  %v4285_v51 = vld [vmem:[#allocation9 + $0xd8] sm:$0xf0] }
  0xa0   : > { %v4559_v52 = vld [vmem:[#allocation9 + $0x4] sm:$0xf]  ;;  %v4121_v53 = vld [vmem:[#allocation9 + $0x8] sm:$0xf0]  ;;  %v4288_v54 = vor.u32 %v4600_v49, %v4285_v51  ;;  %v4127_v55 = vld [vmem:[#allocation9 + $0x10] sm:$0xf] }
  0xa1   : > { %1066 = vmatpush.bf16.msrb.mxu2 %v4152_v16  ;;  %v4124_v56 = vor.u32 %v4559_v52, %v4121_v53  ;;  %v4562_v57 = vld [vmem:[#allocation9 + $0x14] sm:$0xf0]  ;;  %v4275_v58 = vld [vmem:[#allocation9 + $0xc0] sm:$0xf]  ;;  %v4599_v59 = vld [vmem:[#allocation9 + $0xc4] sm:$0xf0] }
  0xa2   : > { %1155 = vmatpush.bf16.msrb.mxu3 %v4156_v6  ;;  %1569 = vmatpush.bf16.msrb.mxu0 %v4292_v43  ;;  %v4128_v60 = vor.u32 %v4562_v57, %v4127_v55  ;;  %v4276_v61 = vor.u32 %v4599_v59, %v4275_v58  ;;  %v4598_v62 = vld [vmem:[#allocation9 + $0xc4] sm:$0xf]  ;;  %v4277_v63 = vld [vmem:[#allocation9 + $0xc8] sm:$0xf0]  ;;  %v4596_v3 = vld [vmem:[#allocation9 + $0xb4] sm:$0xf] }
  0xa3   : > { %1658 = vmatpush.bf16.msrb.mxu1 %v4296_v44  ;;  %v4280_v0 = vor.u32 %v4598_v62, %v4277_v63  ;;  %v4269_v4 = vld [vmem:[#allocation9 + $0xb8] sm:$0xf0]  ;;  %v4119_v5 = vld [vmem:[#allocation9] sm:$0xf]  ;;  %v4560_v6 = vld [vmem:[#allocation9 + $0x4] sm:$0xf0] }
  0xa4   : > { %714 = vmatmul.bf16.gmra.mxu2 %v4520_v1  ;;  %674 = vmatmul.bf16.gmra.mxu0 %v4512_v2  ;;  %v4120_v8 = vor.u32 %v4560_v6, %v4119_v5  ;;  %v4595_v11 = vld [vmem:[#allocation9 + $0xa4] sm:$0xf0]  ;;  %v4594_v12 = vld [vmem:[#allocation9 + $0xa4] sm:$0xf]  ;;  %v4261_v13 = vld [vmem:[#allocation9 + $0xa8] sm:$0xf0] }
  0xa5   : > { %803 = vmatmul.bf16.gmra.mxu3 %v4520_v1  ;;  %1067 = vmatpush.bf16.msrb.mxu2 %v4144_v24  ;;  %v4267_v1 = vld [vmem:[#allocation9 + $0xb0] sm:$0xf]  ;;  %v4264_v15 = vor.u32 %v4594_v12, %v4261_v13  ;;  %v4593_v19 = vld [vmem:[#allocation9 + $0x94] sm:$0xf0]  ;;  %v4592_v20 = vld [vmem:[#allocation9 + $0x94] sm:$0xf] }
  0xa6   : > { %763 = vmatmul.bf16.gmra.mxu1 %v4512_v2  ;;  %1156 = vmatpush.bf16.msrb.mxu3 %v4148_v14  ;;  %v4597_v2 = vld [vmem:[#allocation9 + $0xb4] sm:$0xf0]  ;;  %v4525_v16 = vld [vmem:[%s5472_s17 + $0x70] sm:$0xff]  ;;  %v4365_v24 = vld [vmem:[#allocation9 + $0x178] sm:$0xf0] }
  0xa7   : > { %1570 = vmatpush.bf16.msrb.mxu0 %v4284_v50  ;;  %1659 = vmatpush.bf16.msrb.mxu1 %v4288_v54  ;;  %v4268_v7 = vor.u32 %v4597_v2, %v4267_v1  ;;  %v4620_v23 = vld [vmem:[#allocation9 + $0x174] sm:$0xf]  ;;  %v4243_v27 = vld [vmem:[#allocation9 + $0x80] sm:$0xf]  ;;  %v4591_v28 = vld [vmem:[#allocation9 + $0x84] sm:$0xf0] }
  0xa8   : > { %v4244_v29 = vor.u32 %v4591_v28, %v4243_v27  ;;  %v4245_v31 = vld [vmem:[#allocation9 + $0x88] sm:$0xf0]  ;;  %v4518_v34 = vld [vmem:[%s5472_s17 + $0x38] sm:$0xff]  ;;  %v4363_v41 = vld [vmem:[#allocation9 + $0x170] sm:$0xf] }
  0xa9   : > { %1068 = vmatpush.bf16.msrb.mxu2 %v4136_v33  ;;  %v4526_v33 = vld [vmem:[%s5472_s17 + $0x78] sm:$0xff]  ;;  %v4618_v50 = vld [vmem:[#allocation9 + $0x164] sm:$0xf]  ;;  %v4357_v51 = vld [vmem:[#allocation9 + $0x168] sm:$0xf0] }
  0xaa   : > { %1157 = vmatpush.bf16.msrb.mxu3 %v4140_v22  ;;  %v4253_v22 = vld [vmem:[#allocation9 + $0x98] sm:$0xf0]  ;;  %v1305_v35 = vld [vmem:[%s5506_s24] sm:$0xe]  ;;  %v4360_v52 = vor.u32 %v4618_v50, %v4357_v51  ;;  %v4355_v5 = vld [vmem:[#allocation9 + $0x160] sm:$0xf] }
  0xab   : > { %1571 = vmatpush.bf16.msrb.mxu0 %v4276_v61  ;;  %1660 = vmatpush.bf16.msrb.mxu1 %v4280_v0  ;;  %v5590_v36 = vld [vmem:[%s5506_s24 + $0x4] sm:$0xf]  ;;  %v1388_v37 = vunpack.c.l.b16 %v1305_v35  ;;  %v5594_v39 = vld [vmem:[%s5506_s24 + $0x8] sm:$0xff]  ;;  %v4619_v6 = vld [vmem:[#allocation9 + $0x164] sm:$0xf0] }
  0xac   : > { %v7295_v38 = vunpack.c.l.b16 %v5590_v36  ;;  %v4621_v42 = vld [vmem:[#allocation9 + $0x174] sm:$0xf0]  ;;  %v4545_v12 = vld [vmem:[%s5506_s24 + $0x10] sm:$0xff]  ;;  %v4546_v27 = vld [vmem:[%s5506_s24 + $0x18] sm:$0xff] }
  0xad   : > { %1069 = vmatpush.bf16.msrb.mxu2 %v4128_v60  ;;  %v4364_v43 = vor.u32 %v4621_v42, %v4363_v41  ;;  %v4544_v61 = vld [vmem:[%s5506_s24 + $0x8] sm:$0xff]  ;;  %v4347_v35 = vld [vmem:[#allocation9 + $0x150] sm:$0xf] }
  0xae   : > { %1158 = vmatpush.bf16.msrb.mxu3 %v4132_v30  ;;  %v4590_v30 = vld [vmem:[#allocation9 + $0x84] sm:$0xf]  ;;  %v1421_v40 = vpack.c.b16 %v7295_v38, %v1388_v37  ;;  %v4617_v37 = vld [vmem:[#allocation9 + $0x154] sm:$0xf0] }
  0xaf   : > { %1572 = vmatpush.bf16.msrb.mxu0 %v4268_v7  ;;  %v4248_v32 = vor.u32 %v4590_v30, %v4245_v31  ;;  %v4348_v41 = vor.u32 %v4617_v37, %v4347_v35  ;;  %v4614_v51 = vld [vmem:[#allocation9 + $0x144] sm:$0xf]  ;;  %v5722_v37 = vld [vmem:[%s5506_s24 + $0x38] sm:$0xff] }
  0xb0   : > { %v1439_v44 = vrot.slane %v1421_v40, 1  ;;  %7342 = vst [vmem:[#allocation49_spill] sm:$0xff] %v5722_v37 }
  0xb1   : > { %1070 = vmatpush.bf16.msrb.mxu2 %v4120_v8  ;;  %v4356_v8 = vor.u32 %v4619_v6, %v4355_v5  ;;  %v5700_v6 = vld [vmem:[%s5506_s24 + $0x30] sm:$0xff] }
  0xb2   : > { %1159 = vmatpush.bf16.msrb.mxu3 %v4124_v56  ;;  %v5612_v56 = vld [vmem:[%s5506_s24 + $0x10] sm:$0xff]  ;;  %7337 = vst [vmem:[#allocation44_spill] sm:$0xff] %v5700_v6 }
  0xb3   : > { %v1442_v58 = vrot.slane %v5612_v56, 1 }
  0xb4   : > { %719 = vmatmul.bf16.gmra.mxu2 %v4521_v9  ;;  %679 = vmatmul.bf16.gmra.mxu0 %v4513_v10 }
  0xb5   : > { %808 = vmatmul.bf16.gmra.mxu3 %v4521_v9  ;;  %v4272_v9 = vor.u32 %v4596_v3, %v4269_v4  ;;  %1965 = vmatpush.bf16.msra.mxu2 %v4364_v43  ;;  %v5634_v4 = vld [vmem:[%s5506_s24 + $0x18] sm:$0xff] }
  0xb6   : > { %768 = vmatmul.bf16.gmra.mxu1 %v4513_v10  ;;  %v4259_v10 = vld [vmem:[#allocation9 + $0xa0] sm:$0xf] }
  0xb7   : > { %v4260_v14 = vor.u32 %v4595_v11, %v4259_v10  ;;  %1661 = vmatpush.bf16.msrb.mxu1 %v4272_v9  ;;  %v1444_v9 = vrot.slane %v5634_v4, 1 }
  0xb9   : > { %1573 = vmatpush.bf16.msrb.mxu0 %v4260_v14  ;;  %1966 = vmatpush.bf16.msra.mxu2 %v4356_v8  ;;  %v1445_v14 = vsel %vm1438_vm0, %v1442_v58, %v1444_v9 }
  0xbb   : > { %1662 = vmatpush.bf16.msrb.mxu1 %v4264_v15 }
  0xbd   : > { %1967 = vmatpush.bf16.msra.mxu2 %v4348_v41  ;;  %v4339_v41 = vld [vmem:[#allocation9 + $0x140] sm:$0xf] }
  0xc4   : > { %724 = vmatmul.bf16.gmra.mxu2 %v4522_v17  ;;  %684 = vmatmul.bf16.gmra.mxu0 %v4514_v18 }
  0xc5   : > { %813 = vmatmul.bf16.gmra.mxu3 %v4522_v17  ;;  %v4517_v17 = vld [vmem:[%s5472_s17 + $0x30] sm:$0xff] }
  0xc6   : > { %773 = vmatmul.bf16.gmra.mxu1 %v4514_v18  ;;  %v4251_v18 = vld [vmem:[#allocation9 + $0x90] sm:$0xf] }
  0xc7   : > { %v4252_v21 = vor.u32 %v4593_v19, %v4251_v18 }
  0xc9   : > { %1574 = vmatpush.bf16.msrb.mxu0 %v4252_v21 }
  0xcd   : > { %1575 = vmatpush.bf16.msrb.mxu0 %v4244_v29 }
  0xd4   : > { %729 = vmatmul.bf16.gmra.mxu2 %v4523_v25  ;;  %689 = vmatmul.bf16.gmra.mxu0 %v4515_v26 }
  0xd5   : > { %818 = vmatmul.bf16.gmra.mxu3 %v4523_v25  ;;  %v4256_v25 = vor.u32 %v4592_v20, %v4253_v22  ;;  %v5656_v22 = vld [vmem:[%s5506_s24 + $0x20] sm:$0xff] }
  0xd6   : > { %778 = vmatmul.bf16.gmra.mxu1 %v4515_v26  ;;  %v4368_v26 = vor.u32 %v4620_v23, %v4365_v24  ;;  %7327 = vst [vmem:[#allocation34_spill] sm:$0xff] %v5656_v22  ;;  %v1446_v24 = vrot.slane %v5656_v22, 1  ;;  %v5789_v22 = vld [vmem:[%s5506_s24 + $0x50] sm:$0xff] }
  0xd7   : > { %1663 = vmatpush.bf16.msrb.mxu1 %v4256_v25 }
  0xd8   : > { %2054 = vmatpush.bf16.msra.mxu3 %v4368_v26  ;;  %v1447_v29 = vsel %vm1438_vm0, %v1444_v9, %v1446_v24  ;;  %v1450_v9 = vrot.slane %v5700_v6, 1  ;;  %v4331_v6 = vld [vmem:[#allocation9 + $0x130] sm:$0xf] }
  0xdb   : > { %1664 = vmatpush.bf16.msrb.mxu1 %v4248_v32 }
  0xdc   : > { %2055 = vmatpush.bf16.msra.mxu3 %v4360_v52  ;;  %v4341_v52 = vld [vmem:[#allocation9 + $0x148] sm:$0xf0] }
  0xe4   : > { %734 = vmatmul.bf16.gmra.mxu2 %v4524_v45  ;;  %694 = vmatmul.bf16.gmra.mxu0 %v4516_v46 }
  0xe5   : > { %823 = vmatmul.bf16.gmra.mxu3 %v4524_v45  ;;  %v1440_v45 = vrot.slane %v5594_v39, 1 }
  0xe6   : > { %783 = vmatmul.bf16.gmra.mxu1 %v4516_v46  ;;  %v4543_v46 = vld [vmem:[%s5506_s24] sm:$0xff] }
  0xe7   : > { %v1441_v48 = vsel %vm1438_vm0, %v1439_v44, %v1440_v45  ;;  %v1443_v63 = vsel %vm1438_vm0, %v1440_v45, %v1442_v58  ;;  %v4547_v45 = vld [vmem:[%s5506_s24 + $0x20] sm:$0xff]  ;;  %v4344_v58 = vor.u32 %v4614_v51, %v4341_v52  ;;  %v1452_v51 = vrot.slane %v5722_v37, 1 }
  0xe9   : > { %v1453_v38 = vsel %vm1438_vm0, %v1450_v9, %v1452_v51 }
  0xf4   : > { %739 = vmatmul.bf16.gmra.mxu2 %v4525_v16  ;;  %699 = vmatmul.bf16.gmra.mxu0 %v4517_v17 }
  0xf5   : > { %828 = vmatmul.bf16.gmra.mxu3 %v4525_v16  ;;  %v4616_v16 = vld [vmem:[#allocation9 + $0x154] sm:$0xf] }
  0xf6   : > { %788 = vmatmul.bf16.gmra.mxu1 %v4517_v17  ;;  %v4349_v17 = vld [vmem:[#allocation9 + $0x158] sm:$0xf0] }
  0xf7   : > { %v4352_v18 = vor.u32 %v4616_v16, %v4349_v17  ;;  %v4548_v16 = vld [vmem:[%s5506_s24 + $0x28] sm:$0xff] }
  0xf9   : > { %2056 = vmatpush.bf16.msra.mxu3 %v4352_v18 }
  0xfd   : > { %2057 = vmatpush.bf16.msra.mxu3 %v4344_v58 }
 0x104   : > { %744 = vmatmul.bf16.gmra.mxu2 %v4526_v33  ;;  %704 = vmatmul.bf16.gmra.mxu0 %v4518_v34 }
 0x105   : > { %833 = vmatmul.bf16.gmra.mxu3 %v4526_v33 }
 0x106   : > { %793 = vmatmul.bf16.gmra.mxu1 %v4518_v34  ;;  %v5678_v34 = vld [vmem:[%s5506_s24 + $0x28] sm:$0xff] }
 0x107   : > { %7332 = vst [vmem:[#allocation39_spill] sm:$0xff] %v5678_v34  ;;  %v1448_v42 = vrot.slane %v5678_v34, 1 }
 0x109   : > { %v1451_v18 = vsel %vm1438_vm0, %v1448_v42, %v1450_v9 }
 0x111   : > { %v5600_v47 = vpop.f32.mrf.mxu0 }
 0x113   : > { %v5603_v49 = vpop.f32.mrf.mxu1 }
 0x114   : > { %1071 = vmatmul.bf16.vlgmr.msrb.gmra.mxu2 %v4543_v46  ;;  %1576 = vmatmul.bf16.vlgmr.msrb.gmra.mxu0 %v1441_v48 }
 0x115   : > { %1160 = vmatmul.bf16.vlgmr.msrb.gmra.mxu3 %v4543_v46 }
 0x116   : > { %1665 = vmatmul.bf16.vlgmr.msrb.gmra.mxu1 %v1441_v48  ;;  %v1449_v48 = vsel %vm1438_vm0, %v1446_v24, %v1448_v42 }
 0x117   : > { %v5605_v53 = vpop.f32.mrf.mxu2 }
 0x118   : > { %v5607_v54 = vpop.f32.mrf.mxu3 }
 0x119   : > { %v5609_v55 = vpop.f32.mrf.mxu0 }
 0x11b   : > { %v5614_v57 = vpop.f32.mrf.mxu1 }
 0x11f   : > { %v5617_v59 = vpop.f32.mrf.mxu2 }
 0x120   : > { %v5619_v60 = vpop.f32.mrf.mxu3 }
 0x121   : > { %v5622_v62 = vpop.f32.mrf.mxu0 }
 0x123   : > { %v5625_v0 = vpop.f32.mrf.mxu1 }
 0x124   : > { %1076 = vmatmul.bf16.gmra.mxu2 %v4544_v61  ;;  %1581 = vmatmul.bf16.gmra.mxu0 %v1443_v63 }
 0x125   : > { %1165 = vmatmul.bf16.gmra.mxu3 %v4544_v61 }
 0x126   : > { %1670 = vmatmul.bf16.gmra.mxu1 %v1443_v63 }
 0x127   : > { %v5627_v1 = vpop.f32.mrf.mxu2 }
 0x128   : > { %v5629_v2 = vpop.f32.mrf.mxu3 }
 0x129   : > { %v5631_v3 = vpop.f32.mrf.mxu0 }
 0x12b   : > { %v5636_v7 = vpop.f32.mrf.mxu1 }
 0x12f   : > { %v5639_v10 = vpop.f32.mrf.mxu2 }
 0x130   : > { %v5641_v11 = vpop.f32.mrf.mxu3 }
 0x131   : > { %v5644_v13 = vpop.f32.mrf.mxu0 }
 0x133   : > { %v5647_v15 = vpop.f32.mrf.mxu1 }
 0x134   : > { %1081 = vmatmul.bf16.gmra.mxu2 %v4545_v12  ;;  %1586 = vmatmul.bf16.gmra.mxu0 %v1445_v14 }
 0x135   : > { %1170 = vmatmul.bf16.gmra.mxu3 %v4545_v12 }
 0x136   : > { %1675 = vmatmul.bf16.gmra.mxu1 %v1445_v14 }
 0x137   : > { %v5649_v19 = vpop.f32.mrf.mxu2 }
 0x138   : > { %7325 = vst [vmem:[#allocation32_spill] sm:$0xff] %v5649_v19  ;;  %v5651_v20 = vpop.f32.mrf.mxu3 }
 0x139   : > { %7326 = vst [vmem:[#allocation33_spill] sm:$0xff] %v5651_v20  ;;  %v5653_v21 = vpop.f32.mrf.mxu0 }
 0x13b   : > { %v5658_v23 = vpop.f32.mrf.mxu1 }
 0x13f   : > { %v5661_v25 = vpop.f32.mrf.mxu2 }
 0x140   : > { %7328 = vst [vmem:[#allocation35_spill] sm:$0xff] %v5661_v25  ;;  %v5663_v26 = vpop.f32.mrf.mxu3 }
 0x141   : > { %7329 = vst [vmem:[#allocation36_spill] sm:$0xff] %v5663_v26  ;;  %v5666_v28 = vpop.f32.mrf.mxu0 }
 0x143   : > { %v5669_v30 = vpop.f32.mrf.mxu1 }
 0x144   : > { %1086 = vmatmul.bf16.gmra.mxu2 %v4546_v27  ;;  %1591 = vmatmul.bf16.gmra.mxu0 %v1447_v29 }
 0x145   : > { %1175 = vmatmul.bf16.gmra.mxu3 %v4546_v27 }
 0x146   : > { %1680 = vmatmul.bf16.gmra.mxu1 %v1447_v29 }
 0x147   : > { %v5671_v31 = vpop.f32.mrf.mxu2 }
 0x148   : > { %7330 = vst [vmem:[#allocation37_spill] sm:$0xff] %v5671_v31  ;;  %v5673_v32 = vpop.f32.mrf.mxu3 }
 0x149   : > { %7331 = vst [vmem:[#allocation38_spill] sm:$0xff] %v5673_v32  ;;  %v5675_v33 = vpop.f32.mrf.mxu0 }
 0x14b   : > { %v5680_v40 = vpop.f32.mrf.mxu1 }
 0x14f   : > { %v5683_v43 = vpop.f32.mrf.mxu2 }
 0x150   : > { %7333 = vst [vmem:[#allocation40_spill] sm:$0xff] %v5683_v43  ;;  %v5685_v44 = vpop.f32.mrf.mxu3 }
 0x151   : > { %7334 = vst [vmem:[#allocation41_spill] sm:$0xff] %v5685_v44  ;;  %v5688_v46 = vpop.f32.mrf.mxu0 }
 0x153   : > { %v5691_v50 = vpop.f32.mrf.mxu1 }
 0x154   : > { %1091 = vmatmul.bf16.gmra.mxu2 %v4547_v45  ;;  %1596 = vmatmul.bf16.gmra.mxu0 %v1449_v48 }
 0x155   : > { %1180 = vmatmul.bf16.gmra.mxu3 %v4547_v45  ;;  %v4615_v45 = vld [vmem:[#allocation9 + $0x144] sm:$0xf0] }
 0x156   : > { %1685 = vmatmul.bf16.gmra.mxu1 %v1449_v48  ;;  %v4340_v42 = vor.u32 %v4615_v45, %v4339_v41  ;;  %v4612_v41 = vld [vmem:[#allocation9 + $0x134] sm:$0xf]  ;;  %v4333_v45 = vld [vmem:[#allocation9 + $0x138] sm:$0xf0] }
 0x157   : > { %v5693_v61 = vpop.f32.mrf.mxu2 }
 0x158   : > { %7335 = vst [vmem:[#allocation42_spill] sm:$0xff] %v5693_v61  ;;  %v5695_v63 = vpop.f32.mrf.mxu3  ;;  %1968 = vmatpush.bf16.msra.mxu2 %v4340_v42  ;;  %v4336_v42 = vor.u32 %v4612_v41, %v4333_v45 }
 0x159   : > { %7336 = vst [vmem:[#allocation43_spill] sm:$0xff] %v5695_v63  ;;  %v5697_v5 = vpop.f32.mrf.mxu0  ;;  %v4613_v63 = vld [vmem:[#allocation9 + $0x134] sm:$0xf0] }
 0x15a   : > { %2058 = vmatpush.bf16.msra.mxu3 %v4336_v42 }
 0x15b   : > { %v5702_v8 = vpop.f32.mrf.mxu1 }
 0x15f   : > { %v5705_v12 = vpop.f32.mrf.mxu2 }
 0x160   : > { %7338 = vst [vmem:[#allocation45_spill] sm:$0xff] %v5705_v12  ;;  %v5707_v14 = vpop.f32.mrf.mxu3 }
 0x161   : > { %7339 = vst [vmem:[#allocation46_spill] sm:$0xff] %v5707_v14  ;;  %v5710_v17 = vpop.f32.mrf.mxu0 }
 0x163   : > { %v5713_v24 = vpop.f32.mrf.mxu1 }
 0x164   : > { %1096 = vmatmul.bf16.gmra.mxu2 %v4548_v16  ;;  %1601 = vmatmul.bf16.gmra.mxu0 %v1451_v18 }
 0x165   : > { %1185 = vmatmul.bf16.gmra.mxu3 %v4548_v16  ;;  %v4549_v16 = vld [vmem:[%s5506_s24 + $0x30] sm:$0xff] }
 0x166   : > { %1690 = vmatmul.bf16.gmra.mxu1 %v1451_v18 }
 0x167   : > { %v5715_v27 = vpop.f32.mrf.mxu2 }
 0x168   : > { %7340 = vst [vmem:[#allocation47_spill] sm:$0xff] %v5715_v27  ;;  %v5717_v29 = vpop.f32.mrf.mxu3  ;;  %v5744_v27 = vld [vmem:[%s5506_s24 + $0x40] sm:$0xff] }
 0x169   : > { %7341 = vst [vmem:[#allocation48_spill] sm:$0xff] %v5717_v29  ;;  %v5719_v35 = vpop.f32.mrf.mxu0  ;;  %v1454_v14 = vrot.slane %v5744_v27, 1 }
 0x16a   : > { %7347 = vst [vmem:[#allocation54_spill] sm:$0xff] %v5744_v27 }
 0x16b   : > { %v5724_v48 = vpop.f32.mrf.mxu1  ;;  %v1455_v45 = vsel %vm1438_vm0, %v1452_v51, %v1454_v14  ;;  %v4332_v51 = vor.u32 %v4613_v63, %v4331_v6 }
 0x16d   : > { %1969 = vmatpush.bf16.msra.mxu2 %v4332_v51  ;;  %v4610_v51 = vld [vmem:[#allocation9 + $0x124] sm:$0xf] }
 0x16f   : > { %v5727_v52 = vpop.f32.mrf.mxu2 }
 0x170   : > { %7343 = vst [vmem:[#allocation50_spill] sm:$0xff] %v5727_v52  ;;  %v5729_v58 = vpop.f32.mrf.mxu3 }
 0x171   : > { %7344 = vst [vmem:[#allocation51_spill] sm:$0xff] %v5729_v58  ;;  %v5732_v18 = vpop.f32.mrf.mxu0 }
 0x173   : > { %v5735_v29 = vpop.f32.mrf.mxu1 }
 0x174   : > { %1101 = vmatmul.bf16.gmra.mxu2 %v4549_v16  ;;  %1606 = vmatmul.bf16.gmra.mxu0 %v1453_v38 }
 0x175   : > { %1190 = vmatmul.bf16.gmra.mxu3 %v4549_v16  ;;  %v4550_v16 = vld [vmem:[%s5506_s24 + $0x38] sm:$0xff] }
 0x176   : > { %1695 = vmatmul.bf16.gmra.mxu1 %v1453_v38 }
 0x177   : > { %v5737_v37 = vpop.f32.mrf.mxu2 }
 0x178   : > { %7345 = vst [vmem:[#allocation52_spill] sm:$0xff] %v5737_v37  ;;  %v5739_v52 = vpop.f32.mrf.mxu3 }
 0x179   : > { %7346 = vst [vmem:[#allocation53_spill] sm:$0xff] %v5739_v52  ;;  %v5741_v58 = vpop.f32.mrf.mxu0 }
 0x17b   : > { %v5746_v9 = vpop.f32.mrf.mxu1 }
 0x17f   : > { %v5749_v12 = vpop.f32.mrf.mxu2 }
 0x180   : > { %7348 = vst [vmem:[#allocation55_spill] sm:$0xff] %v5749_v12  ;;  %v5751_v38 = vpop.f32.mrf.mxu3  ;;  %v5766_v12 = vld [vmem:[%s5506_s24 + $0x48] sm:$0xff] }
 0x181   : > { %7349 = vst [vmem:[#allocation56_spill] sm:$0xff] %v5751_v38  ;;  %v5754_v41 = vpop.f32.mrf.mxu0  ;;  %v1456_v61 = vrot.slane %v5766_v12, 1 }
 0x182   : > { %7352 = vst [vmem:[#allocation59_spill] sm:$0xff] %v5766_v12 }
 0x183   : > { %v5757_v52 = vpop.f32.mrf.mxu1  ;;  %v1457_v43 = vsel %vm1438_vm0, %v1454_v14, %v1456_v61 }
 0x184   : > { %1106 = vmatmul.bf16.gmra.mxu2 %v4550_v16  ;;  %1611 = vmatmul.bf16.gmra.mxu0 %v1455_v45 }
 0x185   : > { %1195 = vmatmul.bf16.gmra.mxu3 %v4550_v16  ;;  %v479_v16 = vld [vmem:[%s7283_s5] sm:$0x3] }
 0x186   : > { %1700 = vmatmul.bf16.gmra.mxu1 %v1455_v45  ;;  %v5780_v34 = vperm.slane %v479_v16, 0  ;;  %v5782_v31 = vperm.slane %v479_v16, 1 }
 0x187   : > { %v5759_v42 = vpop.f32.mrf.mxu2 }
 0x188   : > { %7350 = vst [vmem:[#allocation57_spill] sm:$0xff] %v5759_v42  ;;  %v5761_v37 = vpop.f32.mrf.mxu3  ;;  %v671_v63 = vadd.f32 %v5600_v47, %v5780_v34  ;;  %v760_v6 = vadd.f32 %v5603_v49, %v5782_v31  ;;  %v673_v49 = vadd.f32 %v5609_v55, %v5780_v34  ;;  %v4637_v55 = vld [vmem:[#allocation12 + $0x74] sm:$0xf0] }
 0x189   : > { %7351 = vst [vmem:[#allocation58_spill] sm:$0xff] %v5761_v37  ;;  %v5763_v27 = vpop.f32.mrf.mxu0  ;;  %v4551_v37 = vld [vmem:[%s5506_s24 + $0x40] sm:$0xff] }
 0x18b   : > { %v5768_v38 = vpop.f32.mrf.mxu1 }
 0x18f   : > { %v5771_v44 = vpop.f32.mrf.mxu2 }
 0x190   : > { %7353 = vst [vmem:[#allocation60_spill] sm:$0xff] %v5771_v44  ;;  %v5776_v45 = vpop.f32.mrf.mxu3 }
 0x191   : > { %7354 = vst [vmem:[#allocation61_spill] sm:$0xff] %v5776_v45  ;;  %v1577_v42 = vpop.f32.mrf.mxu0  ;;  %v4325_v45 = vld [vmem:[#allocation9 + $0x128] sm:$0xf0] }
 0x192   : > { %v4328_v44 = vor.u32 %v4610_v51, %v4325_v45 }
 0x193   : > { %v1666_v32 = vpop.f32.mrf.mxu1 }
 0x194   : > { %1111 = vmatmul.bf16.gmra.mxu2 %v4551_v37  ;;  %1616 = vmatmul.bf16.gmra.mxu0 %v1457_v43 }
 0x195   : > { %1200 = vmatmul.bf16.gmra.mxu3 %v4551_v37  ;;  %v1458_v37 = vrot.slane %v5789_v22, 1 }
 0x196   : > { %1705 = vmatmul.bf16.gmra.mxu1 %v1457_v43  ;;  %2059 = vmatpush.bf16.msra.mxu3 %v4328_v44  ;;  %v762_v43 = vadd.f32 %v5614_v57, %v5782_v31  ;;  %v676_v57 = vadd.f32 %v5622_v62, %v5780_v34 }
 0x197   : > { %v1072_v14 = vpop.f32.mrf.mxu2 }
 0x198   : > { %v1241_v12 = vadd.f32 %v1072_v14, %v671_v63  ;;  %v1161_v26 = vpop.f32.mrf.mxu3 }
 0x199   : > { %v1242_v16 = vadd.f32 %v1161_v26, %v760_v6  ;;  %v1579_v25 = vpop.f32.mrf.mxu0  ;;  %v4552_v26 = vld [vmem:[%s5506_s24 + $0x48] sm:$0xff] }
 0x19a   : > { %v5791_v47 = vadd.f32 %v1577_v42, %v1241_v12  ;;  %v1459_v12 = vsel %vm1438_vm0, %v1456_v61, %v1458_v37  ;;  %v4636_v61 = vld [vmem:[#allocation12 + $0x74] sm:$0xf] }
 0x19b   : > { %v1668_v20 = vpop.f32.mrf.mxu1  ;;  %v5793_v19 = vadd.f32 %v1666_v32, %v1242_v16  ;;  %v4459_v16 = vld [vmem:[#allocation12 + $0x70] sm:$0xf] }
 0x19c   : > { %7355 = vst [vmem:[#allocation62_spill] sm:$0xff] %v5791_v47 }
 0x19f   : > { %v1074_v45 = vpop.f32.mrf.mxu2 }
 0x1a0   : > { %v1243_v63 = vadd.f32 %v1074_v45, %v673_v49  ;;  %v1163_v44 = vpop.f32.mrf.mxu3  ;;  %v4460_v49 = vor.u32 %v4637_v55, %v4459_v16 }
 0x1a1   : > { %v1244_v6 = vadd.f32 %v1163_v44, %v762_v43  ;;  %v1582_v51 = vpop.f32.mrf.mxu0  ;;  %v765_v43 = vadd.f32 %v5625_v0, %v5782_v31  ;;  %v4323_v0 = vld [vmem:[#allocation9 + $0x120] sm:$0xf] }
 0x1a2   : > { %v5802_v42 = vadd.f32 %v1579_v25, %v1243_v63  ;;  %v4461_v25 = vld [vmem:[#allocation12 + $0x78] sm:$0xf0]  ;;  %2997 = vmatpush.bf16.msra.mxu0 %v4460_v49 }
 0x1a3   : > { %v1671_v32 = vpop.f32.mrf.mxu1  ;;  %v5804_v14 = vadd.f32 %v1668_v20, %v1244_v6  ;;  %v4464_v45 = vor.u32 %v4636_v61, %v4461_v25 }
 0x1a4   : > { %7356 = vst [vmem:[#allocation63_spill] sm:$0xff] %v5802_v42  ;;  %1116 = vmatmul.bf16.gmra.mxu2 %v4552_v26  ;;  %1621 = vmatmul.bf16.gmra.mxu0 %v1459_v12  ;;  %v5811_v42 = vld [vmem:[%s5506_s24 + $0x58] sm:$0xff] }
 0x1a5   : > { %1205 = vmatmul.bf16.gmra.mxu3 %v4552_v26  ;;  %3086 = vmatpush.bf16.msra.mxu1 %v4464_v45  ;;  %v4611_v26 = vld [vmem:[#allocation9 + $0x124] sm:$0xf0] }
 0x1a6   : > { %1710 = vmatmul.bf16.gmra.mxu1 %v1459_v12  ;;  %v678_v12 = vadd.f32 %v5631_v3, %v5780_v34  ;;  %v4324_v49 = vor.u32 %v4611_v26, %v4323_v0  ;;  %v681_v3 = vadd.f32 %v5644_v13, %v5780_v34  ;;  %v4608_v0 = vld [vmem:[#allocation9 + $0x114] sm:$0xf]  ;;  %v4317_v26 = vld [vmem:[#allocation9 + $0x118] sm:$0xf0] }
 0x1a7   : > { %v1077_v20 = vpop.f32.mrf.mxu2 }
 0x1a8   : > { %v1245_v63 = vadd.f32 %v1077_v20, %v676_v57  ;;  %v1166_v44 = vpop.f32.mrf.mxu3  ;;  %v767_v57 = vadd.f32 %v5636_v7, %v5782_v31  ;;  %1970 = vmatpush.bf16.msra.mxu2 %v4324_v49  ;;  %v770_v7 = vadd.f32 %v5647_v15, %v5782_v31  ;;  %v683_v15 = vadd.f32 %v5653_v21, %v5780_v34  ;;  %v4635_v21 = vld [vmem:[#allocation12 + $0x64] sm:$0xf0] }
 0x1a9   : > { %v1246_v6 = vadd.f32 %v1166_v44, %v765_v43  ;;  %v1584_v62 = vpop.f32.mrf.mxu0  ;;  %v1460_v43 = vrot.slane %v5811_v42, 1 }
 0x1aa   : > { %v5813_v47 = vadd.f32 %v1582_v51, %v1245_v63  ;;  %v4553_v51 = vld [vmem:[%s5506_s24 + $0x50] sm:$0xff] }
 0x1ab   : > { %v1673_v16 = vpop.f32.mrf.mxu1  ;;  %v5815_v55 = vadd.f32 %v1671_v32, %v1246_v6  ;;  %v1461_v32 = vsel %vm1438_vm0, %v1458_v37, %v1460_v43 }
 0x1ac   : > { %7357 = vst [vmem:[#allocation64_spill] sm:$0xff] %v5813_v47 }
 0x1af   : > { %v1079_v61 = vpop.f32.mrf.mxu2 }
 0x1b0   : > { %v1247_v25 = vadd.f32 %v1079_v61, %v678_v12  ;;  %v1168_v45 = vpop.f32.mrf.mxu3  ;;  %v4320_v12 = vor.u32 %v4608_v0, %v4317_v26  ;;  %v5833_v61 = vld [vmem:[%s5506_s24 + $0x60] sm:$0xff] }
 0x1b1   : > { %v1248_v20 = vadd.f32 %v1168_v45, %v767_v57  ;;  %v1587_v63 = vpop.f32.mrf.mxu0 }
 0x1b2   : > { %v5824_v44 = vadd.f32 %v1584_v62, %v1247_v25  ;;  %2060 = vmatpush.bf16.msra.mxu3 %v4320_v12 }
 0x1b3   : > { %v1676_v6 = vpop.f32.mrf.mxu1  ;;  %v5826_v47 = vadd.f32 %v1673_v16, %v1248_v20  ;;  %v1462_v20 = vrot.slane %v5833_v61, 1 }
 0x1b4   : > { %1121 = vmatmul.bf16.gmra.mxu2 %v4553_v51  ;;  %1626 = vmatmul.bf16.gmra.mxu0 %v1461_v32 }
 0x1b5   : > { %1210 = vmatmul.bf16.gmra.mxu3 %v4553_v51  ;;  %v772_v51 = vadd.f32 %v5658_v23, %v5782_v31  ;;  %v686_v23 = vadd.f32 %v5666_v28, %v5780_v34 }
 0x1b6   : > { %1715 = vmatmul.bf16.gmra.mxu1 %v1461_v32 }
 0x1b7   : > { %v1082_v37 = vpop.f32.mrf.mxu2 }
 0x1b8   : > { %v1249_v62 = vadd.f32 %v1082_v37, %v681_v3  ;;  %v1171_v49 = vpop.f32.mrf.mxu3 }
 0x1b9   : > { %v1250_v16 = vadd.f32 %v1171_v49, %v770_v7  ;;  %v1589_v57 = vpop.f32.mrf.mxu0  ;;  %v4554_v7 = vld [vmem:[%s5506_s24 + $0x58] sm:$0xff]  ;;  %v4451_v49 = vld [vmem:[#allocation12 + $0x60] sm:$0xf] }
 0x1ba   : > { %v5835_v13 = vadd.f32 %v1587_v63, %v1249_v62  ;;  %v1463_v63 = vsel %vm1438_vm0, %v1460_v43, %v1462_v20  ;;  %v4634_v43 = vld [vmem:[#allocation12 + $0x64] sm:$0xf] }
 0x1bb   : > { %v1678_v25 = vpop.f32.mrf.mxu1  ;;  %v5837_v45 = vadd.f32 %v1676_v6, %v1250_v16  ;;  %v4452_v16 = vor.u32 %v4635_v21, %v4451_v49 }
 0x1bd   : > { %2998 = vmatpush.bf16.msra.mxu0 %v4452_v16 }
 0x1bf   : > { %v1084_v32 = vpop.f32.mrf.mxu2 }
 0x1c0   : > { %v1251_v3 = vadd.f32 %v1084_v32, %v683_v15  ;;  %v1173_v0 = vpop.f32.mrf.mxu3  ;;  %v775_v15 = vadd.f32 %v5669_v30, %v5782_v31  ;;  %v4315_v30 = vld [vmem:[#allocation9 + $0x110] sm:$0xf] }
 0x1c1   : > { %v1252_v26 = vadd.f32 %v1173_v0, %v772_v51  ;;  %v1592_v12 = vpop.f32.mrf.mxu0 }
 0x1c2   : > { %v5846_v37 = vadd.f32 %v1589_v57, %v1251_v3  ;;  %v4453_v57 = vld [vmem:[#allocation12 + $0x68] sm:$0xf0] }
 0x1c3   : > { %v1681_v6 = vpop.f32.mrf.mxu1  ;;  %v5848_v62 = vadd.f32 %v1678_v25, %v1252_v26  ;;  %v4456_v51 = vor.u32 %v4634_v43, %v4453_v57  ;;  %v5855_v26 = vld [vmem:[%s5506_s24 + $0x68] sm:$0xff] }
 0x1c4   : > { %7358 = vst [vmem:[#allocation65_spill] sm:$0xff] %v5846_v37  ;;  %1126 = vmatmul.bf16.gmra.mxu2 %v4554_v7  ;;  %1631 = vmatmul.bf16.gmra.mxu0 %v1463_v63 }
 0x1c5   : > { %1215 = vmatmul.bf16.gmra.mxu3 %v4554_v7  ;;  %3087 = vmatpush.bf16.msra.mxu1 %v4456_v51  ;;  %v4609_v7 = vld [vmem:[#allocation9 + $0x114] sm:$0xf0] }
 0x1c6   : > { %1720 = vmatmul.bf16.gmra.mxu1 %v1463_v63  ;;  %v688_v63 = vadd.f32 %v5675_v33, %v5780_v34  ;;  %v4316_v16 = vor.u32 %v4609_v7, %v4315_v30  ;;  %v691_v33 = vadd.f32 %v5688_v46, %v5780_v34  ;;  %v4606_v30 = vld [vmem:[#allocation9 + $0x104] sm:$0xf]  ;;  %v4309_v7 = vld [vmem:[#allocation9 + $0x108] sm:$0xf0] }
 0x1c7   : > { %v1087_v25 = vpop.f32.mrf.mxu2 }
 0x1c8   : > { %v1253_v32 = vadd.f32 %v1087_v25, %v686_v23  ;;  %v1176_v3 = vpop.f32.mrf.mxu3  ;;  %v777_v23 = vadd.f32 %v5680_v40, %v5782_v31  ;;  %1971 = vmatpush.bf16.msra.mxu2 %v4316_v16  ;;  %v780_v40 = vadd.f32 %v5691_v50, %v5782_v31  ;;  %v693_v50 = vadd.f32 %v5697_v5, %v5780_v34 }
 0x1c9   : > { %v1254_v0 = vadd.f32 %v1176_v3, %v775_v15  ;;  %v1594_v28 = vpop.f32.mrf.mxu0  ;;  %v1464_v15 = vrot.slane %v5855_v26, 1  ;;  %v696_v5 = vadd.f32 %v5710_v17, %v5780_v34 }
 0x1ca   : > { %v5857_v37 = vadd.f32 %v1592_v12, %v1253_v32  ;;  %v4555_v12 = vld [vmem:[%s5506_s24 + $0x60] sm:$0xff] }
 0x1cb   : > { %v1683_v49 = vpop.f32.mrf.mxu1  ;;  %v5859_v21 = vadd.f32 %v1681_v6, %v1254_v0  ;;  %v1465_v6 = vsel %vm1438_vm0, %v1462_v20, %v1464_v15 }
 0x1cc   : > { %7359 = vst [vmem:[#allocation66_spill] sm:$0xff] %v5857_v37 }
 0x1cf   : > { %v1089_v43 = vpop.f32.mrf.mxu2 }
 0x1d0   : > { %v1255_v57 = vadd.f32 %v1089_v43, %v688_v63  ;;  %v1178_v51 = vpop.f32.mrf.mxu3  ;;  %v4312_v63 = vor.u32 %v4606_v30, %v4309_v7  ;;  %v4588_v43 = vld [vmem:[%s5506_s24 + $0x70] sm:$0xff]  ;;  %v4556_v30 = vld [vmem:[%s5506_s24 + $0x68] sm:$0xff] }
 0x1d1   : > { %v1256_v25 = vadd.f32 %v1178_v51, %v777_v23  ;;  %v1597_v32 = vpop.f32.mrf.mxu0 }
 0x1d2   : > { %v5868_v3 = vadd.f32 %v1594_v28, %v1255_v57  ;;  %2061 = vmatpush.bf16.msra.mxu3 %v4312_v63 }
 0x1d3   : > { %v1686_v0 = vpop.f32.mrf.mxu1  ;;  %v5870_v37 = vadd.f32 %v1683_v49, %v1256_v25  ;;  %v1466_v25 = vrot.slane %v4588_v43, 1  ;;  %v4445_v43 = vld [vmem:[#allocation12 + $0x58] sm:$0xf0] }
 0x1d4   : > { %1131 = vmatmul.bf16.gmra.mxu2 %v4555_v12  ;;  %1636 = vmatmul.bf16.gmra.mxu0 %v1465_v6 }
 0x1d5   : > { %1220 = vmatmul.bf16.gmra.mxu3 %v4555_v12  ;;  %v782_v12 = vadd.f32 %v5702_v8, %v5782_v31  ;;  %v1467_v63 = vsel %vm1438_vm0, %v1464_v15, %v1466_v25 }
 0x1d6   : > { %1725 = vmatmul.bf16.gmra.mxu1 %v1465_v6 }
 0x1d7   : > { %v1092_v20 = vpop.f32.mrf.mxu2 }
 0x1d8   : > { %v1257_v28 = vadd.f32 %v1092_v20, %v691_v33  ;;  %v1181_v16 = vpop.f32.mrf.mxu3 }
 0x1d9   : > { %v1258_v49 = vadd.f32 %v1181_v16, %v780_v40  ;;  %v5876_v23 = vpop.f32.mrf.mxu0  ;;  %v785_v16 = vadd.f32 %v5713_v24, %v5782_v31 }
 0x1da   : > { %7360 = vst [vmem:[#allocation67_spill] sm:$0xff] %v5876_v23  ;;  %v5879_v46 = vadd.f32 %v1597_v32, %v1257_v28  ;;  %v4633_v28 = vld [vmem:[#allocation12 + $0x54] sm:$0xf0]  ;;  %v4589_v23 = vld [vmem:[%s5506_s24 + $0x78] sm:$0xff] }
 0x1db   : > { %v5881_v57 = vpop.f32.mrf.mxu1  ;;  %v5883_v51 = vadd.f32 %v1686_v0, %v1258_v49  ;;  %v4443_v0 = vld [vmem:[#allocation12 + $0x50] sm:$0xf]  ;;  %v4632_v49 = vld [vmem:[#allocation12 + $0x54] sm:$0xf] }
 0x1dc   : > { %v4444_v8 = vor.u32 %v4633_v28, %v4443_v0  ;;  %v698_v28 = vadd.f32 %v5719_v35, %v5780_v34  ;;  %v701_v35 = vadd.f32 %v5732_v18, %v5780_v34 }
 0x1de   : > { %2999 = vmatpush.bf16.msra.mxu0 %v4444_v8  ;;  %v787_v8 = vadd.f32 %v5724_v48, %v5782_v31  ;;  %v790_v48 = vadd.f32 %v5735_v29, %v5782_v31  ;;  %v703_v29 = vadd.f32 %v5741_v58, %v5780_v34  ;;  %v706_v58 = vadd.f32 %v5754_v41, %v5780_v34 }
 0x1df   : > { %v1094_v6 = vpop.f32.mrf.mxu2  ;;  %v7366_v41 = vunpack.c.l.b16 %v5590_v36 }
 0x1e0   : > { %v5889_v33 = vadd.f32 %v1094_v6, %v693_v50  ;;  %v1183_v40 = vpop.f32.mrf.mxu3  ;;  %v4448_v50 = vor.u32 %v4632_v49, %v4445_v43 }
 0x1e1   : > { %v5892_v7 = vadd.f32 %v1183_v40, %v782_v12  ;;  %v1602_v32 = vpop.f32.mrf.mxu0 }
 0x1e2   : > { %7361 = vst [vmem:[#allocation68_spill] sm:$0xff] %v5889_v33  ;;  %3088 = vmatpush.bf16.msra.mxu1 %v4448_v50  ;;  %v4557_v50 = vld [vmem:[%s5506_s24 + $0x70] sm:$0xff] }
 0x1e3   : > { %v1691_v20 = vpop.f32.mrf.mxu1 }
 0x1e4   : > { %1136 = vmatmul.bf16.gmra.mxu2 %v4556_v30  ;;  %1641 = vmatmul.bf16.gmra.mxu0 %v1467_v63 }
 0x1e5   : > { %1225 = vmatmul.bf16.gmra.mxu3 %v4556_v30  ;;  %v4307_v30 = vld [vmem:[#allocation9 + $0x100] sm:$0xf] }
 0x1e6   : > { %1730 = vmatmul.bf16.gmra.mxu1 %v1467_v63  ;;  %v4607_v63 = vld [vmem:[#allocation9 + $0x104] sm:$0xf0] }
 0x1e7   : > { %v1097_v15 = vpop.f32.mrf.mxu2 }
 0x1e8   : > { %v1261_v12 = vadd.f32 %v1097_v15, %v696_v5  ;;  %v1186_v6 = vpop.f32.mrf.mxu3  ;;  %v4308_v5 = vor.u32 %v4607_v63, %v4307_v30 }
 0x1e9   : > { %v1262_v40 = vadd.f32 %v1186_v6, %v785_v16  ;;  %v5899_v17 = vpop.f32.mrf.mxu0  ;;  %v1468_v16 = vrot.slane %v4589_v23, 1 }
 0x1ea   : > { %7362 = vst [vmem:[#allocation69_spill] sm:$0xff] %v5899_v17  ;;  %v5902_v33 = vadd.f32 %v1602_v32, %v1261_v12  ;;  %1972 = vmatpush.bf16.msra.mxu2 %v4308_v5 }
 0x1eb   : > { %v5904_v0 = vpop.f32.mrf.mxu1  ;;  %v5906_v24 = vadd.f32 %v1691_v20, %v1262_v40  ;;  %v1469_v12 = vsel %vm1438_vm0, %v1466_v25, %v1468_v16  ;;  %v1337_v40 = vld [vmem:[%s5506_s24 + $0x80] sm:$0x1] }
 0x1ec   : > { %v1420_v23 = vunpack.c.l.b16 %v1337_v40 }
 0x1ee   : > { %v1437_v25 = vpack.c.b16 %v1420_v23, %v1420_v23 }
 0x1ef   : > { %v1099_v49 = vpop.f32.mrf.mxu2 }
 0x1f0   : > { %v5912_v43 = vadd.f32 %v1099_v49, %v698_v28  ;;  %v1188_v32 = vpop.f32.mrf.mxu3 }
 0x1f1   : > { %v5915_v15 = vadd.f32 %v1188_v32, %v787_v8  ;;  %v1607_v20 = vpop.f32.mrf.mxu0 }
 0x1f3   : > { %v1696_v6 = vpop.f32.mrf.mxu1 }
 0x1f4   : > { %1141 = vmatmul.bf16.gmra.mxu2 %v4557_v50  ;;  %1646 = vmatmul.bf16.gmra.mxu0 %v1469_v12 }
 0x1f5   : > { %1230 = vmatmul.bf16.gmra.mxu3 %v4557_v50  ;;  %v792_v50 = vadd.f32 %v5746_v9, %v5782_v31 }
 0x1f6   : > { %1735 = vmatmul.bf16.gmra.mxu1 %v1469_v12  ;;  %v1470_v12 = vrot.slane %v1437_v25, 1  ;;  %v795_v25 = vadd.f32 %v5757_v52, %v5782_v31 }
 0x1f7   : > { %v1102_v30 = vpop.f32.mrf.mxu2 }
 0x1f8   : > { %v1265_v63 = vadd.f32 %v1102_v30, %v701_v35  ;;  %v1191_v28 = vpop.f32.mrf.mxu3  ;;  %v4558_v30 = vld [vmem:[%s5506_s24 + $0x78] sm:$0xff]  ;;  %v1471_v23 = vsel %vm1438_vm0, %v1468_v16, %v1470_v12 }
 0x1f9   : > { %v1266_v5 = vadd.f32 %v1191_v28, %v790_v48  ;;  %v5923_v8 = vpop.f32.mrf.mxu0 }
 0x1fa   : > { %7363 = vst [vmem:[#allocation70_spill] sm:$0xff] %v5923_v8  ;;  %v5925_v49 = vadd.f32 %v1607_v20, %v1265_v63  ;;  %v4631_v8 = vld [vmem:[#allocation12 + $0x44] sm:$0xf0] }
 0x1fb   : > { %v5927_v18 = vpop.f32.mrf.mxu1  ;;  %v5929_v32 = vadd.f32 %v1696_v6, %v1266_v5  ;;  %v1810_v6 = vld [vmem:[%s5506_s24] sm:$0xc]  ;;  %v4435_v5 = vld [vmem:[#allocation12 + $0x40] sm:$0xf] }
 0x1fc   : > { %7364 = vst [vmem:[#allocation71_spill] sm:$0xff] %v5925_v49  ;;  %v4436_v9 = vor.u32 %v4631_v8, %v4435_v5 }
 0x1fe   : > { %3000 = vmatpush.bf16.msra.mxu0 %v4436_v9 }
 0x1ff   : > { %v1104_v40 = vpop.f32.mrf.mxu2 }
 0x200   : > { %v5935_v35 = vadd.f32 %v1104_v40, %v703_v29  ;;  %v1193_v48 = vpop.f32.mrf.mxu3  ;;  %v1831_v29 = vunpack.c.l.b16 %v1810_v6  ;;  %v4437_v40 = vld [vmem:[#allocation12 + $0x48] sm:$0xf0]  ;;  %v797_v6 = vadd.f32 %v5768_v38, %v5782_v31  ;;  %v800_v38 = vadd.f32 %v5607_v54, %v5782_v31 }
 0x201   : > { %v5938_v28 = vadd.f32 %v1193_v48, %v792_v50  ;;  %v1612_v20 = vpop.f32.mrf.mxu0  ;;  %v4630_v50 = vld [vmem:[#allocation12 + $0x44] sm:$0xf]  ;;  %v802_v54 = vadd.f32 %v5619_v60, %v5782_v31  ;;  %v716_v60 = vadd.f32 %v5627_v1, %v5780_v34  ;;  %v1841_v1 = vrot.slane %v5634_v4, 2 }
 0x202   : > { %7365 = vst [vmem:[#allocation72_spill] sm:$0xff] %v5935_v35  ;;  %v4440_v16 = vor.u32 %v4630_v50, %v4437_v40  ;;  %v1833_v8 = vpack.c.b16 %v7366_v41, %v1831_v29  ;;  %v7371_v4 = vld [vmem:[#allocation32_spill] sm:$0xff] }
 0x203   : > { %v1701_v63 = vpop.f32.mrf.mxu1 }
 0x204   : > { %1146 = vmatmul.bf16.gmra.mxu2 %v4558_v30  ;;  %1651 = vmatmul.bf16.gmra.mxu0 %v1471_v23 }
 0x205   : > { %1235 = vmatmul.bf16.gmra.mxu3 %v4558_v30  ;;  %3089 = vmatpush.bf16.msra.mxu1 %v4440_v16 }
 0x206   : > { %1740 = vmatmul.bf16.gmra.mxu1 %v1471_v23  ;;  %v708_v23 = vadd.f32 %v5763_v27, %v5780_v34  ;;  %v711_v27 = vadd.f32 %v5605_v53, %v5780_v34  ;;  %v713_v53 = vadd.f32 %v5617_v59, %v5780_v34  ;;  %v4429_v59 = vld [vmem:[#allocation12 + $0x38] sm:$0xf0] }
 0x207   : > { %v1107_v12 = vpop.f32.mrf.mxu2 }
 0x208   : > { %v1269_v48 = vadd.f32 %v1107_v12, %v706_v58  ;;  %v1196_v35 = vpop.f32.mrf.mxu3  ;;  %v1836_v58 = vrot.slane %v1833_v8, 2 }
 0x209   : > { %v1270_v49 = vadd.f32 %v1196_v35, %v795_v25  ;;  %v5946_v17 = vpop.f32.mrf.mxu0  ;;  %v1837_v35 = vrot.slane %v5594_v39, 2 }
 0x20a   : > { %v5950_v5 = vadd.f32 %v1612_v20, %v1269_v48 }
 0x20b   : > { %v5952_v52 = vpop.f32.mrf.mxu1  ;;  %v5954_v30 = vadd.f32 %v1701_v63, %v1270_v49  ;;  %v1838_v29 = vsel %vm1835_vm1, %v1836_v58, %v1837_v35 }
 0x20c   : > { %7367 = vst [vmem:[#allocation73_spill] sm:$0xff] %v5950_v5 }
 0x20f   : > { %v1109_v9 = vpop.f32.mrf.mxu2 }
 0x210   : > { %v5961_v25 = vadd.f32 %v1109_v9, %v708_v23  ;;  %v1198_v36 = vpop.f32.mrf.mxu3  ;;  %v1839_v23 = vrot.slane %v5612_v56, 2 }
 0x211   : > { %v5963_v20 = vadd.f32 %v1198_v36, %v797_v6  ;;  %v1617_v49 = vpop.f32.mrf.mxu0 }
 0x213   : > { %v1706_v63 = vpop.f32.mrf.mxu1 }
 0x214   : > { %1973 = vmatmul.bf16.vlgmr.msra.gmra.mxu2 %v1838_v29 }
 0x215   : > { %2062 = vmatmul.bf16.vlgmr.msra.gmra.mxu3 %v1838_v29  ;;  %v1840_v29 = vsel %vm1835_vm1, %v1837_v35, %v1839_v23 }
 0x217   : > { %v1112_v39 = vpop.f32.mrf.mxu2 }
 0x218   : > { %v1273_v50 = vadd.f32 %v1112_v39, %v711_v27  ;;  %v1201_v40 = vpop.f32.mrf.mxu3  ;;  %v4628_v39 = vld [vmem:[#allocation12 + $0x34] sm:$0xf] }
 0x219   : > { %v1274_v16 = vadd.f32 %v1201_v40, %v800_v38  ;;  %v5970_v12 = vpop.f32.mrf.mxu0  ;;  %v4629_v38 = vld [vmem:[#allocation12 + $0x34] sm:$0xf0]  ;;  %v805_v40 = vadd.f32 %v5629_v2, %v5782_v31  ;;  %v807_v2 = vadd.f32 %v5641_v11, %v5782_v31 }
 0x21a   : > { %v5972_v48 = vadd.f32 %v1617_v49, %v1273_v50  ;;  %v4432_v50 = vor.u32 %v4628_v39, %v4429_v59 }
 0x21b   : > { %v5974_v41 = vpop.f32.mrf.mxu1  ;;  %v5976_v8 = vadd.f32 %v1706_v63, %v1274_v16  ;;  %v4427_v63 = vld [vmem:[#allocation12 + $0x30] sm:$0xf] }
 0x21c   : > { %7368 = vst [vmem:[#allocation74_spill] sm:$0xff] %v5972_v48  ;;  %v4428_v56 = vor.u32 %v4629_v38, %v4427_v63  ;;  %3090 = vmatpush.bf16.msra.mxu1 %v4432_v50  ;;  %v718_v38 = vadd.f32 %v5639_v10, %v5780_v34  ;;  %v7372_v10 = vld [vmem:[#allocation33_spill] sm:$0xff] }
 0x21e   : > { %3001 = vmatpush.bf16.msra.mxu0 %v4428_v56 }
 0x21f   : > { %v1114_v6 = vpop.f32.mrf.mxu2 }
 0x220   : > { %v5983_v58 = vadd.f32 %v1114_v6, %v713_v53  ;;  %v1203_v9 = vpop.f32.mrf.mxu3 }
 0x221   : > { %v5985_v36 = vadd.f32 %v1203_v9, %v802_v54  ;;  %v1622_v49 = vpop.f32.mrf.mxu0 }
 0x223   : > { %v1711_v27 = vpop.f32.mrf.mxu1 }
 0x224   : > { %1978 = vmatmul.bf16.gmra.mxu2 %v1840_v29 }
 0x225   : > { %2067 = vmatmul.bf16.gmra.mxu3 %v1840_v29 }
 0x227   : > { %v1117_v16 = vpop.f32.mrf.mxu2 }
 0x228   : > { %v1277_v53 = vadd.f32 %v1117_v16, %v716_v60  ;;  %v1206_v35 = vpop.f32.mrf.mxu3  ;;  %v810_v16 = vadd.f32 %v7372_v10, %v5782_v31 }
 0x229   : > { %v1278_v54 = vadd.f32 %v1206_v35, %v805_v40  ;;  %v5992_v6 = vpop.f32.mrf.mxu0 }
 0x22a   : > { %v5994_v9 = vadd.f32 %v1622_v49, %v1277_v53  ;;  %v1842_v49 = vsel %vm1835_vm1, %v1839_v23, %v1841_v1 }
 0x22b   : > { %v5996_v29 = vpop.f32.mrf.mxu1  ;;  %v5998_v63 = vadd.f32 %v1711_v27, %v1278_v54  ;;  %v721_v27 = vadd.f32 %v7371_v4, %v5780_v34 }
 0x22c   : > { %7369 = vst [vmem:[#allocation75_spill] sm:$0xff] %v5994_v9  ;;  %v7378_v9 = vld [vmem:[#allocation35_spill] sm:$0xff] }
 0x22d   : > { %7370 = vst [vmem:[#allocation76_spill] sm:$0xff] %v5998_v63  ;;  %v723_v4 = vadd.f32 %v7378_v9, %v5780_v34  ;;  %v7379_v63 = vld [vmem:[#allocation36_spill] sm:$0xff]  ;;  %v4421_v9 = vld [vmem:[#allocation12 + $0x28] sm:$0xf0] }
 0x22e   : > { %v812_v10 = vadd.f32 %v7379_v63, %v5782_v31 }
 0x22f   : > { %v1119_v56 = vpop.f32.mrf.mxu2 }
 0x230   : > { %v6005_v39 = vadd.f32 %v1119_v56, %v718_v38  ;;  %v1208_v59 = vpop.f32.mrf.mxu3 }
 0x231   : > { %v6007_v60 = vadd.f32 %v1208_v59, %v807_v2  ;;  %v1627_v50 = vpop.f32.mrf.mxu0  ;;  %v7377_v59 = vld [vmem:[#allocation34_spill] sm:$0xff] }
 0x233   : > { %v1716_v40 = vpop.f32.mrf.mxu1 }
 0x234   : > { %1983 = vmatmul.bf16.gmra.mxu2 %v1842_v49 }
 0x235   : > { %2072 = vmatmul.bf16.gmra.mxu3 %v1842_v49  ;;  %v1843_v49 = vrot.slane %v7377_v59, 2 }
 0x237   : > { %v1122_v53 = vpop.f32.mrf.mxu2 }
 0x238   : > { %v1281_v11 = vadd.f32 %v1122_v53, %v721_v27  ;;  %v1211_v35 = vpop.f32.mrf.mxu3 }
 0x239   : > { %v1282_v54 = vadd.f32 %v1211_v35, %v810_v16  ;;  %v6014_v38 = vpop.f32.mrf.mxu0 }
 0x23a   : > { %7373 = vst [vmem:[#allocation32_spill] sm:$0xff] %v6014_v38  ;;  %v6016_v2 = vadd.f32 %v1627_v50, %v1281_v11  ;;  %v1844_v50 = vsel %vm1835_vm1, %v1841_v1, %v1843_v49 }
 0x23b   : > { %v6018_v56 = vpop.f32.mrf.mxu1  ;;  %v6020_v23 = vadd.f32 %v1716_v40, %v1282_v54  ;;  %v4419_v40 = vld [vmem:[#allocation12 + $0x20] sm:$0xf]  ;;  %v4627_v54 = vld [vmem:[#allocation12 + $0x24] sm:$0xf0] }
 0x23c   : > { %7374 = vst [vmem:[#allocation33_spill] sm:$0xff] %v6016_v2  ;;  %v4420_v59 = vor.u32 %v4627_v54, %v4419_v40  ;;  %v4626_v2 = vld [vmem:[#allocation12 + $0x24] sm:$0xf]  ;;  %v7387_v54 = vld [vmem:[#allocation39_spill] sm:$0xff] }
 0x23d   : > { %7375 = vst [vmem:[#allocation77_spill] sm:$0xff] %v6018_v56 }
 0x23e   : > { %7376 = vst [vmem:[#allocation78_spill] sm:$0xff] %v6020_v23  ;;  %v7381_v23 = vld [vmem:[#allocation37_spill] sm:$0xff]  ;;  %3002 = vmatpush.bf16.msra.mxu0 %v4420_v59 }
 0x23f   : > { %v1124_v48 = vpop.f32.mrf.mxu2  ;;  %v726_v63 = vadd.f32 %v7381_v23, %v5780_v34  ;;  %v1845_v23 = vrot.slane %v7387_v54, 2  ;;  %v7393_v54 = vld [vmem:[#allocation43_spill] sm:$0xff] }
 0x240   : > { %v6027_v27 = vadd.f32 %v1124_v48, %v723_v4  ;;  %v1213_v16 = vpop.f32.mrf.mxu3  ;;  %v4424_v48 = vor.u32 %v4626_v2, %v4421_v9  ;;  %v7382_v4 = vld [vmem:[#allocation38_spill] sm:$0xff]  ;;  %v7388_v2 = vld [vmem:[#allocation40_spill] sm:$0xff]  ;;  %v7389_v9 = vld [vmem:[#allocation41_spill] sm:$0xff] }
 0x241   : > { %v6029_v53 = vadd.f32 %v1213_v16, %v812_v10  ;;  %v1632_v11 = vpop.f32.mrf.mxu0  ;;  %v815_v10 = vadd.f32 %v7382_v4, %v5782_v31  ;;  %v728_v59 = vadd.f32 %v7388_v2, %v5780_v34  ;;  %v817_v4 = vadd.f32 %v7389_v9, %v5782_v31 }
 0x242   : > { %3091 = vmatpush.bf16.msra.mxu1 %v4424_v48  ;;  %v820_v2 = vadd.f32 %v7393_v54, %v5782_v31 }
 0x243   : > { %7380 = vst [vmem:[#allocation34_spill] sm:$0xff] %v6029_v53  ;;  %v1721_v35 = vpop.f32.mrf.mxu1 }
 0x244   : > { %1988 = vmatmul.bf16.gmra.mxu2 %v1844_v50 }
 0x245   : > { %2077 = vmatmul.bf16.gmra.mxu3 %v1844_v50 }
 0x247   : > { %v1127_v16 = vpop.f32.mrf.mxu2 }
 0x248   : > { %v1285_v56 = vadd.f32 %v1127_v16, %v726_v63  ;;  %v1216_v1 = vpop.f32.mrf.mxu3 }
 0x249   : > { %v1286_v53 = vadd.f32 %v1216_v1, %v815_v10  ;;  %v6036_v5 = vpop.f32.mrf.mxu0 }
 0x24a   : > { %7383 = vst [vmem:[#allocation35_spill] sm:$0xff] %v6036_v5  ;;  %v6038_v38 = vadd.f32 %v1632_v11, %v1285_v56  ;;  %v1846_v56 = vsel %vm1835_vm1, %v1843_v49, %v1845_v23  ;;  %v7400_v5 = vld [vmem:[#allocation46_spill] sm:$0xff] }
 0x24b   : > { %v6040_v50 = vpop.f32.mrf.mxu1  ;;  %v6042_v40 = vadd.f32 %v1721_v35, %v1286_v53  ;;  %v7392_v53 = vld [vmem:[#allocation42_spill] sm:$0xff]  ;;  %v822_v54 = vadd.f32 %v7400_v5, %v5782_v31 }
 0x24c   : > { %7384 = vst [vmem:[#allocation36_spill] sm:$0xff] %v6038_v38  ;;  %v731_v35 = vadd.f32 %v7392_v53, %v5780_v34 }
 0x24d   : > { %7385 = vst [vmem:[#allocation37_spill] sm:$0xff] %v6040_v50  ;;  %v7398_v50 = vld [vmem:[#allocation44_spill] sm:$0xff] }
 0x24e   : > { %7386 = vst [vmem:[#allocation38_spill] sm:$0xff] %v6042_v40 }
 0x24f   : > { %v1129_v63 = vpop.f32.mrf.mxu2 }
 0x250   : > { %v6049_v16 = vadd.f32 %v1129_v63, %v728_v59  ;;  %v1218_v48 = vpop.f32.mrf.mxu3 }
 0x251   : > { %v6051_v10 = vadd.f32 %v1218_v48, %v817_v4  ;;  %v1637_v11 = vpop.f32.mrf.mxu0 }
 0x252   : > { %7390 = vst [vmem:[#allocation39_spill] sm:$0xff] %v6049_v16 }
 0x253   : > { %7391 = vst [vmem:[#allocation40_spill] sm:$0xff] %v6051_v10  ;;  %v1726_v1 = vpop.f32.mrf.mxu1  ;;  %v7399_v10 = vld [vmem:[#allocation45_spill] sm:$0xff] }
 0x254   : > { %1993 = vmatmul.bf16.gmra.mxu2 %v1846_v56  ;;  %v733_v53 = vadd.f32 %v7399_v10, %v5780_v34  ;;  %v4413_v10 = vld [vmem:[#allocation12 + $0x18] sm:$0xf0] }
 0x255   : > { %2082 = vmatmul.bf16.gmra.mxu3 %v1846_v56  ;;  %v1847_v56 = vrot.slane %v7398_v50, 2 }
 0x257   : > { %v1132_v38 = vpop.f32.mrf.mxu2 }
 0x258   : > { %v1289_v9 = vadd.f32 %v1132_v38, %v731_v35  ;;  %v1221_v40 = vpop.f32.mrf.mxu3 }
 0x259   : > { %v1290_v59 = vadd.f32 %v1221_v40, %v820_v2  ;;  %v6058_v63 = vpop.f32.mrf.mxu0 }
 0x25a   : > { %7394 = vst [vmem:[#allocation41_spill] sm:$0xff] %v6058_v63  ;;  %v6060_v4 = vadd.f32 %v1637_v11, %v1289_v9  ;;  %v1848_v11 = vsel %vm1835_vm1, %v1845_v23, %v1847_v56 }
 0x25b   : > { %v6062_v48 = vpop.f32.mrf.mxu1  ;;  %v6064_v49 = vadd.f32 %v1726_v1, %v1290_v59  ;;  %v4411_v1 = vld [vmem:[#allocation12 + $0x10] sm:$0xf]  ;;  %v4625_v59 = vld [vmem:[#allocation12 + $0x14] sm:$0xf0] }
 0x25c   : > { %7395 = vst [vmem:[#allocation42_spill] sm:$0xff] %v6060_v4  ;;  %v4412_v50 = vor.u32 %v4625_v59, %v4411_v1  ;;  %v4624_v4 = vld [vmem:[#allocation12 + $0x14] sm:$0xf]  ;;  %v7409_v59 = vld [vmem:[#allocation49_spill] sm:$0xff] }
 0x25d   : > { %7396 = vst [vmem:[#allocation43_spill] sm:$0xff] %v6062_v48 }
 0x25e   : > { %7397 = vst [vmem:[#allocation79_spill] sm:$0xff] %v6064_v49  ;;  %v7403_v49 = vld [vmem:[#allocation47_spill] sm:$0xff]  ;;  %3003 = vmatpush.bf16.msra.mxu0 %v4412_v50 }
 0x25f   : > { %v1134_v16 = vpop.f32.mrf.mxu2  ;;  %v736_v5 = vadd.f32 %v7403_v49, %v5780_v34  ;;  %v1849_v49 = vrot.slane %v7409_v59, 2  ;;  %v7415_v59 = vld [vmem:[#allocation53_spill] sm:$0xff] }
 0x260   : > { %v6071_v38 = vadd.f32 %v1134_v16, %v733_v53  ;;  %v1223_v40 = vpop.f32.mrf.mxu3  ;;  %v4416_v16 = vor.u32 %v4624_v4, %v4413_v10  ;;  %v7404_v53 = vld [vmem:[#allocation48_spill] sm:$0xff]  ;;  %v7410_v4 = vld [vmem:[#allocation50_spill] sm:$0xff]  ;;  %v7411_v10 = vld [vmem:[#allocation51_spill] sm:$0xff] }
 0x261   : > { %v6073_v35 = vadd.f32 %v1223_v40, %v822_v54  ;;  %v1642_v2 = vpop.f32.mrf.mxu0  ;;  %v825_v54 = vadd.f32 %v7404_v53, %v5782_v31  ;;  %v738_v50 = vadd.f32 %v7410_v4, %v5780_v34  ;;  %v827_v53 = vadd.f32 %v7411_v10, %v5782_v31 }
 0x262   : > { %7401 = vst [vmem:[#allocation44_spill] sm:$0xff] %v6071_v38  ;;  %3092 = vmatpush.bf16.msra.mxu1 %v4416_v16  ;;  %v830_v4 = vadd.f32 %v7415_v59, %v5782_v31 }
 0x263   : > { %7402 = vst [vmem:[#allocation45_spill] sm:$0xff] %v6073_v35  ;;  %v1731_v9 = vpop.f32.mrf.mxu1 }
 0x264   : > { %1998 = vmatmul.bf16.gmra.mxu2 %v1848_v11 }
 0x265   : > { %2087 = vmatmul.bf16.gmra.mxu3 %v1848_v11 }
 0x267   : > { %v1137_v40 = vpop.f32.mrf.mxu2 }
 0x268   : > { %v1293_v48 = vadd.f32 %v1137_v40, %v736_v5  ;;  %v1226_v23 = vpop.f32.mrf.mxu3 }
 0x269   : > { %v1294_v35 = vadd.f32 %v1226_v23, %v825_v54  ;;  %v6080_v63 = vpop.f32.mrf.mxu0 }
 0x26a   : > { %7405 = vst [vmem:[#allocation46_spill] sm:$0xff] %v6080_v63  ;;  %v6082_v38 = vadd.f32 %v1642_v2, %v1293_v48  ;;  %v1850_v48 = vsel %vm1835_vm1, %v1847_v56, %v1849_v49  ;;  %v7419_v56 = vld [vmem:[#allocation54_spill] sm:$0xff] }
 0x26b   : > { %v6084_v11 = vpop.f32.mrf.mxu1  ;;  %v6086_v1 = vadd.f32 %v1731_v9, %v1294_v35  ;;  %v7414_v9 = vld [vmem:[#allocation52_spill] sm:$0xff] }
 0x26c   : > { %7406 = vst [vmem:[#allocation47_spill] sm:$0xff] %v6082_v38  ;;  %v741_v23 = vadd.f32 %v7414_v9, %v5780_v34  ;;  %v7422_v9 = vld [vmem:[#allocation56_spill] sm:$0xff] }
 0x26d   : > { %7407 = vst [vmem:[#allocation48_spill] sm:$0xff] %v6084_v11  ;;  %v1851_v11 = vrot.slane %v7419_v56, 2  ;;  %v832_v59 = vadd.f32 %v7422_v9, %v5782_v31 }
 0x26e   : > { %7408 = vst [vmem:[#allocation80_spill] sm:$0xff] %v6086_v1 }
 0x26f   : > { %v1139_v5 = vpop.f32.mrf.mxu2 }
 0x270   : > { %v6093_v40 = vadd.f32 %v1139_v5, %v738_v50  ;;  %v1228_v16 = vpop.f32.mrf.mxu3 }
 0x271   : > { %v6095_v54 = vadd.f32 %v1228_v16, %v827_v53  ;;  %v1647_v2 = vpop.f32.mrf.mxu0 }
 0x272   : > { %7412 = vst [vmem:[#allocation49_spill] sm:$0xff] %v6093_v40 }
 0x273   : > { %7413 = vst [vmem:[#allocation50_spill] sm:$0xff] %v6095_v54  ;;  %v1736_v35 = vpop.f32.mrf.mxu1 }
 0x274   : > { %2003 = vmatmul.bf16.gmra.mxu2 %v1850_v48 }
 0x275   : > { %2092 = vmatmul.bf16.gmra.mxu3 %v1850_v48  ;;  %v7420_v48 = vld [vmem:[#allocation55_spill] sm:$0xff] }
 0x276   : > { %v743_v54 = vadd.f32 %v7420_v48, %v5780_v34 }
 0x277   : > { %v1142_v1 = vpop.f32.mrf.mxu2 }
 0x278   : > { %v1297_v10 = vadd.f32 %v1142_v1, %v741_v23  ;;  %v1231_v38 = vpop.f32.mrf.mxu3  ;;  %v7425_v23 = vld [vmem:[#allocation57_spill] sm:$0xff] }
 0x279   : > { %v1298_v50 = vadd.f32 %v1231_v38, %v830_v4  ;;  %v6106_v16 = vpop.f32.mrf.mxu0  ;;  %v746_v4 = vadd.f32 %v7425_v23, %v5780_v34  ;;  %v7430_v23 = vld [vmem:[#allocation61_spill] sm:$0xff] }
 0x27a   : > { %v6102_v5 = vadd.f32 %v1647_v2, %v1297_v10  ;;  %7418 = vst [vmem:[#allocation53_spill] sm:$0xff] %v6106_v16  ;;  %v7426_v10 = vld [vmem:[#allocation58_spill] sm:$0xff] }
 0x27b   : > { %v6104_v53 = vadd.f32 %v1736_v35, %v1298_v50  ;;  %v6111_v63 = vpop.f32.mrf.mxu1  ;;  %v1852_v35 = vsel %vm1835_vm1, %v1849_v49, %v1851_v11  ;;  %v835_v50 = vadd.f32 %v7426_v10, %v5782_v31 }
 0x27c   : > { %7416 = vst [vmem:[#allocation51_spill] sm:$0xff] %v6102_v5 }
 0x27d   : > { %7417 = vst [vmem:[#allocation52_spill] sm:$0xff] %v6104_v53 }
 0x27e   : > { %7421 = vst [vmem:[#allocation54_spill] sm:$0xff] %v6111_v63 }
 0x27f   : > { %v1144_v40 = vpop.f32.mrf.mxu2 }
 0x280   : > { %v6115_v1 = vadd.f32 %v1144_v40, %v743_v54  ;;  %v1233_v38 = vpop.f32.mrf.mxu3 }
 0x281   : > { %v6117_v2 = vadd.f32 %v1233_v38, %v832_v59  ;;  %v1652_v48 = vpop.f32.mrf.mxu0  ;;  %v7428_v38 = vld [vmem:[#allocation59_spill] sm:$0xff] }
 0x282   : > { %7423 = vst [vmem:[#allocation55_spill] sm:$0xff] %v6115_v1  ;;  %v1853_v49 = vrot.slane %v7428_v38, 2  ;;  %v4622_v38 = vld [vmem:[#allocation12 + $0x4] sm:$0xf] }
 0x283   : > { %7424 = vst [vmem:[#allocation56_spill] sm:$0xff] %v6117_v2  ;;  %v1741_v53 = vpop.f32.mrf.mxu1  ;;  %v837_v2 = vadd.f32 %v7430_v23, %v5782_v31  ;;  %v4405_v31 = vld [vmem:[#allocation12 + $0x8] sm:$0xf0] }
 0x284   : > { %2008 = vmatmul.bf16.gmra.mxu2 %v1852_v35 }
 0x285   : > { %2097 = vmatmul.bf16.gmra.mxu3 %v1852_v35  ;;  %v7429_v35 = vld [vmem:[#allocation60_spill] sm:$0xff] }
 0x286   : > { %v748_v63 = vadd.f32 %v7429_v35, %v5780_v34  ;;  %v4623_v34 = vld [vmem:[#allocation12 + $0x4] sm:$0xf0] }
 0x287   : > { %v1147_v56 = vpop.f32.mrf.mxu2 }
 0x288   : > { %v1301_v5 = vadd.f32 %v1147_v56, %v746_v4  ;;  %v1236_v9 = vpop.f32.mrf.mxu3 }
 0x289   : > { %v1302_v40 = vadd.f32 %v1236_v9, %v835_v50  ;;  %v1854_v50 = vsel %vm1835_vm1, %v1851_v11, %v1853_v49  ;;  %v4403_v9 = vld [vmem:[#allocation12] sm:$0xf] }
 0x28a   : > { %v6124_v54 = vadd.f32 %v1652_v48, %v1301_v5 }
 0x28b   : > { %v6126_v59 = vadd.f32 %v1741_v53, %v1302_v40  ;;  %v4404_v40 = vor.u32 %v4623_v34, %v4403_v9 }
 0x28c   : > { %7427 = vst [vmem:[#allocation57_spill] sm:$0xff] %v6124_v54 }
 0x28d   : > { %3004 = vmatpush.bf16.msra.mxu0 %v4404_v40  ;;  %v7432_v40 = vld [vmem:[#allocation62_spill] sm:$0xff] }
 0x28f   : > { %v1149_v16 = vpop.f32.mrf.mxu2 }
 0x290   : > { %v6133_v10 = vadd.f32 %v1149_v16, %v748_v63  ;;  %v1238_v1 = vpop.f32.mrf.mxu3  ;;  %v1855_v63 = vrot.slane %v5789_v22, 2  ;;  %v4408_v16 = vor.u32 %v4622_v38, %v4405_v31 }
 0x291   : > { %v6135_v4 = vadd.f32 %v1238_v1, %v837_v2 }
 0x292   : > { %7431 = vst [vmem:[#allocation58_spill] sm:$0xff] %v6133_v10  ;;  %3093 = vmatpush.bf16.msra.mxu1 %v4408_v16  ;;  %v1856_v35 = vsel %vm1835_vm1, %v1853_v49, %v1855_v63 }
 0x294   : > { %2013 = vmatmul.bf16.gmra.mxu2 %v1854_v50 }
 0x295   : > { %2102 = vmatmul.bf16.gmra.mxu3 %v1854_v50 }
 0x297   : > { %v1974_v5 = vpop.f32.mrf.mxu2 }
 0x298   : > { %v2063_v53 = vpop.f32.mrf.mxu3  ;;  %v2143_v38 = vadd.f32 %v1974_v5, %v7432_v40 }
 0x299   : > { %v2144_v56 = vadd.f32 %v2063_v53, %v5793_v19 }
 0x29b   : > { %v4369_v48 = vmul.f32 -1.442695, %v2144_v56 }
 0x29d   : > { %4778 = vpow2.f32 %v4369_v48 }
 0x29f   : > { %v1976_v1 = vpop.f32.mrf.mxu2 }
 0x2a0   : > { %v2065_v11 = vpop.f32.mrf.mxu3 }
 0x2a1   : > { %v2146_v2 = vadd.f32 %v2065_v11, %v5804_v14  ;;  %v1857_v14 = vrot.slane %v5811_v42, 2 }
 0x2a3   : > { %v4779_v23 = vpop.eup %4778  ;;  %v4370_v19 = vmul.f32 -1.442695, %v2146_v2 }
 0x2a4   : > { %v2335_v50 = vadd.f32 1.0, %v4779_v23  ;;  %2018 = vmatmul.bf16.gmra.mxu2 %v1856_v35 }
 0x2a5   : > { %4780 = vpow2.f32 %v4370_v19  ;;  %2107 = vmatmul.bf16.gmra.mxu3 %v1856_v35 }
 0x2a6   : > { %4782 = vrcp.f32 %v2335_v50  ;;  %v2378_v2 = vand.u32 2147483648, %v2335_v50  ;;  %v2376_v19 = vand.u32 2147483647, %v2335_v50  ;;  %vm2372_vm3 = vweird.f32 %v2335_v50 }
 0x2a7   : > { %v1979_v53 = vpop.f32.mrf.mxu2 }
 0x2a8   : > { %v2068_v56 = vpop.f32.mrf.mxu3  ;;  %v2379_v40 = vor.u32 1.1754944e-38, %v2378_v2  ;;  %vm2377_vm5 = vcmp.eq.f32.partialorder %v2376_v19, 8.507059e+37 }
 0x2a9   : > { %v2148_v22 = vadd.f32 %v2068_v56, %v5815_v55  ;;  %v1858_v55 = vsel %vm1835_vm1, %v1855_v63, %v1857_v14 }
 0x2ab   : > { %v4781_v48 = vpop.eup %4780  ;;  %v4371_v9 = vmul.f32 -1.442695, %v2148_v22 }
 0x2ac   : > { %v4783_v34 = vpop.eup %4782  ;;  %v2336_v31 = vadd.f32 1.0, %v4781_v48 }
 0x2ad   : > { %v2368_v49 = vmul.f32 %v4783_v34, %v2335_v50  ;;  %4784 = vpow2.f32 %v4371_v9  ;;  %vm2373_vm2 = vweird.f32 %v4783_v34 }
 0x2ae   : > { %4786 = vrcp.f32 %v2336_v31  ;;  %vm2374_vm4 = vmor %vm2372_vm3, %vm2373_vm2  ;;  %v2393_v2 = vand.u32 2147483648, %v2336_v31  ;;  %vm2387_vm7 = vweird.f32 %v2336_v31 }
 0x2af   : > { %v2369_v16 = vsub.f32 1.0, %v2368_v49  ;;  %v6145_v11 = vpop.f32.mrf.mxu2  ;;  %4788 = vtanh.f32 %v2143_v38  ;;  %v7433_v49 = vld [vmem:[#allocation63_spill] sm:$0xff] }
 0x2b0   : > { %v2070_v35 = vpop.f32.mrf.mxu3  ;;  %v2145_v38 = vadd.f32 %v1976_v1, %v7433_v49  ;;  %v2149_v42 = vadd.f32 %v6145_v11, %v5824_v44 }
 0x2b1   : > { %v2370_v23 = vmul.f32 %v4783_v34, %v2369_v16  ;;  %v2150_v5 = vadd.f32 %v2070_v35, %v5826_v47 }
 0x2b3   : > { %v4785_v56 = vpop.eup %4784  ;;  %v2371_v22 = vadd.f32 %v4783_v34, %v2370_v23  ;;  %v4372_v48 = vmul.f32 -1.442695, %v2150_v5 }
 0x2b4   : > { %v4787_v9 = vpop.eup %4786  ;;  %v6152_v54 = vadd.f32 1.0, %v4785_v56  ;;  %2023 = vmatmul.bf16.gmra.mxu2 %v1858_v55  ;;  %v2391_v56 = vand.u32 2147483647, %v2336_v31 }
 0x2b5   : > { %v2383_v10 = vmul.f32 %v4787_v9, %v2336_v31  ;;  %4790 = vpow2.f32 %v4372_v48  ;;  %2112 = vmatmul.bf16.gmra.mxu3 %v1858_v55  ;;  %v2375_v63 = vsel %vm2374_vm4, %v4783_v34, %v2371_v22  ;;  %v4789_v16 = vpop.eup %4788  ;;  %vm2388_vm6 = vweird.f32 %v4787_v9 }
 0x2b6   : > { %4792 = vrcp.f32 %v6152_v54  ;;  %v2380_v47 = vsel %vm2377_vm5, %v2379_v40, %v2375_v63  ;;  %vm2389_vm8 = vmor %vm2387_vm7, %vm2388_vm6  ;;  %v2394_v22 = vor.u32 1.1754944e-38, %v2393_v2  ;;  %v7434_v40 = vld [vmem:[#allocation64_spill] sm:$0xff]  ;;  %vm2392_vm9 = vcmp.eq.f32.partialorder %v2391_v56, 8.507059e+37 }
 0x2b7   : > { %v2384_v35 = vsub.f32 1.0, %v2383_v10  ;;  %v6155_v50 = vpop.f32.mrf.mxu2  ;;  %v2847_v23 = vmul.f32 %v4789_v16, %v2380_v47  ;;  %4794 = vtanh.f32 %v2145_v38  ;;  %v2147_v10 = vadd.f32 %v1979_v53, %v7434_v40 }
 0x2b8   : > { %v2073_v5 = vpop.f32.mrf.mxu3  ;;  %v1859_v38 = vrot.slane %v5833_v61, 2  ;;  %vm2402_vm11 = vweird.f32 %v6152_v54  ;;  %v7435_v61 = vld [vmem:[#allocation65_spill] sm:$0xff] }
 0x2b9   : > { %v2385_v1 = vmul.f32 %v4787_v9, %v2384_v35  ;;  %v2152_v19 = vadd.f32 %v2073_v5, %v5837_v45 }
 0x2ba   : > { %v1860_v53 = vsel %vm1835_vm1, %v1857_v14, %v1859_v38 }
 0x2bb   : > { %v4791_v49 = vpop.eup %4790  ;;  %v2386_v48 = vadd.f32 %v4787_v9, %v2385_v1  ;;  %v4373_v34 = vmul.f32 -1.442695, %v2152_v19  ;;  %v2406_v19 = vand.u32 2147483647, %v6152_v54 }
 0x2bc   : > { %v4793_v55 = vpop.eup %4792  ;;  %v6159_v63 = vadd.f32 1.0, %v4791_v49 }
 0x2bd   : > { %v2398_v16 = vmul.f32 %v4793_v55, %v6152_v54  ;;  %4796 = vpow2.f32 %v4373_v34  ;;  %v2390_v47 = vsel %vm2389_vm8, %v4787_v9, %v2386_v48  ;;  %v4795_v35 = vpop.eup %4794  ;;  %v2408_v9 = vand.u32 2147483648, %v6152_v54 }
 0x2be   : > { %4798 = vrcp.f32 %v6159_v63  ;;  %v2395_v45 = vsel %vm2392_vm9, %v2394_v22, %v2390_v47  ;;  %vm2403_vm10 = vweird.f32 %v4793_v55  ;;  %vm2407_vm13 = vcmp.eq.f32.partialorder %v2406_v19, 8.507059e+37 }
 0x2bf   : > { %v2399_v31 = vsub.f32 1.0, %v2398_v16  ;;  %v6164_v5 = vpop.f32.mrf.mxu2  ;;  %v2848_v1 = vmul.f32 %v4795_v35, %v2395_v45  ;;  %4800 = vtanh.f32 %v2147_v10  ;;  %vm2404_vm12 = vmor %vm2402_vm11, %vm2403_vm10  ;;  %v2409_v16 = vor.u32 1.1754944e-38, %v2408_v9 }
 0x2c0   : > { %v2075_v2 = vpop.f32.mrf.mxu3  ;;  %v2423_v11 = vand.u32 2147483648, %v6159_v63  ;;  %vm2417_vm15 = vweird.f32 %v6159_v63 }
 0x2c1   : > { %v2154_v56 = vadd.f32 %v2075_v2, %v5848_v62  ;;  %v2879_v49 = vpack.c.bf16 %v2848_v1, %v2847_v23  ;;  %v2400_v48 = vmul.f32 %v4793_v55, %v2399_v31 }
 0x2c3   : > { %v4797_v34 = vpop.eup %4796  ;;  %v4374_v22 = vmul.f32 -1.442695, %v2154_v56  ;;  %3005 = vmatmul.bf16.vlgmr.msra.gmra.mxu0 %v2879_v49  ;;  %3094 = vmatmul.bf16.vlgmr.msra.gmra.mxu1 %v2879_v49  ;;  %v2401_v40 = vadd.f32 %v4793_v55, %v2400_v48  ;;  %v2151_v49 = vadd.f32 %v6155_v50, %v5835_v13 }
 0x2c4   : > { %v4799_v10 = vpop.eup %4798  ;;  %v6177_v14 = vadd.f32 1.0, %v4797_v34  ;;  %2028 = vmatmul.bf16.gmra.mxu2 %v1860_v53  ;;  %v2424_v34 = vor.u32 1.1754944e-38, %v2423_v11 }
 0x2c5   : > { %v2413_v62 = vmul.f32 %v4799_v10, %v6159_v63  ;;  %4802 = vpow2.f32 %v4374_v22  ;;  %2117 = vmatmul.bf16.gmra.mxu3 %v1860_v53  ;;  %v2405_v23 = vsel %vm2404_vm12, %v4793_v55, %v2401_v40  ;;  %v4801_v47 = vpop.eup %4800  ;;  %vm2418_vm14 = vweird.f32 %v4799_v10 }
 0x2c6   : > { %4804 = vrcp.f32 %v6177_v14  ;;  %v2410_v35 = vsel %vm2407_vm13, %v2409_v16, %v2405_v23  ;;  %v2421_v53 = vand.u32 2147483647, %v6159_v63  ;;  %vm2419_vm0 = vmor %vm2417_vm15, %vm2418_vm14  ;;  %v1861_v22 = vrot.slane %v5855_v26, 2 }
 0x2c7   : > { %v2414_v54 = vsub.f32 1.0, %v2413_v62  ;;  %v6181_v45 = vpop.f32.mrf.mxu2  ;;  %v2849_v31 = vmul.f32 %v4801_v47, %v2410_v35  ;;  %4806 = vtanh.f32 %v2149_v42  ;;  %v2436_v47 = vand.u32 2147483647, %v6177_v14 }
 0x2c8   : > { %v2078_v44 = vpop.f32.mrf.mxu3  ;;  %vm2422_vm2 = vcmp.eq.f32.partialorder %v2421_v53, 8.507059e+37  ;;  %v1862_v50 = vsel %vm1835_vm1, %v1859_v38, %v1861_v22  ;;  %vm2432_vm4 = vweird.f32 %v6177_v14  ;;  %v2153_v38 = vadd.f32 %v6164_v5, %v7435_v61 }
 0x2c9   : > { %v2156_v1 = vadd.f32 %v2078_v44, %v5859_v21  ;;  %v2415_v2 = vmul.f32 %v4799_v10, %v2414_v54  ;;  %vm2437_vm6 = vcmp.eq.f32.partialorder %v2436_v47, 8.507059e+37  ;;  %v7436_v47 = vld [vmem:[#allocation66_spill] sm:$0xff] }
 0x2cb   : > { %v4803_v55 = vpop.eup %4802  ;;  %v4375_v19 = vmul.f32 -1.442695, %v2156_v1  ;;  %v2416_v9 = vadd.f32 %v4799_v10, %v2415_v2 }
 0x2cc   : > { %v4805_v56 = vpop.eup %4804  ;;  %v6189_v48 = vadd.f32 1.0, %v4803_v55 }
 0x2cd   : > { %v2428_v21 = vmul.f32 %v4805_v56, %v6177_v14  ;;  %4808 = vpow2.f32 %v4375_v19  ;;  %v2420_v40 = vsel %vm2419_vm0, %v4799_v10, %v2416_v9  ;;  %v4807_v42 = vpop.eup %4806  ;;  %v2438_v10 = vand.u32 2147483648, %v6177_v14 }
 0x2ce   : > { %4810 = vrcp.f32 %v6189_v48  ;;  %v2425_v16 = vsel %vm2422_vm2, %v2424_v34, %v2420_v40  ;;  %vm2433_vm3 = vweird.f32 %v4805_v56  ;;  %v2453_v40 = vand.u32 2147483648, %v6189_v48 }
 0x2cf   : > { %v2429_v63 = vsub.f32 1.0, %v2428_v21  ;;  %v6194_v62 = vpop.f32.mrf.mxu2  ;;  %v2850_v23 = vmul.f32 %v4807_v42, %v2425_v16  ;;  %4812 = vtanh.f32 %v2151_v49  ;;  %vm2434_vm5 = vmor %vm2432_vm4, %vm2433_vm3  ;;  %v2439_v19 = vor.u32 1.1754944e-38, %v2438_v10 }
 0x2d0   : > { %v2080_v13 = vpop.f32.mrf.mxu3  ;;  %vm2447_vm8 = vweird.f32 %v6189_v48  ;;  %v2155_v10 = vadd.f32 %v6181_v45, %v7436_v47  ;;  %v1765_v45 = vadd.f32 %v5881_v57, %v5892_v7  ;;  %v2157_v26 = vadd.f32 %v6194_v62, %v5868_v3 }
 0x2d1   : > { %v2158_v35 = vadd.f32 %v2080_v13, %v5870_v37  ;;  %v2880_v54 = vpack.c.bf16 %v2850_v23, %v2849_v31  ;;  %v2430_v44 = vmul.f32 %v4805_v56, %v2429_v63 }
 0x2d3   : > { %v4809_v11 = vpop.eup %4808  ;;  %v4376_v1 = vmul.f32 -1.442695, %v2158_v35  ;;  %3010 = vmatmul.bf16.gmra.mxu0 %v2880_v54  ;;  %3099 = vmatmul.bf16.gmra.mxu1 %v2880_v54  ;;  %v2431_v2 = vadd.f32 %v4805_v56, %v2430_v44  ;;  %v2454_v54 = vor.u32 1.1754944e-38, %v2453_v40  ;;  %v6222_v44 = vld [vmem:[%s5506_s24 + $0x70] sm:$0xff] }
 0x2d4   : > { %v4811_v53 = vpop.eup %4810  ;;  %v6207_v55 = vadd.f32 1.0, %v4809_v11  ;;  %2033 = vmatmul.bf16.gmra.mxu2 %v1862_v50 }
 0x2d5   : > { %v2443_v37 = vmul.f32 %v4811_v53, %v6189_v48  ;;  %4814 = vpow2.f32 %v4376_v1  ;;  %2122 = vmatmul.bf16.gmra.mxu3 %v1862_v50  ;;  %v2435_v31 = vsel %vm2434_vm5, %v4805_v56, %v2431_v2  ;;  %v4813_v9 = vpop.eup %4812  ;;  %vm2448_vm7 = vweird.f32 %v4811_v53 }
 0x2d6   : > { %4816 = vrcp.f32 %v6207_v55  ;;  %v2440_v49 = vsel %vm2437_vm6, %v2439_v19, %v2435_v31  ;;  %v2451_v56 = vand.u32 2147483647, %v6189_v48  ;;  %vm2449_vm9 = vmor %vm2447_vm8, %vm2448_vm7  ;;  %v2466_v31 = vand.u32 2147483647, %v6207_v55 }
 0x2d7   : > { %v2444_v14 = vsub.f32 1.0, %v2443_v37  ;;  %v6211_v34 = vpop.f32.mrf.mxu2  ;;  %v2851_v21 = vmul.f32 %v4813_v9, %v2440_v49  ;;  %4818 = vtanh.f32 %v2153_v38  ;;  %v2468_v9 = vand.u32 2147483648, %v6207_v55 }
 0x2d8   : > { %v2083_v5 = vpop.f32.mrf.mxu3  ;;  %vm2452_vm10 = vcmp.eq.f32.partialorder %v2451_v56, 8.507059e+37  ;;  %vm2462_vm12 = vweird.f32 %v6207_v55  ;;  %vm2467_vm14 = vcmp.eq.f32.partialorder %v2466_v31, 8.507059e+37 }
 0x2d9   : > { %v2160_v42 = vadd.f32 %v2083_v5, %v5883_v51  ;;  %v2445_v16 = vmul.f32 %v4811_v53, %v2444_v14  ;;  %v1863_v51 = vrot.slane %v6222_v44, 2 }
 0x2db   : > { %v4815_v63 = vpop.eup %4814  ;;  %v4377_v23 = vmul.f32 -1.442695, %v2160_v42  ;;  %v2446_v13 = vadd.f32 %v4811_v53, %v2445_v16  ;;  %v2469_v16 = vor.u32 1.1754944e-38, %v2468_v9 }
 0x2dc   : > { %v4817_v50 = vpop.eup %4816  ;;  %v6219_v35 = vadd.f32 1.0, %v4815_v63 }
 0x2dd   : > { %v2458_v11 = vmul.f32 %v4817_v50, %v6207_v55  ;;  %4820 = vpow2.f32 %v4377_v23  ;;  %v2450_v1 = vsel %vm2449_vm9, %v4811_v53, %v2446_v13  ;;  %v4819_v2 = vpop.eup %4818  ;;  %v1864_v53 = vsel %vm1835_vm1, %v1861_v22, %v1863_v51 }
 0x2de   : > { %4822 = vrcp.f32 %v6219_v35  ;;  %v2455_v48 = vsel %vm2452_vm10, %v2454_v54, %v2450_v1  ;;  %vm2463_vm11 = vweird.f32 %v4817_v50  ;;  %v2483_v62 = vand.u32 2147483648, %v6219_v35 }
 0x2df   : > { %v2459_v61 = vsub.f32 1.0, %v2458_v11  ;;  %v6229_v38 = vpop.f32.mrf.mxu2  ;;  %v2852_v19 = vmul.f32 %v4819_v2, %v2455_v48  ;;  %4824 = vtanh.f32 %v2155_v10  ;;  %vm2464_vm13 = vmor %vm2462_vm12, %vm2463_vm11  ;;  %vm2477_vm0 = vweird.f32 %v6219_v35 }
 0x2e0   : > { %v2085_v37 = vpop.f32.mrf.mxu3 }
 0x2e1   : > { %v2162_v49 = vadd.f32 %v2085_v37, %v1765_v45  ;;  %v2881_v14 = vpack.c.bf16 %v2852_v19, %v2851_v21  ;;  %v2460_v5 = vmul.f32 %v4817_v50, %v2459_v61  ;;  %v2159_v45 = vadd.f32 %v6211_v34, %v5879_v46  ;;  %v6256_v37 = vld [vmem:[%s5506_s24 + $0x78] sm:$0xff] }
 0x2e2   : > { %v2484_v19 = vor.u32 1.1754944e-38, %v2483_v62  ;;  %v1769_v46 = vadd.f32 %v5904_v0, %v5915_v15  ;;  %v1811_v0 = vld [vmem:[%s5506_s24 + $0x80] sm:$0x3]  ;;  %v7437_v15 = vld [vmem:[#allocation68_spill] sm:$0xff] }
 0x2e3   : > { %v4821_v57 = vpop.eup %4820  ;;  %v4378_v7 = vmul.f32 -1.442695, %v2162_v49  ;;  %3015 = vmatmul.bf16.gmra.mxu0 %v2881_v14  ;;  %3104 = vmatmul.bf16.gmra.mxu1 %v2881_v14  ;;  %v2461_v40 = vadd.f32 %v4817_v50, %v2460_v5  ;;  %v1832_v62 = vunpack.c.l.b16 %v1811_v0 }
 0x2e4   : > { %v4823_v42 = vpop.eup %4822  ;;  %v6241_v22 = vadd.f32 1.0, %v4821_v57  ;;  %2038 = vmatmul.bf16.gmra.mxu2 %v1864_v53 }
 0x2e5   : > { %v2473_v21 = vmul.f32 %v4823_v42, %v6219_v35  ;;  %4826 = vpow2.f32 %v4378_v7  ;;  %2127 = vmatmul.bf16.gmra.mxu3 %v1864_v53  ;;  %v2465_v56 = vsel %vm2464_vm13, %v4817_v50, %v2461_v40  ;;  %v4825_v63 = vpop.eup %4824  ;;  %vm2478_vm15 = vweird.f32 %v4823_v42 }
 0x2e6   : > { %4828 = vrcp.f32 %v6241_v22  ;;  %v2470_v23 = vsel %vm2467_vm14, %v2469_v16, %v2465_v56  ;;  %v2481_v50 = vand.u32 2147483647, %v6219_v35  ;;  %vm2479_vm2 = vmor %vm2477_vm0, %vm2478_vm15  ;;  %v2496_v7 = vand.u32 2147483647, %v6241_v22 }
 0x2e7   : > { %v2474_v55 = vsub.f32 1.0, %v2473_v21  ;;  %v6245_v13 = vpop.f32.mrf.mxu2  ;;  %v2853_v47 = vmul.f32 %v4825_v63, %v2470_v23  ;;  %4830 = vtanh.f32 %v2157_v26  ;;  %v2498_v40 = vand.u32 2147483648, %v6241_v22  ;;  %v7438_v21 = vld [vmem:[#allocation67_spill] sm:$0xff] }
 0x2e8   : > { %v2088_v3 = vpop.f32.mrf.mxu3  ;;  %vm2482_vm3 = vcmp.eq.f32.partialorder %v2481_v50, 8.507059e+37  ;;  %v1764_v56 = vadd.f32 %v7438_v21, %v7437_v15  ;;  %vm2492_vm5 = vweird.f32 %v6241_v22  ;;  %vm2497_vm7 = vcmp.eq.f32.partialorder %v2496_v7, 8.507059e+37 }
 0x2e9   : > { %v2164_v10 = vadd.f32 %v2088_v3, %v5906_v24  ;;  %v2475_v54 = vmul.f32 %v4823_v42, %v2474_v55  ;;  %v1865_v24 = vrot.slane %v6256_v37, 2 }
 0x2eb   : > { %v4827_v11 = vpop.eup %4826  ;;  %v4379_v1 = vmul.f32 -1.442695, %v2164_v10  ;;  %v2476_v2 = vadd.f32 %v4823_v42, %v2475_v54  ;;  %v1866_v57 = vsel %vm1835_vm1, %v1863_v51, %v1865_v24  ;;  %v2161_v51 = vadd.f32 %v6229_v38, %v1764_v56 }
 0x2ec   : > { %v4829_v48 = vpop.eup %4828  ;;  %v6253_v61 = vadd.f32 1.0, %v4827_v11 }
 0x2ed   : > { %v2488_v53 = vmul.f32 %v4829_v48, %v6241_v22  ;;  %4832 = vpow2.f32 %v4379_v1  ;;  %v2480_v31 = vsel %vm2479_vm2, %v4823_v42, %v2476_v2  ;;  %v4831_v9 = vpop.eup %4830  ;;  %vm2493_vm4 = vweird.f32 %v4829_v48 }
 0x2ee   : > { %4834 = vrcp.f32 %v6253_v61  ;;  %v2485_v35 = vsel %vm2482_vm3, %v2484_v19, %v2480_v31  ;;  %vm2494_vm6 = vmor %vm2492_vm5, %vm2493_vm4  ;;  %v1834_v19 = vpack.c.b16 %v1832_v62, %v1832_v62  ;;  %vm2507_vm9 = vweird.f32 %v6253_v61 }
 0x2ef   : > { %v2489_v34 = vsub.f32 1.0, %v2488_v53  ;;  %v6263_v49 = vpop.f32.mrf.mxu2  ;;  %v2854_v14 = vmul.f32 %v4831_v9, %v2485_v35  ;;  %4836 = vtanh.f32 %v2159_v45  ;;  %v2513_v45 = vand.u32 2147483648, %v6253_v61 }
 0x2f0   : > { %v2090_v5 = vpop.f32.mrf.mxu3  ;;  %v1867_v7 = vrot.slane %v1834_v19, 2 }
 0x2f1   : > { %v2166_v42 = vadd.f32 %v2090_v5, %v1769_v46  ;;  %v2882_v26 = vpack.c.bf16 %v2854_v14, %v2853_v47  ;;  %v2490_v16 = vmul.f32 %v4829_v48, %v2489_v34  ;;  %v2499_v47 = vor.u32 1.1754944e-38, %v2498_v40 }
 0x2f2   : > { %v2163_v14 = vadd.f32 %v6245_v13, %v5902_v33  ;;  %v1868_v15 = vsel %vm1835_vm1, %v1865_v24, %v1867_v7 }
 0x2f3   : > { %v4833_v63 = vpop.eup %4832  ;;  %v4380_v23 = vmul.f32 -1.442695, %v2166_v42  ;;  %3020 = vmatmul.bf16.gmra.mxu0 %v2882_v26  ;;  %3109 = vmatmul.bf16.gmra.mxu1 %v2882_v26  ;;  %v2491_v55 = vadd.f32 %v4829_v48, %v2490_v16 }
 0x2f4   : > { %v4835_v44 = vpop.eup %4834  ;;  %v6277_v3 = vadd.f32 1.0, %v4833_v63  ;;  %2043 = vmatmul.bf16.gmra.mxu2 %v1866_v57 }
 0x2f5   : > { %v2503_v10 = vmul.f32 %v4835_v44, %v6253_v61  ;;  %4838 = vpow2.f32 %v4380_v23  ;;  %2132 = vmatmul.bf16.gmra.mxu3 %v1866_v57  ;;  %v2495_v54 = vsel %vm2494_vm6, %v4829_v48, %v2491_v55  ;;  %v4837_v50 = vpop.eup %4836  ;;  %vm2508_vm8 = vweird.f32 %v4835_v44 }
 0x2f6   : > { %4840 = vrcp.f32 %v6277_v3  ;;  %v2500_v11 = vsel %vm2497_vm7, %v2499_v47, %v2495_v54  ;;  %v2511_v48 = vand.u32 2147483647, %v6253_v61  ;;  %vm2509_vm10 = vmor %vm2507_vm9, %vm2508_vm8  ;;  %v2514_v57 = vor.u32 1.1754944e-38, %v2513_v45 }
 0x2f7   : > { %v2504_v22 = vsub.f32 1.0, %v2503_v10  ;;  %v6281_v1 = vpop.f32.mrf.mxu2  ;;  %v2855_v38 = vmul.f32 %v4837_v50, %v2500_v11  ;;  %4842 = vtanh.f32 %v2161_v51  ;;  %v1773_v61 = vadd.f32 %v5927_v18, %v5938_v28  ;;  %v7439_v18 = vld [vmem:[#allocation69_spill] sm:$0xff] }
 0x2f8   : > { %v2093_v2 = vpop.f32.mrf.mxu3  ;;  %vm2512_vm11 = vcmp.eq.f32.partialorder %v2511_v48, 8.507059e+37  ;;  %v2526_v21 = vand.u32 2147483647, %v6277_v3  ;;  %v2528_v56 = vand.u32 2147483648, %v6277_v3  ;;  %v1768_v28 = vadd.f32 %v7439_v18, %v5912_v43 }
 0x2f9   : > { %v2168_v53 = vadd.f32 %v2093_v2, %v5929_v32  ;;  %v2505_v31 = vmul.f32 %v4835_v44, %v2504_v22  ;;  %vm2522_vm13 = vweird.f32 %v6277_v3 }
 0x2fa   : > { %v2165_v24 = vadd.f32 %v6263_v49, %v1768_v28  ;;  %v2529_v10 = vor.u32 1.1754944e-38, %v2528_v56  ;;  %vm2527_vm15 = vcmp.eq.f32.partialorder %v2526_v21, 8.507059e+37  ;;  %v7441_v56 = vld [vmem:[#allocation72_spill] sm:$0xff] }
 0x2fb   : > { %v4839_v9 = vpop.eup %4838  ;;  %v4381_v35 = vmul.f32 -1.442695, %v2168_v53  ;;  %v2506_v46 = vadd.f32 %v4835_v44, %v2505_v31 }
 0x2fc   : > { %v4841_v34 = vpop.eup %4840  ;;  %v6289_v5 = vadd.f32 1.0, %v4839_v9 }
 0x2fd   : > { %v2518_v32 = vmul.f32 %v4841_v34, %v6277_v3  ;;  %4844 = vpow2.f32 %v4381_v35  ;;  %v2510_v40 = vsel %vm2509_vm10, %v4835_v44, %v2506_v46  ;;  %v4843_v42 = vpop.eup %4842  ;;  %vm2523_vm12 = vweird.f32 %v4841_v34  ;;  %v7440_v46 = vld [vmem:[#allocation71_spill] sm:$0xff] }
 0x2fe   : > { %4846 = vrcp.f32 %v6289_v5  ;;  %v2515_v26 = vsel %vm2512_vm11, %v2514_v57, %v2510_v40  ;;  %vm2524_vm14 = vmor %vm2522_vm13, %vm2523_vm12  ;;  %v2543_v2 = vand.u32 2147483648, %v6289_v5  ;;  %v2541_v53 = vand.u32 2147483647, %v6289_v5 }
 0x2ff   : > { %v2519_v16 = vsub.f32 1.0, %v2518_v32  ;;  %v6295_v0 = vpop.f32.mrf.mxu2  ;;  %v2856_v33 = vmul.f32 %v4843_v42, %v2515_v26  ;;  %4848 = vtanh.f32 %v2163_v14  ;;  %vm2537_vm2 = vweird.f32 %v6289_v5 }
 0x300   : > { %v2095_v13 = vpop.f32.mrf.mxu3  ;;  %v2544_v57 = vor.u32 1.1754944e-38, %v2543_v2  ;;  %vm2542_vm4 = vcmp.eq.f32.partialorder %v2541_v53, 8.507059e+37  ;;  %v6343_v2 = vadd.f32 %v5970_v12, %v5983_v58  ;;  %v7444_v58 = vld [vmem:[#allocation73_spill] sm:$0xff] }
 0x301   : > { %v2170_v63 = vadd.f32 %v2095_v13, %v1773_v61  ;;  %v2883_v23 = vpack.c.bf16 %v2856_v33, %v2855_v38  ;;  %v2520_v55 = vmul.f32 %v4841_v34, %v2519_v16 }
 0x303   : > { %v4845_v44 = vpop.eup %4844  ;;  %v4382_v51 = vmul.f32 -1.442695, %v2170_v63  ;;  %3025 = vmatmul.bf16.gmra.mxu0 %v2883_v23  ;;  %3114 = vmatmul.bf16.gmra.mxu1 %v2883_v23  ;;  %v2521_v47 = vadd.f32 %v4841_v34, %v2520_v55  ;;  %v7442_v63 = vld [vmem:[#allocation70_spill] sm:$0xff] }
 0x304   : > { %v4847_v37 = vpop.eup %4846  ;;  %v6306_v62 = vadd.f32 1.0, %v4845_v44  ;;  %2048 = vmatmul.bf16.gmra.mxu2 %v1868_v15  ;;  %v1772_v23 = vadd.f32 %v7442_v63, %v7441_v56  ;;  %v7451_v56 = vld [vmem:[#allocation44_spill] sm:$0xff]  ;;  %v7452_v63 = vld [vmem:[#allocation41_spill] sm:$0xff] }
 0x305   : > { %v2533_v54 = vmul.f32 %v4847_v37, %v6289_v5  ;;  %4850 = vpow2.f32 %v4382_v51  ;;  %2137 = vmatmul.bf16.gmra.mxu3 %v1868_v15  ;;  %v2525_v43 = vsel %vm2524_vm14, %v4841_v34, %v2521_v47  ;;  %v4849_v50 = vpop.eup %4848  ;;  %vm2538_vm0 = vweird.f32 %v4847_v37 }
 0x306   : > { %4852 = vrcp.f32 %v6306_v62  ;;  %v2530_v11 = vsel %vm2527_vm15, %v2529_v10, %v2525_v43  ;;  %v2167_v34 = vadd.f32 %v6281_v1, %v7440_v46  ;;  %vm2539_vm3 = vmor %vm2537_vm2, %vm2538_vm0  ;;  %v1777_v5 = vadd.f32 %v5952_v52, %v5963_v20 }
 0x307   : > { %v2534_v22 = vsub.f32 1.0, %v2533_v54  ;;  %v6310_v3 = vpop.f32.mrf.mxu2  ;;  %v2857_v38 = vmul.f32 %v4849_v50, %v2530_v11  ;;  %4854 = vtanh.f32 %v2165_v24  ;;  %v2556_v16 = vand.u32 2147483647, %v6306_v62 }
 0x308   : > { %v2098_v49 = vpop.f32.mrf.mxu3  ;;  %v2558_v33 = vand.u32 2147483648, %v6306_v62  ;;  %vm2552_vm6 = vweird.f32 %v6306_v62  ;;  %v2169_v28 = vadd.f32 %v6295_v0, %v1772_v23  ;;  %v6384_v23 = vadd.f32 %v7452_v63, %v7451_v56  ;;  %v4972_v56 = vld [vmem:[%s5506_s24] sm:$0xe] }
 0x309   : > { %v2172_v45 = vadd.f32 %v2098_v49, %v5954_v30  ;;  %v2535_v19 = vmul.f32 %v4847_v37, %v2534_v22  ;;  %vm2557_vm8 = vcmp.eq.f32.partialorder %v2556_v16, 8.507059e+37  ;;  %v1776_v49 = vadd.f32 %v5946_v17, %v5961_v25  ;;  %v7443_v25 = vld [vmem:[#allocation32_spill] sm:$0xff] }
 0x30a   : > { %v2559_v51 = vor.u32 1.1754944e-38, %v2558_v33  ;;  %v6358_v12 = vadd.f32 %v7443_v25, %v6027_v27  ;;  %v7447_v27 = vld [vmem:[#allocation39_spill] sm:$0xff]  ;;  %v3175_v33 = vlaneseq }
 0x30b   : > { %v4851_v31 = vpop.eup %4850  ;;  %v4383_v48 = vmul.f32 -1.442695, %v2172_v45  ;;  %v2536_v9 = vadd.f32 %v4847_v37, %v2535_v19  ;;  %v1781_v45 = vadd.f32 %v5974_v41, %v5985_v36  ;;  %v6349_v19 = vadd.f32 %v5992_v6, %v6005_v39 }
 0x30c   : > { %v4853_v35 = vpop.eup %4852  ;;  %v6318_v14 = vadd.f32 1.0, %v4851_v31  ;;  %v2171_v41 = vadd.f32 %v6310_v3, %v7444_v58 }
 0x30d   : > { %v2548_v7 = vmul.f32 %v4853_v35, %v6306_v62  ;;  %4856 = vpow2.f32 %v4383_v48  ;;  %v2540_v30 = vsel %vm2539_vm3, %v4847_v37, %v2536_v9  ;;  %v4855_v32 = vpop.eup %4854  ;;  %vm2553_vm5 = vweird.f32 %v4853_v35  ;;  %v7445_v9 = vld [vmem:[#allocation34_spill] sm:$0xff] }
 0x30e   : > { %4858 = vrcp.f32 %v6318_v14  ;;  %v2545_v40 = vsel %vm2542_vm4, %v2544_v57, %v2540_v30  ;;  %vm2554_vm7 = vmor %vm2552_vm6, %vm2553_vm5  ;;  %v2573_v0 = vand.u32 2147483648, %v6318_v14  ;;  %vm2567_vm10 = vweird.f32 %v6318_v14  ;;  %v7449_v57 = vld [vmem:[#allocation40_spill] sm:$0xff] }
 0x30f   : > { %v2549_v42 = vsub.f32 1.0, %v2548_v7  ;;  %v6324_v26 = vpop.f32.mrf.mxu2  ;;  %v2858_v1 = vmul.f32 %v4855_v32, %v2545_v40  ;;  %4860 = vtanh.f32 %v2167_v34  ;;  %v7448_v34 = vld [vmem:[#allocation35_spill] sm:$0xff]  ;;  %v7450_v7 = vld [vmem:[#allocation37_spill] sm:$0xff] }
 0x310   : > { %v2100_v61 = vpop.f32.mrf.mxu3  ;;  %v2574_v6 = vor.u32 1.1754944e-38, %v2573_v0  ;;  %v6377_v30 = vadd.f32 %v7450_v7, %v7449_v57  ;;  %v2173_v40 = vadd.f32 %v6324_v26, %v1776_v49  ;;  %v7454_v26 = vld [vmem:[#allocation43_spill] sm:$0xff]  ;;  %v7465_v7 = vld [vmem:[#allocation76_spill] sm:$0xff] }
 0x311   : > { %v2174_v13 = vadd.f32 %v2100_v61, %v1777_v5  ;;  %v2884_v15 = vpack.c.bf16 %v2858_v1, %v2857_v38  ;;  %v2550_v21 = vmul.f32 %v4853_v35, %v2549_v42  ;;  %v2571_v38 = vand.u32 2147483647, %v6318_v14 }
 0x313   : > { %v4857_v55 = vpop.eup %4856  ;;  %v4384_v18 = vmul.f32 -1.442695, %v2174_v13  ;;  %3030 = vmatmul.bf16.gmra.mxu0 %v2884_v15  ;;  %3119 = vmatmul.bf16.gmra.mxu1 %v2884_v15  ;;  %v2551_v52 = vadd.f32 %v4853_v35, %v2550_v21  ;;  %vm2572_vm12 = vcmp.eq.f32.partialorder %v2571_v38, 8.507059e+37  ;;  %v1743_v38 = vpop.f32.mrf.mxu1 }
 0x314   : > { %v4859_v20 = vpop.eup %4858  ;;  %v6332_v44 = vadd.f32 1.0, %v4857_v55  ;;  %v7453_v55 = vld [vmem:[#allocation45_spill] sm:$0xff] }
 0x315   : > { %v2563_v47 = vmul.f32 %v4859_v20, %v6318_v14  ;;  %4862 = vpow2.f32 %v4384_v18  ;;  %v2555_v37 = vsel %vm2554_vm7, %v4853_v35, %v2551_v52  ;;  %v4861_v24 = vpop.eup %4860  ;;  %vm2568_vm9 = vweird.f32 %v4859_v20  ;;  %v7446_v35 = vld [vmem:[#allocation77_spill] sm:$0xff] }
 0x316   : > { %4864 = vrcp.f32 %v6332_v44  ;;  %v2560_v10 = vsel %vm2557_vm8, %v2559_v51, %v2555_v37  ;;  %vm2569_vm11 = vmor %vm2567_vm10, %vm2568_vm9  ;;  %v6368_v46 = vadd.f32 %v7446_v35, %v7445_v9  ;;  %v6372_v14 = vadd.f32 %v7448_v34, %v7447_v27  ;;  %v7455_v52 = vld [vmem:[#allocation49_spill] sm:$0xff]  ;;  %v7457_v51 = vld [vmem:[#allocation50_spill] sm:$0xff] }
 0x317   : > { %v2564_v54 = vsub.f32 1.0, %v2563_v47  ;;  %v2014_v43 = vpop.f32.mrf.mxu2  ;;  %v2859_v50 = vmul.f32 %v4861_v24, %v2560_v10  ;;  %4866 = vtanh.f32 %v2169_v28  ;;  %v2586_v61 = vand.u32 2147483647, %v6332_v44  ;;  %v7458_v47 = vld [vmem:[#allocation48_spill] sm:$0xff]  ;;  %v7464_v27 = vld [vmem:[#allocation54_spill] sm:$0xff] }
 0x318   : > { %v2103_v62 = vpop.f32.mrf.mxu3  ;;  %v2588_v16 = vand.u32 2147483648, %v6332_v44  ;;  %v6388_v18 = vadd.f32 %v7454_v26, %v7453_v55  ;;  %v6396_v37 = vadd.f32 %v7458_v47, %v7457_v51  ;;  %vm2582_vm14 = vweird.f32 %v6332_v44  ;;  %v7463_v35 = vld [vmem:[#allocation56_spill] sm:$0xff]  ;;  %v4973_v51 = vld [vmem:[%s5506_s24 + $0x4] sm:$0xf] }
 0x319   : > { %v2176_v11 = vadd.f32 %v2103_v62, %v5976_v8  ;;  %v2565_v22 = vmul.f32 %v4859_v20, %v2564_v54  ;;  %v6353_v8 = vadd.f32 %v5996_v29, %v6007_v60  ;;  %v7459_v62 = vld [vmem:[#allocation74_spill] sm:$0xff]  ;;  %vm2587_vm0 = vcmp.eq.f32.partialorder %v2586_v61, 8.507059e+37 }
 0x31a   : > { %v2175_v0 = vadd.f32 %v2014_v43, %v7459_v62  ;;  %v6412_v43 = vstv %s5491_s25  ;;  %v6425_v34 = vadd.f32 %v7464_v27, %v7463_v35  ;;  %v3404_v47 = vunpack.c.l.bf16 %v4973_v51  ;;  %v7471_v51 = vld [vmem:[#allocation78_spill] sm:$0xff]  ;;  %s4638_s25 = sshll.u32 %s5257_s12, 6 }
 0x31b   : > { %v4863_v53 = vpop.eup %4862  ;;  %v4385_v31 = vmul.f32 -1.442695, %v2176_v11  ;;  %v2566_v48 = vadd.f32 %v4859_v20, %v2565_v22  ;;  %v2589_v22 = vor.u32 1.1754944e-38, %v2588_v16  ;;  %s3740_s8 = sadd.s32 %s4638_s25, %s4500_s13 }
 0x31c   : > { %v4865_v17 = vpop.eup %4864  ;;  %v6362_v36 = vadd.f32 1.0, %v4863_v53  ;;  %v6407_v53 = vshrl.u32 %v3175_v33, 7  ;;  %v3471_v35 = vrot.slane %v3404_v47, 2  ;;  %s4501_s12 = sshll.u32 %s3740_s8, 2 }
 0x31d   : > { %v2578_v29 = vmul.f32 %v4865_v17, %v6332_v44  ;;  %4868 = vpow2.f32 %v4385_v31  ;;  %v2570_v39 = vsel %vm2569_vm11, %v4859_v20, %v2566_v48  ;;  %v4867_v60 = vpop.eup %4866  ;;  %vm2583_vm13 = vweird.f32 %v4865_v17  ;;  %v7456_v20 = vld [vmem:[#allocation46_spill] sm:$0xff]  ;;  %s3742_s29 = scalar_lea.hbm %s7511_s19, %s4501_s12 }
 0x31e   : > { %4870 = vrcp.f32 %v6362_v36  ;;  %v2575_v3 = vsel %vm2572_vm12, %v2574_v6, %v2570_v39  ;;  %v6392_v28 = vadd.f32 %v7456_v20, %v7455_v52  ;;  %vm2584_vm15 = vmor %vm2582_vm14, %vm2583_vm13  ;;  %v2601_v48 = vand.u32 2147483647, %v6362_v36  ;;  %v7461_v39 = vld [vmem:[#allocation55_spill] sm:$0xff]  ;;  %s3745_s20 = sshll.u32 %s3742_s29, 4  ;;  %s3746_s20 = int_to_ptr.hbm [resolvable:$true] %s3745_s20 }
 0x31f   : > { %v2579_v32 = vsub.f32 1.0, %v2578_v29  ;;  %v2016_v5 = vpop.f32.mrf.mxu2  ;;  %v2860_v42 = vmul.f32 %v4867_v60, %v2575_v3  ;;  %4872 = vtanh.f32 %v2171_v41  ;;  %v2603_v6 = vand.u32 2147483648, %v6362_v36  ;;  %v7462_v60 = vld [vmem:[#allocation53_spill] sm:$0xff]  ;;  %s5177_s16 = sshra.s32 %s3746_s20, 4  ;;  %s5178_s16 = int_to_ptr.hbm [resolvable:$true] %s5177_s16 }
 0x320   : > { %v2105_v1 = vpop.f32.mrf.mxu3  ;;  %4874 = vtanh.f32 %v2173_v40  ;;  %v2177_v58 = vadd.f32 %v2016_v5, %v6343_v2  ;;  %v6421_v9 = vadd.f32 %v7462_v60, %v7461_v39  ;;  %v6428_v3 = vadd.f32 %v1743_v38, %v6135_v4  ;;  %v7468_v39 = vld [vmem:[#allocation75_spill] sm:$0xff]  ;;  %s5179_s28 = scalar_lea.hbm %s5178_s16, 256  ;;  %p5184_p5 = scmp.lt.s32.totalorder %s5178_s16, %s7511_s19 }
 0x321   : > { %v2178_v13 = vadd.f32 %v2105_v1, %v1781_v45  ;;  %v2885_v15 = vpack.c.bf16 %v2860_v42, %v2859_v50  ;;  %v2580_v21 = vmul.f32 %v4865_v17, %v2579_v32  ;;  %v3209_v5 = vadd.s32 %v6412_v43, %v6407_v53  ;;  %p5180_p6 = scmp.ne.s32.totalorder %s5178_s16, %s5179_s28 }
 0x322   : > { %vm2597_vm3 = vweird.f32 %v6362_v36  ;;  %vm6434_vm4 = vcmp.eq.f32.partialorder %v2601_v48, 8.507059e+37  ;;  %v6441_v4 = vstv %s6399_s18  ;;  %v3177_v63 = vadd.s32 8, %v6407_v53  ;;  %s5183_s18 = scalar_lea.hbm %s7511_s19, 2048 }
 0x323   : > { %v4869_v24 = vpop.eup %4868  ;;  %v4386_v10 = vmul.f32 -1.442695, %v2178_v13  ;;  %3035 = vmatmul.bf16.gmra.mxu0 %v2885_v15  ;;  %3124 = vmatmul.bf16.gmra.mxu1 %v2885_v15  ;;  %v2581_v54 = vadd.f32 %v4865_v17, %v2580_v21  ;;  %v2604_v13 = vor.u32 1.1754944e-38, %v2603_v6  ;;  %vm3243_vm6 = vcmp.lt.s32.totalorder %v3209_v5, %v6441_v4  ;;  %p5181_p13 = pnand %p5180_p6, %p5439_p3  ;;  %p5185_p7 = scmp.lt.s32.totalorder %s5183_s18, %s5179_s28 }
 0x324   : > { %v4871_v50 = vpop.eup %4870  ;;  %v6403_v11 = vadd.f32 1.0, %v4869_v24  ;;  %v5284_v38 = vmov 0.0   ;;  %v3178_v48 = vadd.s32 16, %v6407_v53 }
 0x325   : > { %v2593_v49 = vmul.f32 %v4871_v50, %v6362_v36  ;;  %4876 = vpow2.f32 %v4386_v10  ;;  %v2585_v45 = vsel %vm2584_vm15, %v4865_v17, %v2581_v54  ;;  %v4873_v31 = vpop.eup %4872  ;;  %v2911_v17 = vld [vmem:[%s7460_s4] sm:$0x3]  ;;  %vm2598_vm2 = vweird.f32 %v4871_v50  ;;  %p5182_p0 = pneg %p5181_p13  ;;  %p5186_p9 = por %p5185_p7, %p5184_p5 }
 0x326   : > { %4878 = vrcp.f32 %v6403_v11  ;;  %v2590_v44 = vsel %vm2587_vm0, %v2589_v22, %v2585_v45  ;;  %v4875_v57 = vpop.eup %4874  ;;  %v6438_v1 = vperm.slane %v2911_v17, 0  ;;  %vm2599_vm5 = vmor %vm2597_vm3, %vm2598_vm2  ;;  %v3403_v36 = vunpack.c.l.bf16 %v4972_v56 }
 0x327   : > { %v2594_v25 = vsub.f32 1.0, %v2593_v49  ;;  %v2019_v41 = vpop.f32.mrf.mxu2  ;;  %v2861_v29 = vmul.f32 %v4873_v31, %v2590_v44  ;;  %4880 = vtanh.f32 %v2175_v0  ;;  %v2616_v24 = vand.u32 2147483647, %v6403_v11  ;;  %v1307_v31 = vld [vmem:[%s5506_s24 + $0x8] sm:$0xff]   ;;  %p5187_p2 = pnand %p5186_p9, %p5182_p0 }
 0x328   : > { %v2108_v2 = vpop.f32.mrf.mxu3  ;;  %4882 = vtanh.f32 %v2177_v58  ;;  %v6454_v0 = vperm.slane %v2911_v17, 1  ;;  %v6458_v49 = vsel %vm3243_vm6, 1.0, %v5284_v38  ;;  %v3470_v45 = vrot.slane %v3403_v36, 2 }
 0x329   : > { %v2180_v32 = vadd.f32 %v2108_v2, %v7465_v7  ;;  %v2595_v40 = vmul.f32 %v4871_v50, %v2594_v25  ;;  %v3210_v44 = vadd.s32 %v6412_v43, %v3177_v63  ;;  %v2179_v60 = vadd.f32 %v2019_v41, %v7468_v39 }
 0x32a   : > { %vm2612_vm8 = vweird.f32 %v6403_v11  ;;  %vm6468_vm9 = vcmp.eq.f32.partialorder %v2616_v24, 8.507059e+37  ;;  %v6484_v63 = vsel %vm1835_vm1, %v3470_v45, %v3471_v35 }
 0x32b   : > { %v4877_v61 = vpop.eup %4876  ;;  %v4387_v16 = vmul.f32 -1.442695, %v2180_v32  ;;  %v2596_v33 = vadd.f32 %v4871_v50, %v2595_v40  ;;  %v3405_v40 = vunpack.c.l.bf16 %v1307_v31  ;;  %vm3244_vm11 = vcmp.lt.s32.totalorder %v3210_v44, %v6441_v4 }
 0x32c   : > { %v4879_v15 = vpop.eup %4878  ;;  %v6443_v21 = vadd.f32 1.0, %v4877_v61  ;;  %v3406_v61 = vunpack.c.h.bf16 %v1307_v31 }
 0x32d   : > { %v2608_v55 = vmul.f32 %v4879_v15, %v6403_v11  ;;  %4884 = vpow2.f32 %v4387_v16  ;;  %v2600_v26 = vsel %vm2599_vm5, %v4871_v50, %v2596_v33  ;;  %v4881_v52 = vpop.eup %4880  ;;  %v2618_v50 = vand.u32 2147483648, %v6403_v11 }
 0x32e   : > { %4886 = vrcp.f32 %v6443_v21  ;;  %v2605_v20 = vsel %vm6434_vm4, %v2604_v13, %v2600_v26  ;;  %v6463_v25 = vpop.eup %4882  ;;  %vm2613_vm7 = vweird.f32 %v4879_v15  ;;  %v2631_v41 = vand.u32 2147483647, %v6443_v21 }
 0x32f   : > { %v2609_v10 = vsub.f32 1.0, %v2608_v55  ;;  %v2021_v54 = vpop.f32.mrf.mxu2  ;;  %v2862_v62 = vmul.f32 %v4875_v57, %v2605_v20  ;;  %v2619_v32 = vor.u32 1.1754944e-38, %v2618_v50  ;;  %vm2614_vm10 = vmor %vm2612_vm8, %vm2613_vm7  ;;  %v3211_v11 = vadd.s32 %v6412_v43, %v3178_v48  ;;  %v6486_v20 = vpop.f32.mrf.mxu0  ;;  %v6508_v48 = vld [vmem:[%s5506_s24 + $0x10] sm:$0xff]  }
 0x330   : > { %v2110_v22 = vpop.f32.mrf.mxu3  ;;  %v2181_v16 = vadd.f32 %v2021_v54, %v6349_v19  ;;  %v2633_v13 = vand.u32 2147483648, %v6443_v21  ;;  %v3473_v26 = vrot.slane %v3405_v40, 2  ;;  %vm2627_vm12 = vweird.f32 %v6443_v21 }
 0x331   : > { %v2182_v58 = vadd.f32 %v2110_v22, %v6353_v8  ;;  %v2886_v6 = vpack.c.bf16 %v2862_v62, %v2861_v29  ;;  %v2610_v17 = vmul.f32 %v4879_v15, %v2609_v10  ;;  %v6492_v19 = vsel %vm3244_vm11, 1.0, %v5284_v38 }
 0x332   : > { %vm3245_vm13 = vcmp.lt.s32.totalorder %v3211_v11, %v6441_v4  ;;  %vm6498_vm15 = vcmp.eq.f32.partialorder %v2631_v41, 8.507059e+37  ;;  %v2634_v54 = vor.u32 1.1754944e-38, %v2633_v13  ;;  %v3179_v62 = vadd.s32 24, %v6407_v53 }
 0x333   : > { %v4885_v2 = vpop.eup %4884  ;;  %v4388_v57 = vmul.f32 -1.442695, %v2182_v58  ;;  %3040 = vmatmul.bf16.gmra.mxu0 %v2886_v6  ;;  %3129 = vmatmul.bf16.gmra.mxu1 %v2886_v6  ;;  %v2611_v7 = vadd.f32 %v4879_v15, %v2610_v17  ;;  %v6504_v31 = vsel %vm1835_vm1, %v3471_v35, %v3473_v26  ;;  %v7474_v17 = vld [vmem:[#allocation33_spill] sm:$0xff]  ;;  %v3407_v40 = vunpack.c.l.bf16 %v6508_v48 }
 0x334   : > { %v4887_v8 = vpop.eup %4886  ;;  %v6472_v29 = vadd.f32 1.0, %v4885_v2  ;;  %v3180_v13 = vadd.s32 32, %v6407_v53 }
 0x335   : > { %v2623_v5 = vmul.f32 %v4887_v8, %v6443_v21  ;;  %4888 = vpow2.f32 %v4388_v57  ;;  %v2615_v42 = vsel %vm2614_vm10, %v4879_v15, %v2611_v7  ;;  %vm2628_vm14 = vweird.f32 %v4887_v8 }
 0x336   : > { %4890 = vrcp.f32 %v6472_v29  ;;  %v2620_v33 = vsel %vm6468_vm9, %v2619_v32, %v2615_v42  ;;  %v2646_v44 = vand.u32 2147483647, %v6472_v29  ;;  %vm2629_vm0 = vmor %vm2627_vm12, %vm2628_vm14  ;;  %v2648_v35 = vand.u32 2147483648, %v6472_v29 }
 0x337   : > { %v2624_v56 = vsub.f32 1.0, %v2623_v5  ;;  %v2024_v36 = vpop.f32.mrf.mxu2  ;;  %v2863_v55 = vmul.f32 %v4881_v52, %v2620_v33  ;;  %4892 = vtanh.f32 %v2179_v60  ;;  %v6496_v52 = vrot.slane %v3406_v61, 2 }
 0x338   : > { %v2113_v15 = vpop.f32.mrf.mxu3  ;;  %4894 = vtanh.f32 %v2181_v16  ;;  %v2183_v39 = vadd.f32 %v2024_v36, %v7474_v17  ;;  %v6519_v60 = vsel %vm3245_vm13, 1.0, %v5284_v38  ;;  %v3212_v32 = vadd.s32 %v6412_v43, %v3179_v62 }
 0x339   : > { %v2184_v47 = vadd.f32 %v2113_v15, %v7471_v51  ;;  %v2625_v24 = vmul.f32 %v4887_v8, %v2624_v56  ;;  %v6525_v57 = vsel %vm1835_vm1, %v3473_v26, %v6496_v52  ;;  %vm2642_vm2 = vweird.f32 %v6472_v29 }
 0x33a   : > { %vm6534_vm3 = vcmp.eq.f32.partialorder %v2646_v44, 8.507059e+37  ;;  %v2649_v33 = vor.u32 1.1754944e-38, %v2648_v35  ;;  %vm3246_vm5 = vcmp.lt.s32.totalorder %v3212_v32, %v6441_v4 }
 0x33b   : > { %v4889_v50 = vpop.eup %4888  ;;  %v4389_v22 = vmul.f32 -1.442695, %v2184_v47  ;;  %v2626_v45 = vadd.f32 %v4887_v8, %v2625_v24  ;;  %v6546_v24 = vrot.slane %v3407_v40, 2 }
 0x33c   : > { %v4891_v58 = vpop.eup %4890  ;;  %v6510_v6 = vadd.f32 1.0, %v4889_v50 }
 0x33d   : > { %v2638_v27 = vmul.f32 %v4891_v58, %v6472_v29  ;;  %4896 = vpow2.f32 %v4389_v22  ;;  %v2630_v2 = vsel %vm2629_vm0, %v4887_v8, %v2626_v45  ;;  %v4893_v7 = vpop.eup %4892  ;;  %vm2643_vm4 = vweird.f32 %v4891_v58 }
 0x33e   : > { %4898 = vrcp.f32 %v6510_v6  ;;  %v2635_v21 = vsel %vm6498_vm15, %v2634_v54, %v2630_v2  ;;  %v6538_v42 = vpop.eup %4894  ;;  %v2661_v47 = vand.u32 2147483647, %v6510_v6  ;;  %vm2657_vm6 = vweird.f32 %v6510_v6  ;;  %vm2644_vm7 = vmor %vm2642_vm2, %vm2643_vm4 }
 0x33f   : > { %v2639_v41 = vsub.f32 1.0, %v2638_v27  ;;  %v2026_v11 = vpop.f32.mrf.mxu2  ;;  %v2864_v5 = vmul.f32 %v6463_v25, %v2635_v21  ;;  %4900 = vtanh.f32 %v2183_v39  ;;  %v2663_v17 = vand.u32 2147483648, %v6510_v6 }
 0x340   : > { %v2115_v61 = vpop.f32.mrf.mxu3  ;;  %v3006_v16 = vpop.f32.mrf.mxu0  ;;  %v2185_v45 = vadd.f32 %v2026_v11, %v6358_v12  ;;  %v3408_v29 = vunpack.c.h.bf16 %v6508_v48  ;;  %vm6569_vm9 = vcmp.eq.f32.partialorder %v2661_v47, 8.507059e+37  ;;  %v6576_v8 = vsel %vm3246_vm5, 1.0, %v5284_v38 }
 0x341   : > { %v2186_v56 = vadd.f32 %v2115_v61, %v6368_v46  ;;  %v3007_v36 = vadd.f32 %v3006_v16, %v6438_v1  ;;  %v3095_v25 = vpop.f32.mrf.mxu1  ;;  %v2887_v26 = vpack.c.bf16 %v2864_v5, %v2863_v55  ;;  %v2640_v15 = vmul.f32 %v4891_v58, %v2639_v41 }
 0x342   : > { %v3096_v51 = vadd.f32 %v3095_v25, %v6454_v0  ;;  %v3213_v55 = vadd.s32 %v6412_v43, %v3180_v13  ;;  %v6581_v48 = vsel %vm1835_vm1, %v6496_v52, %v6546_v24  ;;  %v2664_v32 = vor.u32 1.1754944e-38, %v2663_v17 }
 0x343   : > { %v4897_v10 = vpop.eup %4896  ;;  %v4390_v54 = vmul.f32 -1.442695, %v2186_v56  ;;  %v3339_v62 = vmul.f32 %v6458_v49, %v3007_v36  ;;  %3045 = vmatmul.bf16.gmra.mxu0 %v2887_v26  ;;  %3134 = vmatmul.bf16.gmra.mxu1 %v2887_v26  ;;  %v2641_v46 = vadd.f32 %v4891_v58, %v2640_v15  ;;  %v7480_v56 = vld [vmem:[#allocation36_spill] sm:$0xff] }
 0x344   : > { %v4899_v50 = vpop.eup %4898  ;;  %v6551_v22 = vadd.f32 1.0, %v4897_v10  ;;  %v3340_v44 = vmul.f32 %v6458_v49, %v3096_v51  ;;  %vm3247_vm8 = vcmp.lt.s32.totalorder %v3213_v55, %v6441_v4  ;;  %v6594_v10 = vrot.slane %v3408_v29, 2 }
 0x345   : > { %v2653_v39 = vmul.f32 %v4899_v50, %v6510_v6  ;;  %4902 = vpow2.f32 %v4390_v54  ;;  %v3567_v35 = vadd.f32 %v6484_v63, %v3339_v62  ;;  %v2645_v27 = vsel %vm2644_vm7, %v4891_v58, %v2641_v46  ;;  %v6561_v2 = vpop.eup %4900 }
 0x346   : > { %4904 = vrcp.f32 %v6551_v22  ;;  %v3663_v12 = vpack.c.bf16 %v3340_v44, %v3340_v44  ;;  %v2650_v49 = vsel %vm6534_vm3, %v2649_v33, %v2645_v27  ;;  %vm2658_vm10 = vweird.f32 %v4899_v50 }
 0x347   : > { %v2654_v21 = vsub.f32 1.0, %v2653_v39  ;;  %v3599_v40 = vpack.c.bf16 %v3567_v35, %v3567_v35  ;;  %v2029_v41 = vpop.f32.mrf.mxu2  ;;  %v2865_v11 = vmul.f32 %v4893_v7, %v2650_v49  ;;  %4906 = vtanh.f32 %v2185_v45  ;;  %v7479_v7 = vld [vmem:[#allocation38_spill] sm:$0xff]  ;;  %vm2659_vm11 = vmor %vm2657_vm6, %vm2658_vm10 }
 0x348   : > { %3695 = vst [vmem:[%s5533_s9 + $0x4] sm:$0xf] %v3663_v12  ;;  %v2118_v63 = vpop.f32.mrf.mxu3  ;;  %v3008_v58 = vpop.f32.mrf.mxu0  ;;  %v2187_v36 = vadd.f32 %v2029_v41, %v7480_v56  ;;  %v6591_v26 = vsel %vm3247_vm8, 1.0, %v5284_v38  ;;  %vm2672_vm12 = vweird.f32 %v6551_v22  ;;  %v2676_v55 = vand.u32 2147483647, %v6551_v22 }
 0x349   : > { %3631 = vst [vmem:[%s5533_s9] sm:$0xf] %v3599_v40  ;;  %v2188_v61 = vadd.f32 %v2118_v63, %v7479_v7  ;;  %v3009_v16 = vadd.f32 %v3008_v58, %v6438_v1  ;;  %v3097_v33 = vpop.f32.mrf.mxu1  ;;  %v2655_v13 = vmul.f32 %v4899_v50, %v2654_v21  ;;  %v2678_v35 = vand.u32 2147483648, %v6551_v22  ;;  %v6613_v21 = vld [vmem:[%s5506_s24 + $0x18] sm:$0xff]  }
 0x34a   : > { %v3098_v25 = vadd.f32 %v3097_v33, %v6454_v0  ;;  %v6620_v41 = vsel %vm1835_vm1, %v6546_v24, %v6594_v10  ;;  %vm6622_vm14 = vcmp.eq.f32.partialorder %v2676_v55, 8.507059e+37  ;;  %v3409_v24 = vunpack.c.l.bf16 %v6613_v21 }
 0x34b   : > { %v4903_v52 = vpop.eup %4902  ;;  %v4391_v15 = vmul.f32 -1.442695, %v2188_v61  ;;  %v3341_v51 = vmul.f32 %v6492_v19, %v3009_v16  ;;  %v2656_v47 = vadd.f32 %v4899_v50, %v2655_v13  ;;  %v2679_v13 = vor.u32 1.1754944e-38, %v2678_v35 }
 0x34c   : > { %v4905_v54 = vpop.eup %4904  ;;  %v6596_v62 = vadd.f32 1.0, %v4903_v52  ;;  %v3342_v46 = vmul.f32 %v6492_v19, %v3098_v25 }
 0x34d   : > { %v2668_v45 = vmul.f32 %v4905_v54, %v6551_v22  ;;  %4908 = vpow2.f32 %v4391_v15  ;;  %v3568_v44 = vadd.f32 %v6504_v31, %v3341_v51  ;;  %v2660_v17 = vsel %vm2659_vm11, %v4899_v50, %v2656_v47  ;;  %v6605_v39 = vpop.eup %4906 }
 0x34e   : > { %4910 = vrcp.f32 %v6596_v62  ;;  %v3664_v19 = vpack.c.bf16 %v3342_v46, %v3342_v46  ;;  %v2665_v6 = vsel %vm6569_vm9, %v2664_v32, %v2660_v17  ;;  %v3181_v31 = vadd.s32 40, %v6407_v53 }
 0x34f   : > { %v2669_v27 = vsub.f32 1.0, %v2668_v45  ;;  %v3600_v12 = vpack.c.bf16 %v3568_v44, %v3568_v44  ;;  %v2031_v49 = vpop.f32.mrf.mxu2  ;;  %v2866_v29 = vmul.f32 %v6538_v42, %v2665_v6  ;;  %4912 = vtanh.f32 %v2187_v36 }
 0x350   : > { %3696 = vst [vmem:[%s5533_s9 + $0xc] sm:$0xf] %v3664_v19  ;;  %v2120_v50 = vpop.f32.mrf.mxu3  ;;  %v3011_v40 = vpop.f32.mrf.mxu0  ;;  %vm2673_vm13 = vweird.f32 %v4905_v54  ;;  %v2189_v16 = vadd.f32 %v2031_v49, %v6372_v14  ;;  %vm2687_vm15 = vweird.f32 %v6596_v62  ;;  %v2691_v15 = vand.u32 2147483647, %v6596_v62 }
 0x351   : > { %3632 = vst [vmem:[%s5533_s9 + $0x8] sm:$0xf] %v3600_v12  ;;  %v2190_v42 = vadd.f32 %v2120_v50, %v6377_v30  ;;  %v3012_v58 = vadd.f32 %v3011_v40, %v6438_v1  ;;  %v3100_v5 = vpop.f32.mrf.mxu1  ;;  %v2888_v7 = vpack.c.bf16 %v2866_v29, %v2865_v11  ;;  %v2670_v61 = vmul.f32 %v4905_v54, %v2669_v27  ;;  %vm2674_vm0 = vmor %vm2672_vm12, %vm2673_vm13  ;;  %v7485_v29 = vld [vmem:[#allocation79_spill] sm:$0xff] }
 0x352   : > { %v3101_v33 = vadd.f32 %v3100_v5, %v6454_v0  ;;  %v3214_v30 = vadd.s32 %v6412_v43, %v3181_v31  ;;  %v2693_v51 = vand.u32 2147483648, %v6596_v62  ;;  %v6650_v44 = vrot.slane %v3409_v24, 2 }
 0x353   : > { %v4909_v56 = vpop.eup %4908  ;;  %v4392_v36 = vmul.f32 -1.442695, %v2190_v42  ;;  %v3343_v25 = vmul.f32 %v6519_v60, %v3012_v58  ;;  %3050 = vmatmul.bf16.gmra.mxu0 %v2888_v7  ;;  %3139 = vmatmul.bf16.gmra.mxu1 %v2888_v7  ;;  %v2671_v32 = vadd.f32 %v4905_v54, %v2670_v61  ;;  %vm6655_vm3 = vcmp.eq.f32.partialorder %v2691_v15, 8.507059e+37  ;;  %v7486_v61 = vld [vmem:[#allocation42_spill] sm:$0xff] }
 0x354   : > { %v4911_v11 = vpop.eup %4910  ;;  %v6635_v52 = vadd.f32 1.0, %v4909_v56  ;;  %v3344_v14 = vmul.f32 %v6519_v60, %v3101_v33  ;;  %vm3248_vm2 = vcmp.lt.s32.totalorder %v3214_v30, %v6441_v4  ;;  %v2694_v12 = vor.u32 1.1754944e-38, %v2693_v51 }
 0x355   : > { %v2683_v47 = vmul.f32 %v4911_v11, %v6596_v62  ;;  %4914 = vpow2.f32 %v4392_v36  ;;  %v3569_v46 = vadd.f32 %v6525_v57, %v3343_v25  ;;  %v2675_v55 = vsel %vm2674_vm0, %v4905_v54, %v2671_v32  ;;  %v6645_v45 = vpop.eup %4912 }
 0x356   : > { %4916 = vrcp.f32 %v6635_v52  ;;  %v3665_v60 = vpack.c.bf16 %v3344_v14, %v3344_v14  ;;  %v2680_v22 = vsel %vm6622_vm14, %v2679_v13, %v2675_v55  ;;  %v3182_v49 = vadd.s32 48, %v6407_v53 }
 0x357   : > { %v2684_v17 = vsub.f32 1.0, %v2683_v47  ;;  %v3601_v19 = vpack.c.bf16 %v3569_v46, %v3569_v46  ;;  %v2034_v6 = vpop.f32.mrf.mxu2  ;;  %v2867_v35 = vmul.f32 %v6561_v2, %v2680_v22  ;;  %4918 = vtanh.f32 %v2189_v16 }
 0x358   : > { %3697 = vst [vmem:[%s5533_s9 + $0x14] sm:$0xf] %v3665_v60  ;;  %v2123_v57 = vpop.f32.mrf.mxu3  ;;  %v3013_v54 = vpop.f32.mrf.mxu0  ;;  %vm2688_vm4 = vweird.f32 %v4911_v11  ;;  %v6665_v42 = vsel %vm3248_vm2, 1.0, %v5284_v38  ;;  %v6670_v58 = vsel %vm1835_vm1, %v6594_v10, %v6650_v44  ;;  %v3410_v5 = vunpack.c.h.bf16 %v6613_v21 }
 0x359   : > { %3633 = vst [vmem:[%s5533_s9 + $0x10] sm:$0xf] %v3601_v19  ;;  %v2192_v31 = vadd.f32 %v2123_v57, %v7485_v29  ;;  %v3014_v50 = vadd.f32 %v3013_v54, %v6438_v1  ;;  %v3102_v40 = vpop.f32.mrf.mxu1  ;;  %v2685_v2 = vmul.f32 %v4911_v11, %v2684_v17  ;;  %v2191_v16 = vadd.f32 %v2034_v6, %v7486_v61  ;;  %vm2689_vm5 = vmor %vm2687_vm15, %vm2688_vm4 }
 0x35a   : > { %v3103_v63 = vadd.f32 %v3102_v40, %v6454_v0  ;;  %v6681_v10 = vadd.s32 %v6412_v43, %v3182_v49  ;;  %v2706_v21 = vand.u32 2147483647, %v6635_v52  ;;  %v6691_v51 = vrot.slane %v3410_v5, 2  ;;  %v6723_v5 = vld [vmem:[%s5506_s24 + $0x20] sm:$0xff]  }
 0x35b   : > { %v4915_v7 = vpop.eup %4914  ;;  %v4393_v33 = vmul.f32 -1.442695, %v2192_v31  ;;  %v3345_v13 = vmul.f32 %v6576_v8, %v3014_v50  ;;  %v2686_v24 = vadd.f32 %v4911_v11, %v2685_v2  ;;  %vm2702_vm6 = vweird.f32 %v6635_v52 }
 0x35c   : > { %v4917_v56 = vpop.eup %4916  ;;  %v6675_v36 = vadd.f32 1.0, %v4915_v7  ;;  %v3346_v25 = vmul.f32 %v6576_v8, %v3103_v63  ;;  %vm6696_vm8 = vcmp.eq.f32.partialorder %v2706_v21, 8.507059e+37  ;;  %v2708_v17 = vand.u32 2147483648, %v6635_v52 }
 0x35d   : > { %v2698_v32 = vmul.f32 %v4917_v56, %v6635_v52  ;;  %4920 = vpow2.f32 %v4393_v33  ;;  %v3570_v30 = vadd.f32 %v6581_v48, %v3345_v13  ;;  %v2690_v14 = vsel %vm2689_vm5, %v4911_v11, %v2686_v24  ;;  %v6686_v15 = vpop.eup %4918 }
 0x35e   : > { %4922 = vrcp.f32 %v6675_v36  ;;  %v3666_v8 = vpack.c.bf16 %v3346_v25, %v3346_v25  ;;  %v2695_v62 = vsel %vm6655_vm3, %v2694_v12, %v2690_v14  ;;  %vm2703_vm7 = vweird.f32 %v4917_v56 }
 0x35f   : > { %v2699_v47 = vsub.f32 1.0, %v2698_v32  ;;  %v3602_v46 = vpack.c.bf16 %v3570_v30, %v3570_v30  ;;  %v2036_v55 = vpop.f32.mrf.mxu2  ;;  %v2868_v60 = vmul.f32 %v6605_v39, %v2695_v62  ;;  %4924 = vtanh.f32 %v2191_v16  ;;  %vm2704_vm10 = vmor %vm2702_vm6, %vm2703_vm7 }
 0x360   : > { %3698 = vst [vmem:[%s5533_s9 + $0x1c] sm:$0xf] %v3666_v8  ;;  %v2125_v48 = vpop.f32.mrf.mxu3  ;;  %v3016_v11 = vpop.f32.mrf.mxu0  ;;  %v2193_v27 = vadd.f32 %v2036_v55, %v6384_v23  ;;  %vm3249_vm9 = vcmp.lt.s32.totalorder %v6681_v10, %v6441_v4  ;;  %v6711_v49 = vsel %vm1835_vm1, %v6650_v44, %v6691_v51  ;;  %v2721_v23 = vand.u32 2147483647, %v6675_v36 }
 0x361   : > { %3634 = vst [vmem:[%s5533_s9 + $0x18] sm:$0xf] %v3602_v46  ;;  %v2194_v19 = vadd.f32 %v2125_v48, %v6388_v18  ;;  %v3017_v6 = vadd.f32 %v3016_v11, %v6438_v1  ;;  %v3105_v57 = vpop.f32.mrf.mxu1  ;;  %v2889_v39 = vpack.c.bf16 %v2868_v60, %v2867_v35  ;;  %v2700_v54 = vmul.f32 %v4917_v56, %v2699_v47  ;;  %v7490_v47 = vld [vmem:[#allocation80_spill] sm:$0xff] }
 0x362   : > { %v3106_v12 = vadd.f32 %v3105_v57, %v6454_v0  ;;  %v2709_v44 = vor.u32 1.1754944e-38, %v2708_v17  ;;  %v2723_v63 = vand.u32 2147483648, %v6675_v36  ;;  %v3183_v13 = vadd.s32 56, %v6407_v53 }
 0x363   : > { %v4921_v29 = vpop.eup %4920  ;;  %v4394_v18 = vmul.f32 -1.442695, %v2194_v19  ;;  %v3347_v31 = vmul.f32 %v6591_v26, %v3017_v6  ;;  %3055 = vmatmul.bf16.gmra.mxu0 %v2889_v39  ;;  %3144 = vmatmul.bf16.gmra.mxu1 %v2889_v39  ;;  %v2701_v35 = vadd.f32 %v4917_v56, %v2700_v54  ;;  %v3411_v30 = vunpack.c.l.bf16 %v6723_v5 }
 0x364   : > { %v4923_v50 = vpop.eup %4922  ;;  %v6715_v40 = vadd.f32 1.0, %v4921_v29  ;;  %v3348_v2 = vmul.f32 %v6591_v26, %v3106_v12  ;;  %v6741_v62 = vsel %vm3249_vm9, 1.0, %v5284_v38  ;;  %vm2717_vm11 = vweird.f32 %v6675_v36 }
 0x365   : > { %v2713_v7 = vmul.f32 %v4923_v50, %v6675_v36  ;;  %4926 = vpow2.f32 %v4394_v18  ;;  %v3571_v61 = vadd.f32 %v6620_v41, %v3347_v31  ;;  %v2705_v16 = vsel %vm2704_vm10, %v4917_v56, %v2701_v35  ;;  %v6727_v33 = vpop.eup %4924  ;;  %v7489_v41 = vld [vmem:[#allocation47_spill] sm:$0xff] }
 0x366   : > { %4928 = vrcp.f32 %v6715_v40  ;;  %v3667_v26 = vpack.c.bf16 %v3348_v2, %v3348_v2  ;;  %v2710_v52 = vsel %vm6696_vm8, %v2709_v44, %v2705_v16  ;;  %vm2718_vm12 = vweird.f32 %v4923_v50 }
 0x367   : > { %v2714_v24 = vsub.f32 1.0, %v2713_v7  ;;  %v3603_v25 = vpack.c.bf16 %v3571_v61, %v3571_v61  ;;  %v2039_v21 = vpop.f32.mrf.mxu2  ;;  %v2869_v32 = vmul.f32 %v6645_v45, %v2710_v52  ;;  %4930 = vtanh.f32 %v2193_v27  ;;  %vm2719_vm14 = vmor %vm2717_vm11, %vm2718_vm12 }
 0x368   : > { %3699 = vst [vmem:[%s5533_s9 + $0x24] sm:$0xf] %v3667_v26  ;;  %v2195_v56 = vadd.f32 %v2039_v21, %v7489_v41  ;;  %v2128_v14 = vpop.f32.mrf.mxu3  ;;  %v3018_v8 = vpop.f32.mrf.mxu0  ;;  %vm6748_vm13 = vcmp.eq.f32.partialorder %v2721_v23, 8.507059e+37  ;;  %v2724_v22 = vor.u32 1.1754944e-38, %v2723_v63  ;;  %v3216_v10 = vadd.s32 %v6412_v43, %v3183_v13 }
 0x369   : > { %3635 = vst [vmem:[%s5533_s9 + $0x20] sm:$0xf] %v3603_v25  ;;  %v2196_v46 = vadd.f32 %v2128_v14, %v7490_v47  ;;  %v3019_v45 = vadd.f32 %v3018_v8, %v6438_v1  ;;  %v3107_v55 = vpop.f32.mrf.mxu1  ;;  %v2715_v60 = vmul.f32 %v4923_v50, %v2714_v24  ;;  %v6754_v39 = vrot.slane %v3411_v30, 2 }
 0x36a   : > { %v3108_v48 = vadd.f32 %v3107_v55, %v6454_v0  ;;  %4932 = vtanh.f32 %v2195_v56  ;;  %v3184_v29 = vadd.s32 64, %v6407_v53  ;;  %vm2732_vm15 = vweird.f32 %v6715_v40 }
 0x36b   : > { %v4927_v17 = vpop.eup %4926  ;;  %v4395_v19 = vmul.f32 -1.442695, %v2196_v46  ;;  %v3349_v6 = vmul.f32 %v6665_v42, %v3019_v45  ;;  %v2716_v57 = vadd.f32 %v4923_v50, %v2715_v60  ;;  %vm3250_vm0 = vcmp.lt.s32.totalorder %v3216_v10, %v6441_v4 }
 0x36c   : > { %v6756_v54 = vpop.eup %4928  ;;  %v6758_v27 = vadd.f32 1.0, %v4927_v17  ;;  %v3350_v12 = vmul.f32 %v6665_v42, %v3108_v48  ;;  %v6779_v61 = vsel %vm1835_vm1, %v6691_v51, %v6754_v39  ;;  %v6782_v16 = vadd.s32 %v6412_v43, %v3184_v29 }
 0x36d   : > { %v2728_v18 = vmul.f32 %v6756_v54, %v6715_v40  ;;  %4934 = vpow2.f32 %v4395_v19  ;;  %v3572_v31 = vadd.f32 %v6670_v58, %v3349_v6  ;;  %v2720_v35 = vsel %vm2719_vm14, %v4923_v50, %v2716_v57  ;;  %v6767_v23 = vpop.eup %4930 }
 0x36e   : > { %4936 = vrcp.f32 %v6758_v27  ;;  %v3668_v2 = vpack.c.bf16 %v3350_v12, %v3350_v12  ;;  %v2725_v42 = vsel %vm6748_vm13, %v2724_v22, %v2720_v35  ;;  %v3412_v26 = vunpack.c.h.bf16 %v6723_v5 }
 0x36f   : > { %v2729_v36 = vsub.f32 1.0, %v2728_v18  ;;  %v3604_v44 = vpack.c.bf16 %v3572_v31, %v3572_v31  ;;  %v2041_v63 = vpop.f32.mrf.mxu2  ;;  %v2870_v7 = vmul.f32 %v6686_v15, %v2725_v42  ;;  %vm2733_vm2 = vweird.f32 %v6756_v54  ;;  %v7495_v31 = vld [vmem:[#allocation52_spill] sm:$0xff] }
 0x370   : > { %3700 = vst [vmem:[%s5533_s9 + $0x2c] sm:$0xf] %v3668_v2  ;;  %v2130_v58 = vpop.f32.mrf.mxu3  ;;  %v3021_v50 = vpop.f32.mrf.mxu0  ;;  %v6793_v51 = vadd.f32 %v2041_v63, %v6392_v28  ;;  %v4472_v5 = vsel %vm3250_vm0, 1.0, %v5284_v38  ;;  %v2736_v41 = vand.u32 2147483647, %v6715_v40  ;;  %v2738_v28 = vand.u32 2147483648, %v6715_v40  ;;  %vm6812_vm3 = vmor %vm2732_vm15, %vm2733_vm2 }
 0x371   : > { %3636 = vst [vmem:[%s5533_s9 + $0x28] sm:$0xf] %v3604_v44  ;;  %v2198_v15 = vadd.f32 %v2130_v58, %v6396_v37  ;;  %v3022_v52 = vadd.f32 %v3021_v50, %v6438_v1  ;;  %v3110_v13 = vpop.f32.mrf.mxu1  ;;  %v2890_v24 = vpack.c.bf16 %v2870_v7, %v2869_v32  ;;  %v2730_v25 = vmul.f32 %v6756_v54, %v2729_v36  ;;  %v6790_v21 = vpop.eup %4932  ;;  %v6825_v40 = vld [vmem:[%s5506_s24 + $0x28] sm:$0xff]  }
 0x372   : > { %v3111_v30 = vadd.f32 %v3110_v13, %v6454_v0  ;;  %v6806_v45 = vrot.slane %v3412_v26, 2  ;;  %v2751_v60 = vand.u32 2147483647, %v6758_v27  ;;  %vm3251_vm4 = vcmp.lt.s32.totalorder %v6782_v16, %v6441_v4  ;;  %v7498_v63 = vld [vmem:[#allocation51_spill] sm:$0xff] }
 0x373   : > { %v4935_v37 = vpop.eup %4934  ;;  %v4396_v56 = vmul.f32 -1.442695, %v2198_v15  ;;  %v3351_v14 = vmul.f32 %v6741_v62, %v3022_v52  ;;  %3060 = vmatmul.bf16.gmra.mxu0 %v2890_v24  ;;  %3149 = vmatmul.bf16.gmra.mxu1 %v2890_v24  ;;  %v2731_v32 = vadd.f32 %v6756_v54, %v2730_v25  ;;  %vm2737_vm5 = vcmp.eq.f32.partialorder %v2736_v41, 8.507059e+37 }
 0x374   : > { %v4937_v8 = vpop.eup %4936  ;;  %v6803_v47 = vadd.f32 1.0, %v4935_v37  ;;  %v3352_v46 = vmul.f32 %v6741_v62, %v3111_v30  ;;  %v2739_v10 = vor.u32 1.1754944e-38, %v2738_v28  ;;  %vm2747_vm6 = vweird.f32 %v6758_v27 }
 0x375   : > { %v2743_v48 = vmul.f32 %v4937_v8, %v6758_v27  ;;  %4938 = vpow2.f32 %v4396_v56  ;;  %v3573_v11 = vadd.f32 %v6711_v49, %v3351_v14  ;;  %v2735_v62 = vsel %vm6812_vm3, %v6756_v54, %v2731_v32 }
 0x376   : > { %4940 = vrcp.f32 %v6803_v47  ;;  %v3669_v22 = vpack.c.bf16 %v3352_v46, %v3352_v46  ;;  %v2753_v49 = vand.u32 2147483648, %v6758_v27  ;;  %v2740_v29 = vsel %vm2737_vm5, %v2739_v10, %v2735_v62 }
 0x377   : > { %v2744_v17 = vsub.f32 1.0, %v2743_v48  ;;  %v3605_v19 = vpack.c.bf16 %v3573_v11, %v3573_v11  ;;  %v2044_v6 = vpop.f32.mrf.mxu2  ;;  %vm2748_vm7 = vweird.f32 %v4937_v8  ;;  %v3185_v54 = vadd.s32 72, %v6407_v53 }
 0x378   : > { %3701 = vst [vmem:[%s5533_s9 + $0x34] sm:$0xf] %v3669_v22  ;;  %v2133_v57 = vpop.f32.mrf.mxu3  ;;  %v3023_v12 = vpop.f32.mrf.mxu0  ;;  %v3413_v18 = vunpack.c.l.bf16 %v6825_v40  ;;  %vm6836_vm8 = vcmp.eq.f32.partialorder %v2751_v60, 8.507059e+37  ;;  %v2199_v7 = vadd.f32 %v2044_v6, %v7498_v63  ;;  %v2871_v50 = vmul.f32 %v6727_v33, %v2740_v29  ;;  %vm2749_vm9 = vmor %vm2747_vm6, %vm2748_vm7 }
 0x379   : > { %3637 = vst [vmem:[%s5533_s9 + $0x30] sm:$0xf] %v3605_v19  ;;  %v2200_v35 = vadd.f32 %v2133_v57, %v7495_v31  ;;  %v3024_v2 = vadd.f32 %v3023_v12, %v6438_v1  ;;  %v3112_v42 = vpop.f32.mrf.mxu1  ;;  %v2745_v36 = vmul.f32 %v4937_v8, %v2744_v17  ;;  %v3218_v26 = vadd.s32 %v6412_v43, %v3185_v54 }
 0x37a   : > { %v3113_v58 = vadd.f32 %v3112_v42, %v6454_v0  ;;  %v2754_v25 = vor.u32 1.1754944e-38, %v2753_v49  ;;  %v6852_v33 = vrot.slane %v3413_v18, 2  ;;  %v3186_v28 = vadd.s32 80, %v6407_v53 }
 0x37b   : > { %v4939_v15 = vpop.eup %4938  ;;  %v4397_v52 = vmul.f32 -1.442695, %v2200_v35  ;;  %v3353_v13 = vmul.f32 %v4472_v5, %v3024_v2  ;;  %v2746_v24 = vadd.f32 %v4937_v8, %v2745_v36  ;;  %vm3252_vm10 = vcmp.lt.s32.totalorder %v3218_v26, %v6441_v4 }
 0x37c   : > { %v6844_v30 = vpop.eup %4940  ;;  %v6846_v41 = vadd.f32 1.0, %v4939_v15  ;;  %v3354_v37 = vmul.f32 %v4472_v5, %v3113_v58  ;;  %v4473_v11 = vsel %vm3251_vm4, 1.0, %v5284_v38  ;;  %v3488_v62 = vsel %vm1835_vm1, %v6754_v39, %v6806_v45 }
 0x37d   : > { %v2758_v56 = vmul.f32 %v6844_v30, %v6803_v47  ;;  %4942 = vpow2.f32 %v4397_v52  ;;  %v3574_v14 = vadd.f32 %v6779_v61, %v3353_v13  ;;  %v2750_v32 = vsel %vm2749_vm9, %v4937_v8, %v2746_v24 }
 0x37e   : > { %4944 = vrcp.f32 %v6846_v41  ;;  %v3670_v5 = vpack.c.bf16 %v3354_v37, %v3354_v37  ;;  %v2755_v27 = vsel %vm6836_vm8, %v2754_v25, %v2750_v32  ;;  %v3490_v39 = vsel %vm1835_vm1, %v6806_v45, %v6852_v33 }
 0x37f   : > { %v2759_v46 = vsub.f32 1.0, %v2758_v56  ;;  %4946 = vtanh.f32 %v6793_v51  ;;  %v3606_v55 = vpack.c.bf16 %v3574_v14, %v3574_v14  ;;  %v2046_v60 = vpop.f32.mrf.mxu2  ;;  %v2872_v48 = vmul.f32 %v6767_v23, %v2755_v27 }
 0x380   : > { %4948 = vtanh.f32 %v2199_v7  ;;  %3702 = vst [vmem:[%s5533_s9 + $0x3c] sm:$0xf] %v3670_v5  ;;  %v2135_v61 = vpop.f32.mrf.mxu3  ;;  %v3026_v8 = vpop.f32.mrf.mxu0  ;;  %v4474_v51 = vsel %vm3252_vm10, 1.0, %v5284_v38  ;;  %v6879_v16 = vadd.f32 %v2046_v60, %v6421_v9  ;;  %v6886_v49 = vadd.s32 %v6412_v43, %v3186_v28 }
 0x381   : > { %3638 = vst [vmem:[%s5533_s9 + $0x38] sm:$0xf] %v3606_v55  ;;  %v2202_v23 = vadd.f32 %v2135_v61, %v6425_v34  ;;  %v3027_v22 = vadd.f32 %v3026_v8, %v6438_v1  ;;  %v3115_v10 = vpop.f32.mrf.mxu1  ;;  %v2891_v17 = vpack.c.bf16 %v2872_v48, %v2871_v50  ;;  %v2760_v19 = vmul.f32 %v6844_v30, %v2759_v46 }
 0x382   : > { %v3116_v6 = vadd.f32 %v3115_v10, %v6454_v0  ;;  %v3414_v29 = vunpack.c.h.bf16 %v6825_v40  ;;  %vm2762_vm11 = vweird.f32 %v6803_v47  ;;  %vm2763_vm12 = vweird.f32 %v6844_v30 }
 0x383   : > { %v4943_v57 = vpop.eup %4942  ;;  %v4398_v34 = vmul.f32 -1.442695, %v2202_v23  ;;  %v3355_v12 = vmul.f32 %v4473_v11, %v3027_v22  ;;  %3065 = vmatmul.bf16.gmra.mxu0 %v2891_v17  ;;  %3154 = vmatmul.bf16.gmra.mxu1 %v2891_v17  ;;  %v2761_v54 = vadd.f32 %v6844_v30, %v2760_v19  ;;  %v2766_v42 = vand.u32 2147483647, %v6803_v47  ;;  %vm6901_vm14 = vmor %vm2762_vm11, %vm2763_vm12 }
 0x384   : > { %v4945_v9 = vpop.eup %4944  ;;  %v6890_v18 = vadd.f32 1.0, %v4943_v57  ;;  %v3356_v31 = vmul.f32 %v4473_v11, %v3116_v6  ;;  %vm3253_vm13 = vcmp.lt.s32.totalorder %v6886_v49, %v6441_v4  ;;  %v2768_v63 = vand.u32 2147483648, %v6803_v47  ;;  %v6930_v11 = vld [vmem:[%s5506_s24 + $0x30] sm:$0xff]  }
 0x385   : > { %v4947_v45 = vpop.eup %4946  ;;  %v2773_v35 = vmul.f32 %v4945_v9, %v6846_v41  ;;  %4950 = vpow2.f32 %v4398_v34  ;;  %v3575_v2 = vadd.f32 %v3488_v62, %v3355_v12  ;;  %v6906_v50 = vrot.slane %v3414_v29, 2  ;;  %v7503_v12 = vld [vmem:[#allocation58_spill] sm:$0xff] }
 0x386   : > { %v6896_v36 = vpop.eup %4948  ;;  %4952 = vrcp.f32 %v6890_v18  ;;  %v3671_v40 = vpack.c.bf16 %v3356_v31, %v3356_v31  ;;  %v2765_v26 = vsel %vm6901_vm14, %v6844_v30, %v2761_v54  ;;  %vm2767_vm15 = vcmp.eq.f32.partialorder %v2766_v42, 8.507059e+37 }
 0x387   : > { %v2774_v7 = vsub.f32 1.0, %v2773_v35  ;;  %v3607_v58 = vpack.c.bf16 %v3575_v2, %v3575_v2  ;;  %v2769_v13 = vor.u32 1.1754944e-38, %v2768_v63  ;;  %vm2778_vm0 = vweird.f32 %v4945_v9  ;;  %v2049_v19 = vpop.f32.mrf.mxu2  ;;  %v7504_v63 = vld [vmem:[#allocation57_spill] sm:$0xff] }
 0x388   : > { %3703 = vst [vmem:[%s5533_s9 + $0x44] sm:$0xf] %v3671_v40  ;;  %v2138_v15 = vpop.f32.mrf.mxu3  ;;  %v3028_v52 = vpop.f32.mrf.mxu0  ;;  %v2781_v24 = vand.u32 2147483647, %v6846_v41  ;;  %v2783_v14 = vand.u32 2147483648, %v6846_v41  ;;  %vm2777_vm2 = vweird.f32 %v6846_v41  ;;  %v3187_v41 = vadd.s32 88, %v6407_v53 }
 0x389   : > { %3639 = vst [vmem:[%s5533_s9 + $0x40] sm:$0xf] %v3607_v58  ;;  %v2204_v25 = vadd.f32 %v2138_v15, %v6126_v59  ;;  %v3029_v47 = vadd.f32 %v3028_v52, %v6438_v1  ;;  %v3117_v37 = vpop.f32.mrf.mxu1  ;;  %v2775_v56 = vmul.f32 %v4945_v9, %v2774_v7  ;;  %v2770_v32 = vsel %vm2767_vm15, %v2769_v13, %v2765_v26  ;;  %vm2779_vm4 = vmor %vm2777_vm2, %vm2778_vm0 }
 0x38a   : > { %v3118_v30 = vadd.f32 %v3117_v37, %v6454_v0  ;;  %vm6919_vm3 = vcmp.eq.f32.partialorder %v2781_v24, 8.507059e+37  ;;  %v2784_v55 = vor.u32 1.1754944e-38, %v2783_v14  ;;  %v2873_v8 = vmul.f32 %v6790_v21, %v2770_v32 }
 0x38b   : > { %v4951_v27 = vpop.eup %4950  ;;  %v4399_v28 = vmul.f32 -1.442695, %v2204_v25  ;;  %v3357_v46 = vmul.f32 %v4474_v51, %v3029_v47  ;;  %v2776_v59 = vadd.f32 %v4945_v9, %v2775_v56  ;;  %v3220_v21 = vadd.s32 %v6412_v43, %v3187_v41 }
 0x38c   : > { %v6923_v60 = vpop.eup %4952  ;;  %v6925_v48 = vadd.f32 1.0, %v4951_v27  ;;  %v3358_v61 = vmul.f32 %v4474_v51, %v3118_v30  ;;  %v3415_v34 = vunpack.c.l.bf16 %v6930_v11  ;;  %v6942_v29 = vadd.f32 %v6486_v20, %v7503_v12 }
 0x38d   : > { %v2788_v62 = vmul.f32 %v6923_v60, %v6890_v18  ;;  %4954 = vpow2.f32 %v4399_v28  ;;  %v3576_v23 = vadd.f32 %v3490_v39, %v3357_v46  ;;  %v2780_v22 = vsel %vm2779_vm4, %v4945_v9, %v2776_v59 }
 0x38e   : > { %4956 = vrcp.f32 %v6925_v48  ;;  %v3672_v10 = vpack.c.bf16 %v3358_v61, %v3358_v61  ;;  %v2785_v51 = vsel %vm6919_vm3, %v2784_v55, %v2780_v22  ;;  %v4475_v9 = vsel %vm3253_vm13, 1.0, %v5284_v38 }
 0x38f   : > { %v2789_v17 = vsub.f32 1.0, %v2788_v62  ;;  %v3608_v6 = vpack.c.bf16 %v3576_v23, %v3576_v23  ;;  %v2874_v57 = vmul.f32 %v4947_v45, %v2785_v51  ;;  %4958 = vtanh.f32 %v6879_v16 }
 0x390   : > { %3704 = vst [vmem:[%s5533_s9 + $0x4c] sm:$0xf] %v3672_v10  ;;  %v2140_v39 = vpop.f32.mrf.mxu3  ;;  %v3031_v54 = vpop.f32.mrf.mxu0  ;;  %v3188_v31 = vadd.s32 96, %v6407_v53  ;;  %vm3254_vm5 = vcmp.lt.s32.totalorder %v3220_v21, %v6441_v4  ;;  %v3492_v16 = vsel %vm1835_vm1, %v6852_v33, %v6906_v50  ;;  %v6959_v40 = vrot.slane %v3415_v34, 2 }
 0x391   : > { %3640 = vst [vmem:[%s5533_s9 + $0x48] sm:$0xf] %v3608_v6  ;;  %v2206_v45 = vadd.f32 %v2140_v39, %v6428_v3  ;;  %v3032_v35 = vadd.f32 %v3031_v54, %v6438_v1  ;;  %v3120_v2 = vpop.f32.mrf.mxu1  ;;  %v2892_v20 = vpack.c.bf16 %v2874_v57, %v2873_v8  ;;  %v6965_v3 = vadd.f32 %v2049_v19, %v7504_v63 }
 0x392   : > { %v3121_v42 = vadd.f32 %v3120_v2, %v6454_v0  ;;  %v6962_v49 = vadd.s32 %v6412_v43, %v3188_v31  ;;  %v2790_v26 = vmul.f32 %v6923_v60, %v2789_v17  ;;  %v4476_v13 = vsel %vm3254_vm5, 1.0, %v5284_v38 }
 0x393   : > { %v4955_v44 = vpop.eup %4954  ;;  %v4400_v7 = vmul.f32 -1.442695, %v2206_v45  ;;  %v3359_v58 = vmul.f32 %v4475_v9, %v3032_v35  ;;  %3070 = vmatmul.bf16.gmra.mxu0 %v2892_v20  ;;  %3159 = vmatmul.bf16.gmra.mxu1 %v2892_v20  ;;  %v3416_v24 = vunpack.c.h.bf16 %v6930_v11  ;;  %v3494_v37 = vsel %vm1835_vm1, %v6906_v50, %v6959_v40 }
 0x394   : > { %v4957_v15 = vpop.eup %4956  ;;  %v6968_v52 = vadd.f32 1.0, %v4955_v44  ;;  %v3360_v33 = vmul.f32 %v4475_v9, %v3121_v42  ;;  %vm3255_vm6 = vcmp.lt.s32.totalorder %v6962_v49, %v6441_v4  ;;  %v2791_v30 = vadd.f32 %v6923_v60, %v2790_v26  ;;  %v2051_v9 = vpop.f32.mrf.mxu2 }
 0x395   : > { %v2803_v25 = vmul.f32 %v4957_v15, %v6925_v48  ;;  %4960 = vpow2.f32 %v4400_v7  ;;  %v3577_v47 = vadd.f32 %v3492_v16, %v3359_v58  ;;  %v4959_v56 = vpop.eup %4958  ;;  %vm2792_vm7 = vweird.f32 %v6890_v18  ;;  %v7017_v16 = vld [vmem:[%s5506_s24 + $0x38] sm:$0xff]  }
 0x396   : > { %4962 = vrcp.f32 %v6968_v52  ;;  %v3673_v14 = vpack.c.bf16 %v3360_v33, %v3360_v33  ;;  %vm2793_vm8 = vweird.f32 %v6923_v60  ;;  %v2796_v28 = vand.u32 2147483647, %v6890_v18 }
 0x397   : > { %v2804_v32 = vsub.f32 1.0, %v2803_v25  ;;  %v3609_v5 = vpack.c.bf16 %v3577_v47, %v3577_v47  ;;  %vm6983_vm9 = vmor %vm2792_vm7, %vm2793_vm8  ;;  %v2798_v46 = vand.u32 2147483648, %v6890_v18  ;;  %vm2807_vm10 = vweird.f32 %v6925_v48 }
 0x398   : > { %3705 = vst [vmem:[%s5533_s9 + $0x54] sm:$0xf] %v3673_v14  ;;  %v3033_v27 = vpop.f32.mrf.mxu0  ;;  %vm2808_vm11 = vweird.f32 %v4957_v15  ;;  %v2795_v61 = vsel %vm6983_vm9, %v6923_v60, %v2791_v30  ;;  %v2811_v11 = vand.u32 2147483647, %v6925_v48  ;;  %vm2797_vm12 = vcmp.eq.f32.partialorder %v2796_v28, 8.507059e+37 }
 0x399   : > { %3641 = vst [vmem:[%s5533_s9 + $0x50] sm:$0xf] %v3609_v5  ;;  %v3034_v59 = vadd.f32 %v3033_v27, %v6438_v1  ;;  %v3122_v55 = vpop.f32.mrf.mxu1  ;;  %v2805_v8 = vmul.f32 %v4957_v15, %v2804_v32  ;;  %v2799_v62 = vor.u32 1.1754944e-38, %v2798_v46  ;;  %v2813_v18 = vand.u32 2147483648, %v6925_v48  ;;  %vm2809_vm14 = vmor %vm2807_vm10, %vm2808_vm11 }
 0x39a   : > { %v3123_v41 = vadd.f32 %v3122_v55, %v6454_v0  ;;  %vm6998_vm13 = vcmp.eq.f32.partialorder %v2811_v11, 8.507059e+37  ;;  %v3189_v21 = vadd.s32 104, %v6407_v53  ;;  %v3495_v45 = vrot.slane %v3416_v24, 2 }
 0x39b   : > { %v4961_v23 = vpop.eup %4960  ;;  %v3361_v22 = vmul.f32 %v4476_v13, %v3034_v59  ;;  %v2806_v10 = vadd.f32 %v4957_v15, %v2805_v8  ;;  %v2800_v6 = vsel %vm2797_vm12, %v2799_v62, %v2795_v61  ;;  %v2814_v57 = vor.u32 1.1754944e-38, %v2813_v18 }
 0x39c   : > { %v7003_v17 = vpop.eup %4962  ;;  %v7005_v60 = vadd.f32 1.0, %v4961_v23  ;;  %v3362_v19 = vmul.f32 %v4476_v13, %v3123_v41  ;;  %v2875_v54 = vmul.f32 %v6896_v36, %v2800_v6  ;;  %v3222_v42 = vadd.s32 %v6412_v43, %v3189_v21 }
 0x39d   : > { %v2818_v34 = vmul.f32 %v7003_v17, %v6968_v52  ;;  %v3578_v12 = vadd.f32 %v3494_v37, %v3361_v22  ;;  %v2810_v39 = vsel %vm2809_vm14, %v4957_v15, %v2806_v10  ;;  %v4477_v36 = vsel %vm3255_vm6, 1.0, %v5284_v38 }
 0x39e   : > { %4964 = vrcp.f32 %v7005_v60  ;;  %v3674_v31 = vpack.c.bf16 %v3362_v19, %v3362_v19  ;;  %v2815_v35 = vsel %vm6998_vm13, %v2814_v57, %v2810_v39  ;;  %v2205_v63 = vadd.f32 %v2051_v9, %v6942_v29 }
 0x39f   : > { %v2819_v48 = vsub.f32 1.0, %v2818_v34  ;;  %v3610_v2 = vpack.c.bf16 %v3578_v12, %v3578_v12  ;;  %v2876_v20 = vmul.f32 %v4959_v56, %v2815_v35  ;;  %v3496_v15 = vsel %vm1835_vm1, %v6959_v40, %v3495_v45 }
 0x3a0   : > { %3706 = vst [vmem:[%s5533_s9 + $0x5c] sm:$0xf] %v3674_v31  ;;  %v3036_v44 = vpop.f32.mrf.mxu0  ;;  %v3417_v13 = vunpack.c.l.bf16 %v7017_v16  ;;  %4966 = vtanh.f32 %v6965_v3  ;;  %vm3256_vm15 = vcmp.lt.s32.totalorder %v3222_v42, %v6441_v4  ;;  %vm2823_vm0 = vweird.f32 %v7003_v17 }
 0x3a1   : > { %3642 = vst [vmem:[%s5533_s9 + $0x58] sm:$0xf] %v3610_v2  ;;  %v3037_v7 = vadd.f32 %v3036_v44, %v6438_v1  ;;  %v3125_v58 = vpop.f32.mrf.mxu1  ;;  %v2893_v26 = vpack.c.bf16 %v2876_v20, %v2875_v54  ;;  %v2820_v24 = vmul.f32 %v7003_v17, %v2819_v48  ;;  %v3190_v40 = vadd.s32 112, %v6407_v53  ;;  %v1321_v48 = vld [vmem:[%s5506_s24 + $0x40] sm:$0xff]  }
 0x3a2   : > { %v3126_v33 = vadd.f32 %v3125_v58, %v6454_v0  ;;  %v2826_v37 = vand.u32 2147483647, %v6968_v52  ;;  %vm2822_vm2 = vweird.f32 %v6968_v52  ;;  %4968 = vtanh.f32 %v2205_v63 }
 0x3a3   : > { %v3363_v49 = vmul.f32 %v4477_v36, %v3037_v7  ;;  %3075 = vmatmul.bf16.gmra.mxu0 %v2893_v26  ;;  %3164 = vmatmul.bf16.gmra.mxu1 %v2893_v26  ;;  %v2821_v47 = vadd.f32 %v7003_v17, %v2820_v24  ;;  %v3497_v30 = vrot.slane %v3417_v13, 2  ;;  %vm7041_vm3 = vmor %vm2822_vm2, %vm2823_vm0  ;;  %v2828_v5 = vand.u32 2147483648, %v6968_v52 }
 0x3a4   : > { %v4965_v29 = vpop.eup %4964  ;;  %v3364_v25 = vmul.f32 %v4477_v36, %v3126_v33  ;;  %v4478_v28 = vsel %vm3256_vm15, 1.0, %v5284_v38  ;;  %v3223_v55 = vadd.s32 %v6412_v43, %v3190_v40  ;;  %vm2827_vm4 = vcmp.eq.f32.partialorder %v2826_v37, 8.507059e+37 }
 0x3a5   : > { %v2833_v56 = vmul.f32 %v4965_v29, %v7005_v60  ;;  %v3579_v14 = vadd.f32 %v3496_v15, %v3363_v49  ;;  %v2825_v46 = vsel %vm7041_vm3, %v7003_v17, %v2821_v47  ;;  %v2829_v61 = vor.u32 1.1754944e-38, %v2828_v5 }
 0x3a6   : > { %v3675_v3 = vpack.c.bf16 %v3364_v25, %v3364_v25  ;;  %v2843_v8 = vand.u32 2147483648, %v7005_v60  ;;  %v4967_v11 = vpop.eup %4966  ;;  %vm2838_vm5 = vweird.f32 %v4965_v29  ;;  %v2841_v18 = vand.u32 2147483647, %v7005_v60 }
 0x3a7   : > { %v2834_v27 = vsub.f32 1.0, %v2833_v56  ;;  %v3611_v50 = vpack.c.bf16 %v3579_v14, %v3579_v14  ;;  %v3498_v23 = vsel %vm1835_vm1, %v3495_v45, %v3497_v30  ;;  %v3418_v10 = vunpack.c.h.bf16 %v7017_v16 }
 0x3a8   : > { %3707 = vst [vmem:[%s5533_s9 + $0x64] sm:$0xf] %v3675_v3  ;;  %v3038_v59 = vpop.f32.mrf.mxu0  ;;  %v2830_v51 = vsel %vm2827_vm4, %v2829_v61, %v2825_v46  ;;  %vm2837_vm6 = vweird.f32 %v7005_v60  ;;  %v4969_v6 = vpop.eup %4968  ;;  %vm3257_vm7 = vcmp.lt.s32.totalorder %v3223_v55, %v6441_v4  ;;  %v2844_v34 = vor.u32 1.1754944e-38, %v2843_v8  ;;  %v1323_v55 = vld [vmem:[%s5506_s24 + $0x48] sm:$0xff]  }
 0x3a9   : > { %3643 = vst [vmem:[%s5533_s9 + $0x60] sm:$0xf] %v3611_v50  ;;  %v3039_v52 = vadd.f32 %v3038_v59, %v6438_v1  ;;  %v3127_v41 = vpop.f32.mrf.mxu1  ;;  %v2835_v62 = vmul.f32 %v4965_v29, %v2834_v27  ;;  %v2877_v19 = vmul.f32 %v4967_v11, %v2830_v51  ;;  %vm2839_vm8 = vmor %vm2837_vm6, %vm2838_vm5  ;;  %vm2842_vm9 = vcmp.eq.f32.partialorder %v2841_v18, 8.507059e+37 }
 0x3aa   : > { %v3128_v22 = vadd.f32 %v3127_v41, %v6454_v0  ;;  %v3191_v54 = vadd.s32 120, %v6407_v53  ;;  %v3499_v31 = vrot.slane %v3418_v10, 2  ;;  %v4479_v20 = vsel %vm3257_vm7, 1.0, %v5284_v38 }
 0x3ab   : > { %v3365_v21 = vmul.f32 %v4478_v28, %v3039_v52  ;;  %v2836_v17 = vadd.f32 %v4965_v29, %v2835_v62  ;;  %v3419_v58 = vunpack.c.l.bf16 %v1321_v48  ;;  %v3192_v13 = vadd.s32 128, %v6407_v53 }
 0x3ac   : > { %v3366_v57 = vmul.f32 %v4478_v28, %v3128_v22  ;;  %v3224_v36 = vadd.s32 %v6412_v43, %v3191_v54  ;;  %v3500_v63 = vsel %vm1835_vm1, %v3497_v30, %v3499_v31  ;;  %v3420_v30 = vunpack.c.h.bf16 %v1321_v48 }
 0x3ad   : > { %v3580_v12 = vadd.f32 %v3498_v23, %v3365_v21  ;;  %v2840_v39 = vsel %vm2839_vm8, %v4965_v29, %v2836_v17  ;;  %v3501_v49 = vrot.slane %v3419_v58, 2  ;;  %v3225_v56 = vadd.s32 %v6412_v43, %v3192_v13 }
 0x3ae   : > { %v3676_v9 = vpack.c.bf16 %v3366_v57, %v3366_v57  ;;  %v2845_v45 = vsel %vm2842_vm9, %v2844_v34, %v2840_v39  ;;  %vm3258_vm10 = vcmp.lt.s32.totalorder %v3224_v36, %v6441_v4  ;;  %v3193_v50 = vadd.s32 136, %v6407_v53 }
 0x3af   : > { %v3612_v35 = vpack.c.bf16 %v3580_v12, %v3580_v12  ;;  %v2878_v60 = vmul.f32 %v4969_v6, %v2845_v45  ;;  %v4480_v40 = vsel %vm3258_vm10, 1.0, %v5284_v38  ;;  %v3502_v14 = vsel %vm1835_vm1, %v3499_v31, %v3501_v49 }
 0x3b0   : > { %3708 = vst [vmem:[%s5533_s9 + $0x6c] sm:$0xf] %v3676_v9  ;;  %v3041_v2 = vpop.f32.mrf.mxu0  ;;  %vm3259_vm11 = vcmp.lt.s32.totalorder %v3225_v56, %v6441_v4  ;;  %v3503_v46 = vrot.slane %v3420_v30, 2  ;;  %v3226_v41 = vadd.s32 %v6412_v43, %v3193_v50  ;;  %v3421_v23 = vunpack.c.l.bf16 %v1323_v55 }
 0x3b1   : > { %3644 = vst [vmem:[%s5533_s9 + $0x68] sm:$0xf] %v3612_v35  ;;  %v3042_v16 = vadd.f32 %v3041_v2, %v6438_v1  ;;  %v3130_v42 = vpop.f32.mrf.mxu1  ;;  %v2894_v44 = vpack.c.bf16 %v2878_v60, %v2877_v19  ;;  %v4481_v8 = vsel %vm3259_vm11, 1.0, %v5284_v38  ;;  %v3194_v21 = vadd.s32 144, %v6407_v53 }
 0x3b2   : > { %v3131_v7 = vadd.f32 %v3130_v42, %v6454_v0  ;;  %v3504_v62 = vsel %vm1835_vm1, %v3501_v49, %v3503_v46  ;;  %vm3260_vm12 = vcmp.lt.s32.totalorder %v3226_v41, %v6441_v4  ;;  %v3505_v19 = vrot.slane %v3421_v23, 2 }
 0x3b3   : > { %v3367_v26 = vmul.f32 %v4479_v20, %v3042_v16  ;;  %3080 = vmatmul.bf16.gmra.mxu0 %v2894_v44  ;;  %3169 = vmatmul.bf16.gmra.mxu1 %v2894_v44  ;;  %v4482_v34 = vsel %vm3260_vm12, 1.0, %v5284_v38  ;;  %v3227_v54 = vadd.s32 %v6412_v43, %v3194_v21  ;;  %v3422_v45 = vunpack.c.h.bf16 %v1323_v55  ;;  %v1325_v44 = vld [vmem:[%s5506_s24 + $0x50] sm:$0xff]  }
 0x3b4   : > { %v3368_v15 = vmul.f32 %v4479_v20, %v3131_v7  ;;  %v3506_v9 = vsel %vm1835_vm1, %v3503_v46, %v3505_v19  ;;  %v3195_v2 = vadd.s32 152, %v6407_v53  ;;  %v3423_v13 = vunpack.c.l.bf16 %v1325_v44 }
 0x3b5   : > { %v3581_v33 = vadd.f32 %v3500_v63, %v3367_v26  ;;  %vm3261_vm13 = vcmp.lt.s32.totalorder %v3227_v54, %v6441_v4  ;;  %v3507_v16 = vrot.slane %v3422_v45, 2  ;;  %v3424_v50 = vunpack.c.h.bf16 %v1325_v44 }
 0x3b6   : > { %v3677_v24 = vpack.c.bf16 %v3368_v15, %v3368_v15  ;;  %v4483_v63 = vsel %vm3261_vm13, 1.0, %v5284_v38  ;;  %v3228_v26 = vadd.s32 %v6412_v43, %v3195_v2  ;;  %v3197_v55 = vadd.s32 168, %v6407_v53 }
 0x3b7   : > { %v3613_v29 = vpack.c.bf16 %v3581_v33, %v3581_v33  ;;  %v3508_v15 = vsel %vm1835_vm1, %v3505_v19, %v3507_v16  ;;  %v3199_v44 = vadd.s32 184, %v6407_v53 }
 0x3b8   : > { %3709 = vst [vmem:[%s5533_s9 + $0x74] sm:$0xf] %v3677_v24  ;;  %v3043_v25 = vpop.f32.mrf.mxu0  ;;  %vm3262_vm14 = vcmp.lt.s32.totalorder %v3228_v26, %v6441_v4 }
 0x3b9   : > { %3645 = vst [vmem:[%s5533_s9 + $0x70] sm:$0xf] %v3613_v29  ;;  %v3044_v47 = vadd.f32 %v3043_v25, %v6438_v1  ;;  %v3132_v37 = vpop.f32.mrf.mxu1  ;;  %v3196_v25 = vadd.s32 160, %v6407_v53 }
 0x3ba   : > { %v3133_v3 = vadd.f32 %v3132_v37, %v6454_v0 }
 0x3bb   : > { %v3369_v32 = vmul.f32 %v4480_v40, %v3044_v47  ;;  %v3509_v47 = vrot.slane %v3423_v13, 2 }
 0x3bc   : > { %v3370_v5 = vmul.f32 %v4480_v40, %v3133_v3 }
 0x3bd   : > { %v3582_v27 = vadd.f32 %v3502_v14, %v3369_v32  ;;  %v4484_v14 = vsel %vm3262_vm14, 1.0, %v5284_v38  ;;  %v3229_v32 = vadd.s32 %v6412_v43, %v3196_v25 }
 0x3be   : > { %v3678_v28 = vpack.c.bf16 %v3370_v5, %v3370_v5  ;;  %v3510_v5 = vsel %vm1835_vm1, %v3507_v16, %v3509_v47 }
 0x3bf   : > { %v3614_v59 = vpack.c.bf16 %v3582_v27, %v3582_v27  ;;  %vm3263_vm15 = vcmp.lt.s32.totalorder %v3229_v32, %v6441_v4 }
 0x3c0   : > { %3710 = vst [vmem:[%s5533_s9 + $0x7c] sm:$0xf] %v3678_v28  ;;  %v3046_v61 = vpop.f32.mrf.mxu0 }
 0x3c1   : > { %3646 = vst [vmem:[%s5533_s9 + $0x78] sm:$0xf] %v3614_v59  ;;  %v3047_v11 = vadd.f32 %v3046_v61, %v6438_v1  ;;  %v3135_v52 = vpop.f32.mrf.mxu1 }
 0x3c2   : > { %v3136_v18 = vadd.f32 %v3135_v52, %v6454_v0  ;;  %v1327_v52 = vld [vmem:[%s5506_s24 + $0x58] sm:$0xff]  }
 0x3c3   : > { %v3371_v22 = vmul.f32 %v4481_v8, %v3047_v11  ;;  %v3425_v21 = vunpack.c.l.bf16 %v1327_v52  ;;  %v3426_v2 = vunpack.c.h.bf16 %v1327_v52  ;;  %v3201_v52 = vadd.s32 200, %v6407_v53 }
 0x3c4   : > { %v3372_v10 = vmul.f32 %v4481_v8, %v3136_v18  ;;  %v3511_v8 = vrot.slane %v3424_v50, 2 }
 0x3c5   : > { %v3583_v51 = vadd.f32 %v3504_v62, %v3371_v22  ;;  %v4485_v62 = vsel %vm3263_vm15, 1.0, %v5284_v38  ;;  %v3230_v22 = vadd.s32 %v6412_v43, %v3197_v55 }
 0x3c6   : > { %v3679_v17 = vpack.c.bf16 %v3372_v10, %v3372_v10  ;;  %v3512_v10 = vsel %vm1835_vm1, %v3509_v47, %v3511_v8 }
 0x3c7   : > { %v3615_v6 = vpack.c.bf16 %v3583_v51, %v3583_v51  ;;  %vm3264_vm0 = vcmp.lt.s32.totalorder %v3230_v22, %v6441_v4 }
 0x3c8   : > { %3711 = vst [vmem:[%s5533_s9 + $0x84] sm:$0xf] %v3679_v17  ;;  %v3048_v57 = vpop.f32.mrf.mxu0 }
 0x3c9   : > { %3647 = vst [vmem:[%s5533_s9 + $0x80] sm:$0xf] %v3615_v6  ;;  %v3049_v12 = vadd.f32 %v3048_v57, %v6438_v1  ;;  %v3137_v39 = vpop.f32.mrf.mxu1  ;;  %v3198_v57 = vadd.s32 176, %v6407_v53 }
 0x3ca   : > { %v3138_v31 = vadd.f32 %v3137_v39, %v6454_v0 }
 0x3cb   : > { %v3373_v35 = vmul.f32 %v4482_v34, %v3049_v12  ;;  %v3513_v12 = vrot.slane %v3425_v21, 2 }
 0x3cc   : > { %v3374_v60 = vmul.f32 %v4482_v34, %v3138_v31 }
 0x3cd   : > { %v3584_v48 = vadd.f32 %v3506_v9, %v3373_v35  ;;  %v4486_v9 = vsel %vm3264_vm0, 1.0, %v5284_v38  ;;  %v3231_v35 = vadd.s32 %v6412_v43, %v3198_v57 }
 0x3ce   : > { %v3680_v20 = vpack.c.bf16 %v3374_v60, %v3374_v60  ;;  %v3514_v60 = vsel %vm1835_vm1, %v3511_v8, %v3513_v12 }
 0x3cf   : > { %v3616_v42 = vpack.c.bf16 %v3584_v48, %v3584_v48  ;;  %vm3265_vm2 = vcmp.lt.s32.totalorder %v3231_v35, %v6441_v4 }
 0x3d0   : > { %3712 = vst [vmem:[%s5533_s9 + $0x8c] sm:$0xf] %v3680_v20  ;;  %v3051_v36 = vpop.f32.mrf.mxu0 }
 0x3d1   : > { %3648 = vst [vmem:[%s5533_s9 + $0x88] sm:$0xf] %v3616_v42  ;;  %v3052_v7 = vadd.f32 %v3051_v36, %v6438_v1  ;;  %v3140_v58 = vpop.f32.mrf.mxu1 }
 0x3d2   : > { %v3141_v33 = vadd.f32 %v3140_v58, %v6454_v0  ;;  %v1329_v58 = vld [vmem:[%s5506_s24 + $0x60] sm:$0xff]  }
 0x3d3   : > { %v3375_v24 = vmul.f32 %v4483_v63, %v3052_v7  ;;  %v3427_v25 = vunpack.c.l.bf16 %v1329_v58  ;;  %v3428_v55 = vunpack.c.h.bf16 %v1329_v58  ;;  %v3203_v58 = vadd.s32 216, %v6407_v53 }
 0x3d4   : > { %v3376_v49 = vmul.f32 %v4483_v63, %v3141_v33  ;;  %v3515_v63 = vrot.slane %v3426_v2, 2 }
 0x3d5   : > { %v3585_v29 = vadd.f32 %v3508_v15, %v3375_v24  ;;  %v4487_v15 = vsel %vm3265_vm2, 1.0, %v5284_v38  ;;  %v3232_v24 = vadd.s32 %v6412_v43, %v3199_v44 }
 0x3d6   : > { %v3681_v40 = vpack.c.bf16 %v3376_v49, %v3376_v49  ;;  %v3516_v49 = vsel %vm1835_vm1, %v3513_v12, %v3515_v63 }
 0x3d7   : > { %v3617_v37 = vpack.c.bf16 %v3585_v29, %v3585_v29  ;;  %vm3266_vm3 = vcmp.lt.s32.totalorder %v3232_v24, %v6441_v4 }
 0x3d8   : > { %3713 = vst [vmem:[%s5533_s9 + $0x94] sm:$0xf] %v3681_v40  ;;  %v3053_v56 = vpop.f32.mrf.mxu0 }
 0x3d9   : > { %3649 = vst [vmem:[%s5533_s9 + $0x90] sm:$0xf] %v3617_v37  ;;  %v3054_v3 = vadd.f32 %v3053_v56, %v6438_v1  ;;  %v3142_v30 = vpop.f32.mrf.mxu1  ;;  %v3200_v56 = vadd.s32 192, %v6407_v53 }
 0x3da   : > { %v3143_v27 = vadd.f32 %v3142_v30, %v6454_v0 }
 0x3db   : > { %v3377_v28 = vmul.f32 %v4484_v14, %v3054_v3  ;;  %v3517_v3 = vrot.slane %v3427_v25, 2 }
 0x3dc   : > { %v3378_v46 = vmul.f32 %v4484_v14, %v3143_v27 }
 0x3dd   : > { %v3586_v59 = vadd.f32 %v3510_v5, %v3377_v28  ;;  %v4488_v5 = vsel %vm3266_vm3, 1.0, %v5284_v38  ;;  %v3233_v28 = vadd.s32 %v6412_v43, %v3200_v56 }
 0x3de   : > { %v3682_v61 = vpack.c.bf16 %v3378_v46, %v3378_v46  ;;  %v3518_v46 = vsel %vm1835_vm1, %v3515_v63, %v3517_v3 }
 0x3df   : > { %v3618_v11 = vpack.c.bf16 %v3586_v59, %v3586_v59  ;;  %vm3267_vm4 = vcmp.lt.s32.totalorder %v3233_v28, %v6441_v4 }
 0x3e0   : > { %3714 = vst [vmem:[%s5533_s9 + $0x9c] sm:$0xf] %v3682_v61  ;;  %v3056_v41 = vpop.f32.mrf.mxu0 }
 0x3e1   : > { %3650 = vst [vmem:[%s5533_s9 + $0x98] sm:$0xf] %v3618_v11  ;;  %v3057_v18 = vadd.f32 %v3056_v41, %v6438_v1  ;;  %v3145_v23 = vpop.f32.mrf.mxu1 }
 0x3e2   : > { %v3146_v51 = vadd.f32 %v3145_v23, %v6454_v0  ;;  %v1331_v23 = vld [vmem:[%s5506_s24 + $0x68] sm:$0xff]  }
 0x3e3   : > { %v3379_v17 = vmul.f32 %v4485_v62, %v3057_v18  ;;  %v3429_v57 = vunpack.c.l.bf16 %v1331_v23  ;;  %v3430_v44 = vunpack.c.h.bf16 %v1331_v23  ;;  %v3205_v23 = vadd.s32 232, %v6407_v53 }
 0x3e4   : > { %v3380_v19 = vmul.f32 %v4485_v62, %v3146_v51  ;;  %v3519_v62 = vrot.slane %v3428_v55, 2 }
 0x3e5   : > { %v3587_v6 = vadd.f32 %v3512_v10, %v3379_v17  ;;  %v4489_v10 = vsel %vm3267_vm4, 1.0, %v5284_v38  ;;  %v3234_v17 = vadd.s32 %v6412_v43, %v3201_v52 }
 0x3e6   : > { %v3683_v34 = vpack.c.bf16 %v3380_v19, %v3380_v19  ;;  %v3520_v19 = vsel %vm1835_vm1, %v3517_v3, %v3519_v62 }
 0x3e7   : > { %v3619_v39 = vpack.c.bf16 %v3587_v6, %v3587_v6  ;;  %vm3268_vm5 = vcmp.lt.s32.totalorder %v3234_v17, %v6441_v4 }
 0x3e8   : > { %3715 = vst [vmem:[%s5533_s9 + $0xa4] sm:$0xf] %v3683_v34  ;;  %v3058_v54 = vpop.f32.mrf.mxu0 }
 0x3e9   : > { %3651 = vst [vmem:[%s5533_s9 + $0xa0] sm:$0xf] %v3619_v39  ;;  %v3059_v31 = vadd.f32 %v3058_v54, %v6438_v1  ;;  %v3147_v45 = vpop.f32.mrf.mxu1  ;;  %v3202_v54 = vadd.s32 208, %v6407_v53 }
 0x3ea   : > { %v3148_v48 = vadd.f32 %v3147_v45, %v6454_v0 }
 0x3eb   : > { %v3381_v20 = vmul.f32 %v4486_v9, %v3059_v31  ;;  %v3521_v31 = vrot.slane %v3429_v57, 2 }
 0x3ec   : > { %v3382_v16 = vmul.f32 %v4486_v9, %v3148_v48 }
 0x3ed   : > { %v3588_v42 = vadd.f32 %v3514_v60, %v3381_v20  ;;  %v4490_v60 = vsel %vm3268_vm5, 1.0, %v5284_v38  ;;  %v3235_v20 = vadd.s32 %v6412_v43, %v3202_v54 }
 0x3ee   : > { %v3684_v36 = vpack.c.bf16 %v3382_v16, %v3382_v16  ;;  %v3522_v16 = vsel %vm1835_vm1, %v3519_v62, %v3521_v31 }
 0x3ef   : > { %v3620_v7 = vpack.c.bf16 %v3588_v42, %v3588_v42  ;;  %vm3269_vm6 = vcmp.lt.s32.totalorder %v3235_v20, %v6441_v4 }
 0x3f0   : > { %3716 = vst [vmem:[%s5533_s9 + $0xac] sm:$0xf] %v3684_v36  ;;  %v3061_v26 = vpop.f32.mrf.mxu0 }
 0x3f1   : > { %3652 = vst [vmem:[%s5533_s9 + $0xa8] sm:$0xf] %v3620_v7  ;;  %v3062_v33 = vadd.f32 %v3061_v26, %v6438_v1  ;;  %v3150_v13 = vpop.f32.mrf.mxu1 }
 0x3f2   : > { %v3151_v29 = vadd.f32 %v3150_v13, %v6454_v0  ;;  %v1333_v13 = vld [vmem:[%s5506_s24 + $0x70] sm:$0xff]  }
 0x3f3   : > { %v3383_v40 = vmul.f32 %v4487_v15, %v3062_v33  ;;  %v3431_v56 = vunpack.c.l.bf16 %v1333_v13  ;;  %v3432_v52 = vunpack.c.h.bf16 %v1333_v13  ;;  %v3207_v13 = vadd.s32 248, %v6407_v53 }
 0x3f4   : > { %v3384_v47 = vmul.f32 %v4487_v15, %v3151_v29  ;;  %v3523_v15 = vrot.slane %v3430_v44, 2 }
 0x3f5   : > { %v3589_v37 = vadd.f32 %v3516_v49, %v3383_v40  ;;  %v4491_v49 = vsel %vm3269_vm6, 1.0, %v5284_v38  ;;  %v3236_v40 = vadd.s32 %v6412_v43, %v3203_v58 }
 0x3f6   : > { %v3685_v14 = vpack.c.bf16 %v3384_v47, %v3384_v47  ;;  %v3524_v47 = vsel %vm1835_vm1, %v3521_v31, %v3523_v15 }
 0x3f7   : > { %v3621_v30 = vpack.c.bf16 %v3589_v37, %v3589_v37  ;;  %vm3270_vm7 = vcmp.lt.s32.totalorder %v3236_v40, %v6441_v4 }
 0x3f8   : > { %3717 = vst [vmem:[%s5533_s9 + $0xb4] sm:$0xf] %v3685_v14  ;;  %v3063_v32 = vpop.f32.mrf.mxu0 }
 0x3f9   : > { %3653 = vst [vmem:[%s5533_s9 + $0xb0] sm:$0xf] %v3621_v30  ;;  %v3064_v27 = vadd.f32 %v3063_v32, %v6438_v1  ;;  %v3152_v50 = vpop.f32.mrf.mxu1  ;;  %v3204_v32 = vadd.s32 224, %v6407_v53 }
 0x3fa   : > { %v3153_v59 = vadd.f32 %v3152_v50, %v6454_v0 }
 0x3fb   : > { %v3385_v61 = vmul.f32 %v4488_v5, %v3064_v27  ;;  %v3525_v27 = vrot.slane %v3431_v56, 2  ;;  %v3240_v56 = vadd.s32 %v6412_v43, %v3207_v13 }
 0x3fc   : > { %v3386_v8 = vmul.f32 %v4488_v5, %v3153_v59 }
 0x3fd   : > { %v3590_v11 = vadd.f32 %v3518_v46, %v3385_v61  ;;  %v4492_v46 = vsel %vm3270_vm7, 1.0, %v5284_v38  ;;  %v3237_v61 = vadd.s32 %v6412_v43, %v3204_v32  ;;  %vm3274_vm11 = vcmp.lt.s32.totalorder %v3240_v56, %v6441_v4 }
 0x3fe   : > { %v3686_v41 = vpack.c.bf16 %v3386_v8, %v3386_v8  ;;  %v3526_v8 = vsel %vm1835_vm1, %v3523_v15, %v3525_v27 }
 0x3ff   : > { %v3622_v18 = vpack.c.bf16 %v3590_v11, %v3590_v11  ;;  %vm3271_vm8 = vcmp.lt.s32.totalorder %v3237_v61, %v6441_v4 }
 0x400   : > { %3718 = vst [vmem:[%s5533_s9 + $0xbc] sm:$0xf] %v3686_v41  ;;  %v3066_v22 = vpop.f32.mrf.mxu0 }
 0x401   : > { %3654 = vst [vmem:[%s5533_s9 + $0xb8] sm:$0xf] %v3622_v18  ;;  %v3067_v51 = vadd.f32 %v3066_v22, %v6438_v1  ;;  %v3155_v21 = vpop.f32.mrf.mxu1 }
 0x402   : > { %v3156_v6 = vadd.f32 %v3155_v21, %v6454_v0  ;;  %v1335_v21 = vld [vmem:[%s5506_s24 + $0x78] sm:$0xff]  }
 0x403   : > { %v3387_v34 = vmul.f32 %v4489_v10, %v3067_v51  ;;  %v3433_v54 = vunpack.c.l.bf16 %v1335_v21  ;;  %v3434_v58 = vunpack.c.h.bf16 %v1335_v21 }
 0x404   : > { %v3388_v12 = vmul.f32 %v4489_v10, %v3156_v6  ;;  %v3527_v10 = vrot.slane %v3432_v52, 2 }
 0x405   : > { %v3591_v39 = vadd.f32 %v3520_v19, %v3387_v34  ;;  %v4493_v19 = vsel %vm3271_vm8, 1.0, %v5284_v38  ;;  %v3238_v34 = vadd.s32 %v6412_v43, %v3205_v23 }
 0x406   : > { %v3687_v9 = vpack.c.bf16 %v3388_v12, %v3388_v12  ;;  %v3528_v12 = vsel %vm1835_vm1, %v3525_v27, %v3527_v10 }
 0x407   : > { %v3623_v45 = vpack.c.bf16 %v3591_v39, %v3591_v39  ;;  %vm3272_vm9 = vcmp.lt.s32.totalorder %v3238_v34, %v6441_v4 }
 0x408   : > { %3719 = vst [vmem:[%s5533_s9 + $0xc4] sm:$0xf] %v3687_v9  ;;  %v3068_v35 = vpop.f32.mrf.mxu0 }
 0x409   : > { %3655 = vst [vmem:[%s5533_s9 + $0xc0] sm:$0xf] %v3623_v45  ;;  %v3069_v48 = vadd.f32 %v3068_v35, %v6438_v1  ;;  %v3157_v2 = vpop.f32.mrf.mxu1  ;;  %v3206_v35 = vadd.s32 240, %v6407_v53 }
 0x40a   : > { %v3158_v42 = vadd.f32 %v3157_v2, %v6454_v0 }
 0x40b   : > { %v3389_v36 = vmul.f32 %v4490_v60, %v3069_v48  ;;  %v3529_v48 = vrot.slane %v3433_v54, 2 }
 0x40c   : > { %v3390_v63 = vmul.f32 %v4490_v60, %v3158_v42 }
 0x40d   : > { %v3592_v7 = vadd.f32 %v3522_v16, %v3389_v36  ;;  %v4494_v16 = vsel %vm3272_vm9, 1.0, %v5284_v38  ;;  %v3239_v36 = vadd.s32 %v6412_v43, %v3206_v35 }
 0x40e   : > { %v3688_v26 = vpack.c.bf16 %v3390_v63, %v3390_v63  ;;  %v3530_v63 = vsel %vm1835_vm1, %v3527_v10, %v3529_v48 }
 0x40f   : > { %v3624_v33 = vpack.c.bf16 %v3592_v7, %v3592_v7  ;;  %vm3273_vm10 = vcmp.lt.s32.totalorder %v3239_v36, %v6441_v4 }
 0x410   : > { %3720 = vst [vmem:[%s5533_s9 + $0xcc] sm:$0xf] %v3688_v26  ;;  %v3071_v24 = vpop.f32.mrf.mxu0  ;;  %v4495_v40 = vsel %vm3273_vm10, 1.0, %v5284_v38 }
 0x411   : > { %3656 = vst [vmem:[%s5533_s9 + $0xc8] sm:$0xf] %v3624_v33  ;;  %v3072_v29 = vadd.f32 %v3071_v24, %v6438_v1  ;;  %v3160_v25 = vpop.f32.mrf.mxu1 }
 0x412   : > { %v3161_v37 = vadd.f32 %v3160_v25, %v6454_v0 }
 0x413   : > { %v3391_v14 = vmul.f32 %v4491_v49, %v3072_v29 }
 0x414   : > { %v3392_v3 = vmul.f32 %v4491_v49, %v3161_v37  ;;  %v3531_v49 = vrot.slane %v3434_v58, 2 }
 0x415   : > { %v3593_v30 = vadd.f32 %v3524_v47, %v3391_v14  ;;  %v4974_v14 = vld [vmem:[%s5506_s24 + $0x80] sm:$0x1] }
 0x416   : > { %v3689_v5 = vpack.c.bf16 %v3392_v3, %v3392_v3  ;;  %v3435_v3 = vunpack.c.l.bf16 %v4974_v14  ;;  %v3532_v53 = vsel %vm1835_vm1, %v3529_v48, %v3531_v49 }
 0x417   : > { %v3625_v50 = vpack.c.bf16 %v3593_v30, %v3593_v30 }
 0x418   : > { %3721 = vst [vmem:[%s5533_s9 + $0xd4] sm:$0xf] %v3689_v5  ;;  %v3073_v28 = vpop.f32.mrf.mxu0 }
 0x419   : > { %3657 = vst [vmem:[%s5533_s9 + $0xd0] sm:$0xf] %v3625_v50  ;;  %v3074_v59 = vadd.f32 %v3073_v28, %v6438_v1  ;;  %v3162_v55 = vpop.f32.mrf.mxu1  ;;  %v3533_v50 = vrot.slane %v3435_v3, 2 }
 0x41a   : > { %v3163_v11 = vadd.f32 %v3162_v55, %v6454_v0 }
 0x41b   : > { %v3393_v41 = vmul.f32 %v4492_v46, %v3074_v59  ;;  %v4496_v59 = vsel %vm3274_vm11, 1.0, %v5284_v38  ;;  %v3534_v4 = vsel %vm1835_vm1, %v3531_v49, %v3533_v50 }
 0x41c   : > { %v3394_v62 = vmul.f32 %v4492_v46, %v3163_v11 }
 0x41d   : > { %v3594_v18 = vadd.f32 %v3526_v8, %v3393_v41 }
 0x41e   : > { %v3690_v22 = vpack.c.bf16 %v3394_v62, %v3394_v62 }
 0x41f   : > { %v3626_v51 = vpack.c.bf16 %v3594_v18, %v3594_v18 }
 0x420   : > { %3722 = vst [vmem:[%s5533_s9 + $0xdc] sm:$0xf] %v3690_v22  ;;  %v3076_v17 = vpop.f32.mrf.mxu0 }
 0x421   : > { %3658 = vst [vmem:[%s5533_s9 + $0xd8] sm:$0xf] %v3626_v51  ;;  %v3077_v6 = vadd.f32 %v3076_v17, %v6438_v1  ;;  %v3165_v57 = vpop.f32.mrf.mxu1 }
 0x422   : > { %v3166_v39 = vadd.f32 %v3165_v57, %v6454_v0 }
 0x423   : > { %v3395_v9 = vmul.f32 %v4493_v19, %v3077_v6 }
 0x424   : > { %v3396_v31 = vmul.f32 %v4493_v19, %v3166_v39 }
 0x425   : > { %v3595_v45 = vadd.f32 %v3528_v12, %v3395_v9 }
 0x426   : > { %v3691_v60 = vpack.c.bf16 %v3396_v31, %v3396_v31 }
 0x427   : > { %v3627_v2 = vpack.c.bf16 %v3595_v45, %v3595_v45 }
 0x428   : > { %3723 = vst [vmem:[%s5533_s9 + $0xe4] sm:$0xf] %v3691_v60  ;;  %v3078_v20 = vpop.f32.mrf.mxu0 }
 0x429   : > { %3659 = vst [vmem:[%s5533_s9 + $0xe0] sm:$0xf] %v3627_v2  ;;  %v3079_v42 = vadd.f32 %v3078_v20, %v6438_v1  ;;  %v3167_v44 = vpop.f32.mrf.mxu1 }
 0x42a   : > { %v3168_v7 = vadd.f32 %v3167_v44, %v6454_v0 }
 0x42b   : > { %v3397_v26 = vmul.f32 %v4494_v16, %v3079_v42 }
 0x42c   : > { %v3398_v15 = vmul.f32 %v4494_v16, %v3168_v7 }
 0x42d   : > { %v3596_v33 = vadd.f32 %v3530_v63, %v3397_v26 }
 0x42e   : > { %v3692_v24 = vpack.c.bf16 %v3398_v15, %v3398_v15 }
 0x42f   : > { %v3628_v29 = vpack.c.bf16 %v3596_v33, %v3596_v33 }
 0x430   : > { %3724 = vst [vmem:[%s5533_s9 + $0xec] sm:$0xf] %v3692_v24  ;;  %v3081_v25 = vpop.f32.mrf.mxu0 }
 0x431   : > { %3660 = vst [vmem:[%s5533_s9 + $0xe8] sm:$0xf] %v3628_v29  ;;  %v3082_v47 = vadd.f32 %v3081_v25, %v6438_v1  ;;  %v3170_v37 = vpop.f32.mrf.mxu1 }
 0x432   : > { %v3171_v30 = vadd.f32 %v3170_v37, %v6454_v0 }
 0x433   : > { %v3399_v32 = vmul.f32 %v4495_v40, %v3082_v47 }
 0x434   : > { %v3400_v5 = vmul.f32 %v4495_v40, %v3171_v30 }
 0x435   : > { %v3597_v27 = vadd.f32 %v3532_v53, %v3399_v32 }
 0x436   : > { %v3693_v28 = vpack.c.bf16 %v3400_v5, %v3400_v5 }
 0x437   : > { %v3629_v46 = vpack.c.bf16 %v3597_v27, %v3597_v27 }
 0x438   : > { %3725 = vst [vmem:[%s5533_s9 + $0xf4] sm:$0xf] %v3693_v28  ;;  %v3083_v43 = vpop.f32.mrf.mxu0 }
 0x439   : > { %3661 = vst [vmem:[%s5533_s9 + $0xf0] sm:$0xf] %v3629_v46  ;;  %v3084_v55 = vadd.f32 %v3083_v43, %v6438_v1  ;;  %v3172_v61 = vpop.f32.mrf.mxu1 }
 0x43a   : > { %v3173_v8 = vadd.f32 %v3172_v61, %v6454_v0 }
 0x43b   : > { %v3401_v11 = vmul.f32 %v4496_v59, %v3084_v55 }
 0x43c   : > { %v3402_v52 = vmul.f32 %v4496_v59, %v3173_v8 }
 0x43d   : > { %v3598_v38 = vadd.f32 %v3534_v4, %v3401_v11 }
 0x43e   : > { %v3694_v41 = vpack.c.bf16 %v3402_v52, %v3402_v52 }
 0x43f   : > { %v3630_v62 = vpack.c.bf16 %v3598_v38, %v3598_v38 }
 0x440   : > { %3726 = vst [vmem:[%s5533_s9 + $0xfc] sm:$0xf] %v3694_v41 }
 0x441   : > { %3662 = vst [vmem:[%s5533_s9 + $0xf8] sm:$0xf] %v3630_v62 }
 0x442   : > { %5190 = shalt.err (!%p5187_p2)
}
 0x443   : > { %s5285_s21 = smov 128   ;;  %s5286_s9 = smov 8  }
 0x444   : > { %4673 = dma.vmem_to_hbm [thread:$0]  (%p5439_p3), %s3744_s27, 4096, %s3746_s20, %s3728_s7, %s5285_s21, %s5285_s21, %s5286_s9  }
 0x445 PF: > { %s7513_s4 = sld [smem:[#allocation27_spill]]  ;;  %p4702_p4 = scmp.ge.s32.totalorder %s5273_s15, 2 }
 0x446   : > { %s7514_s25 = sld [smem:[#allocation29_spill]] }
 0x44b   : > { %s3760_s13 = sand.u32 1, %s7513_s4  }
 0x44c   : > { %p7515_p1 = scmp.ne.s32.totalorder %s7514_s25, 0  ;;  %s3761_s8 = scalar_lea.sflag [#allocation8], %s3760_s13 }
 0x44e   : > { %p4690_p10 = pnand %p4702_p4, %p7515_p1 }
 0x450   : > { %p4691_p11 = pneg %p4690_p10 }
 0x452   : > { %5240 = dma.done.wait (%p4691_p11), %s3761_s8, 4096  }
 0x453   : > { %5242 = vsyncadd (%p4691_p11), %s3761_s8, 4294963200  ;;  %s34_s15 = sadd.s32 1, %s5273_s15   ;;  %s7516_s12 = sld [smem:[#allocation28_spill]] }
 0x454   : > { %p31_p8 = scmp.ge.s32.totalorder %s34_s15, 10   ;;  %s7517_s13 = sld [smem:[#allocation30_spill]] }
 0x455   : > { %s7518_s9 = smov %s5249_s10  ;;  %s7519_s10 = smov %s5253_s11 }
 0x456   : > { %s7520_s11 = smov %s5456_s6  ;;  %s7521_s0 = smov %s5269_s14 }
 0x457   : > { %s7522_s14 = smov %s7528_s3  ;;  %33 = sbr.rel (!%p31_p8) target bundleno = 19 (0x13), region = 128 }
 0x45c   :  { %3767 = vsyncpa [#allocation7], 1 }
 0x45d   :  { %3769 = vsyncpa [#allocation7 + $0x1], 1 }
 0x45e   :  { %3770 = vsyncpa [#allocation10], 1 }
 0x45f   :  { %3771 = vsyncpa [#allocation13], 1 }
 0x460   :  { %3772 = vsyncpa [#allocation8], 1 }
 0x461   :  { %3774 = vsyncpa [#allocation8 + $0x1], 1 }
 0x462   :  { %3775 = vsyncmov [#allocation3] }
 0x465   :  { %s3776_s24 = vpop.sfrf %3775 }
 0x466   :  { %p4504_p3 = scmp.ne.s32.totalorder %s3776_s24, 0 }
 0x468   :  { %3780 = shalt.err (%p4504_p3)  }
 0x469   :  { %3782 = vsyncmov [#allocation3 + $0x1] }
 0x46c   :  { %s3783_s6 = vpop.sfrf %3782 }
 0x46d   :  { %p4505_p12 = scmp.ne.s32.totalorder %s3783_s6, 0 }
 0x46f   :  { %3787 = shalt.err (%p4505_p12)  }

</bundles_post_ra>
